<compile_context>
chip_gen: v5e
topology: v5e:2x2
jax: 0.10.0
libtpu: 0.0.40
codegen_flags: <defaults>
</compile_context>

<pallas_src>
import math

import jax
import jax.numpy as jnp
import numpy as np
from jax.experimental import pallas as pl
from jax.experimental.pallas import tpu as pltpu


# ----------------------------------------------------------------------------
# Fused Pallas kernel (built per static layer configuration)
# ----------------------------------------------------------------------------
def _make_fused_kernel(att_identity, n_seg, seg_cols):
    """att_identity: tuple[bool] per Attention block; True => value/out are identity.
    n_seg:    number of point clouds (batch elements) per grid step.
    seg_cols: number of points (lane columns) per point cloud."""
    ncols = n_seg * seg_cols

    def kernel(*refs):
        o_ref = refs[-1]
        it = iter(refs[:-1])

        def nxt():
            return next(it)[...]

        def mxu(w_bf16, a_f32):
            # bf16 operands on the MXU, f32 accumulate; elementwise math stays f32.
            return jnp.dot(w_bf16, a_f32.astype(jnp.bfloat16),
                           preferred_element_type=jnp.float32)

        x = nxt()                                                   # (Cin0, ncols) f32

        # ---- first point_block(in, hidden0, None, norm=False): Conv1d only ----
        w = nxt(); b = nxt()
        x = mxu(w, x) + b                                           # (H0, ncols) f32

        # Column index (only needed to stitch per-segment gates when n_seg > 1).
        col = None
        if n_seg > 1:
            col = jax.lax.broadcasted_iota(jnp.int32, (1, ncols), 1)

        # ---- 5 Attention blocks ----
        for identity in att_identity:
            bn1s = nxt(); bn1b = nxt()
            w1 = nxt();   b1 = nxt()
            bn2s = nxt(); bn2b = nxt()
            wq = nxt();   bq = nxt()

            # point_blocks: BN -> ReLU -> Conv1d(1x1), over the whole column block.
            h = jnp.maximum(x * bn1s + bn1b, 0.0)                   # (Cin, ncols)
            h = mxu(w1, h) + b1                                     # (H, ncols)

            # Per point cloud: max over points -> query point_block -> sigmoid gate.
            gates = []
            for j in range(n_seg):
                pooled = jnp.max(h[:, j * seg_cols:(j + 1) * seg_cols],
                                 axis=1, keepdims=True)             # (H, 1)
                qa = jnp.maximum(pooled * bn2s + bn2b, 0.0)         # (H, 1)
                q = mxu(wq, qa) + bq                                # (Cout, 1)
                # sigmoid on the EUP slot
                gates.append(pl.reciprocal(1.0 + jnp.exp(-q), approx=True))

            gate = gates[0]                                         # (Cout, 1)
            for j in range(1, n_seg):
                gate = jnp.where(col >= j * seg_cols, gates[j], gate)  # (Cout, ncols)

            if identity:
                # value/out are nn.Sequential() -> identity: gate*x + x
                x = x * (gate + 1.0)
            else:
                # Packed value|out conv: one matmul produces both halves.
                wvo = nxt(); bvo = nxt()
                cout = wvo.shape[0] // 2                            # 8-aligned slice point
                vo = mxu(wvo, x) + bvo                              # (2*Cout, ncols)
                x = gate * vo[:cout, :] + vo[cout:, :]              # (Cout, ncols)

        # ---- last point_block(ins[-1], n_classes, None): BN folded into conv ----
        w = nxt(); bias = nxt()
        o_ref[...] = mxu(w, x) + bias

    return kernel


# ----------------------------------------------------------------------------
# pallas_call wrapper: one fused call, grid over column blocks (parallel axis)
# ----------------------------------------------------------------------------
def point_att_seg_forward(x, params, *, batch_block=None):
    """x: (B, C, N) — PyTorch Conv1d NCL layout; returns (B, n_classes, N)."""
    B, Cin, N = x.shape
    n_classes = params["last"]["w"].shape[0]
    att_identity = tuple("wvo" not in p for p in params["atts"])

    if batch_block is None:
        batch_block = 2 if B % 2 == 0 else 1     # even grid extent feeds both v7x TCs
    assert B % batch_block == 0, "batch_block must divide B"
    bb = batch_block
    ncols = bb * N                               # MXU columns per grid step

    # Lane-dense (C, B*N) slab: one host-side transpose so every conv streams
    # bb*N columns through the MXU per grid step.
    x_cols = jnp.transpose(x.astype(jnp.float32), (1, 0, 2)).reshape(Cin, B * N)

    bf16 = jnp.bfloat16
    weights = []

    def add(a, dtype=None):
        weights.append(a.astype(dtype) if dtype is not None else a)

    f = params["first"]
    add(f["w"], bf16); add(f["b"])
    for p in params["atts"]:
        add(p["bn1_s"]); add(p["bn1_b"])
        add(p["w1"], bf16); add(p["b1"])
        add(p["bn2_s"]); add(p["bn2_b"])
        add(p["wq"], bf16); add(p["bq"])
        if "wvo" in p:
            add(p["wvo"], bf16); add(p["bvo"])
    # Fold the last BatchNorm into the last conv (exact; no ReLU in between):
    #   W (s*x + b) + bias = (W * s^T) x + (W b + bias)
    l = params["last"]
    add(l["w"] * l["s"].reshape(1, -1), bf16)
    add(l["w"] @ l["b"] + l["bias"])

    # Input/output are pipelined column blocks; all weights are whole-array,
    # un-pipelined VMEM residents (no per-step index_map, no double buffering).
    in_specs = [pl.BlockSpec((Cin, ncols), lambda g: (0, g))]
    in_specs += [pl.BlockSpec(memory_space=pltpu.MemorySpace.VMEM)] * len(weights)
    out_spec = pl.BlockSpec((n_classes, ncols), lambda g: (0, g))

    # Explicit scoped-VMEM budget: live activation slabs (x, h, vo + bf16 casts)
    # plus double-buffered input/output blocks, with headroom, capped at 64 MiB
    # so it is valid on v7x (64 MiB/TC) as well as v5e/v6e.
    max_rows = max(w.shape[0] for w in weights)
    act_bytes = 6 * max_rows * ncols * 4
    io_bytes = 2 * (Cin + n_classes) * ncols * 4
    vmem_limit = int(min(64 * 2**20, max(32 * 2**20, 2 * (act_bytes + io_bytes))))

    out_cols = pl.pallas_call(
        _make_fused_kernel(att_identity, bb, N),
        out_shape=jax.ShapeDtypeStruct((n_classes, B * N), jnp.float32),
        grid=(B // bb,),
        in_specs=in_specs,
        out_specs=out_spec,
        compiler_params=pltpu.CompilerParams(
            dimension_semantics=("parallel",),
            vmem_limit_bytes=vmem_limit),
    )(x_cols, *weights)

    return jnp.transpose(out_cols.reshape(n_classes, B, N), (1, 0, 2))


# ----------------------------------------------------------------------------
# Deterministic parameter init (mirrors the module's __init__ shapes, NCL form)
# ----------------------------------------------------------------------------
def _init_bn(key, c):
    k1, k2, k3, k4 = jax.random.split(key, 4)
    gamma = 1.0 + 0.1 * jax.random.normal(k1, (c,), dtype=jnp.float32)
    beta = 0.1 * jax.random.normal(k2, (c,), dtype=jnp.float32)
    mean = 0.1 * jax.random.normal(k3, (c,), dtype=jnp.float32)
    var = jax.random.uniform(k4, (c,), minval=0.5, maxval=1.5, dtype=jnp.float32)
    scale = gamma / jnp.sqrt(var + 1e-5)
    bias = beta - mean * scale
    return scale.reshape(c, 1), bias.reshape(c, 1)


def _init_conv(key, cin, cout):
    # Conv1d(cin, cout, kernel_size=1): weight (cout, cin, 1) stored as (cout, cin).
    k1, k2 = jax.random.split(key)
    bound = 1.0 / math.sqrt(cin)
    w = jax.random.uniform(k1, (cout, cin), minval=-bound, maxval=bound, dtype=jnp.float32)
    b = jax.random.uniform(k2, (cout, 1), minval=-bound, maxval=bound, dtype=jnp.float32)
    return w, b


def _init_attention(key, cin, cout):
    hidden = cout  # hidden_dims=None -> out_channel
    ks = jax.random.split(key, 6)
    bn1_s, bn1_b = _init_bn(ks[0], cin)
    w1, b1 = _init_conv(ks[1], cin, hidden)
    bn2_s, bn2_b = _init_bn(ks[2], hidden)
    wq, bq = _init_conv(ks[3], hidden, cout)
    p = dict(bn1_s=bn1_s, bn1_b=bn1_b, w1=w1, b1=b1,
             bn2_s=bn2_s, bn2_b=bn2_b, wq=wq, bq=bq)
    if cin != cout:
        wv, bv = _init_conv(ks[4], cin, cout)
        wo, bo = _init_conv(ks[5], cin, cout)
        p["wvo"] = jnp.concatenate([wv, wo], axis=0)   # (2*cout, cin): packed value|out
        p["bvo"] = jnp.concatenate([bv, bo], axis=0)   # (2*cout, 1)
    # else: value / out are nn.Sequential() -> identity, handled statically in the kernel
    return p


def init_point_att_seg(key, input_nc, hidden_dims, n_classes):
    ins = [input_nc] + list(hidden_dims)
    ks = jax.random.split(key, 8)
    # point_block(ins[0], hidden_dims[0], None, False): Conv1d only, no norm.
    w_first, b_first = _init_conv(ks[0], ins[0], hidden_dims[0])
    first = dict(w=w_first, b=b_first)
    atts = [
        _init_attention(ks[1], hidden_dims[0], hidden_dims[0]),
        _init_attention(ks[2], ins[1], hidden_dims[1]),
        _init_attention(ks[3], ins[2], hidden_dims[2]),
        _init_attention(ks[4], ins[3], hidden_dims[3]),
        _init_attention(ks[5], ins[4], hidden_dims[4]),
    ]
    # point_block(ins[5], n_classes, None): BN(ins[5]) + Conv1d(ins[5], n_classes).
    bn_s, bn_b = _init_bn(ks[6], ins[5])
    w_last, b_last = _init_conv(ks[7], ins[5], n_classes)
    last = dict(s=bn_s, b=bn_b, w=w_last, bias=b_last)
    return dict(first=first, atts=atts, last=last)


# ----------------------------------------------------------------------------
# Pure-JAX reference (same math as the PyTorch module, eval-mode BN folded,
# full f32, exact sigmoid, unfolded last BN)
# ----------------------------------------------------------------------------
def _conv1x1(w, b, x):
    # w: (Cout, Cin), x: (B, Cin, N) -> (B, Cout, N)
    return jnp.einsum("oc,bcn->bon", w, x) + b


def point_att_seg_ref(x, params):
    x = x.astype(jnp.float32)
    f = params["first"]
    x = _conv1x1(f["w"], f["b"], x)
    for p in params["atts"]:
        h = jnp.maximum(x * p["bn1_s"] + p["bn1_b"], 0.0)
        h = _conv1x1(p["w1"], p["b1"], h)
        pooled = jnp.max(h, axis=2, keepdims=True)
        q = jnp.maximum(pooled * p["bn2_s"] + p["bn2_b"], 0.0)
        q = _conv1x1(p["wq"], p["bq"], q)
        gate = jax.nn.sigmoid(q)
        if "wvo" in p:
            vo = _conv1x1(p["wvo"], p["bvo"], x)
            cout = p["wvo"].shape[0] // 2
            x = gate * vo[:, :cout, :] + vo[:, cout:, :]
        else:
            x = x * (gate + 1.0)
    l = params["last"]
    x = x * l["s"] + l["b"]
    return _conv1x1(l["w"], l["bias"], x)


# ----------------------------------------------------------------------------
if __name__ == "__main__":
    B, N = 4, 512               # N multiple of 128; grid = B/batch_block = 2 (even -> both v7x TCs)
    input_nc = 4
    hidden_dims = [16, 16, 32, 32, 16]
    n_classes = 2

    key = jax.random.PRNGKey(0)
    kp, kx = jax.random.split(key)
    params = init_point_att_seg(kp, input_nc, hidden_dims, n_classes)
    x = jax.random.normal(kx, (B, input_nc, N), dtype=jnp.float32)

    out = jax.block_until_ready(point_att_seg_forward(x, params))
    assert out.shape == (B, n_classes, N), out.shape

    ref = jax.block_until_ready(point_att_seg_ref(x, params))
    # Tolerance sized for bf16 MXU operands across the 8 chained 1x1-conv layers
    # plus the approx-reciprocal sigmoid (elementwise math stays f32; the
    # reference above is pure f32 with exact sigmoid and unfolded last BN).
    np.testing.assert_allclose(np.asarray(out), np.asarray(ref), rtol=5e-2, atol=5e-2)

    print("KERNEL_OK")
</pallas_src>

<mosaic_0001>
module attributes {stable_mosaic.version = 11 : i64} {
  func.func @kernel(%arg0: i32, %arg1: memref<4x1024xf32, #tpu.memory_space<vmem>>, %arg2: memref<16x4xbf16, #tpu.memory_space<vmem>>, %arg3: memref<16x1xf32, #tpu.memory_space<vmem>>, %arg4: memref<16x1xf32, #tpu.memory_space<vmem>>, %arg5: memref<16x1xf32, #tpu.memory_space<vmem>>, %arg6: memref<16x16xbf16, #tpu.memory_space<vmem>>, %arg7: memref<16x1xf32, #tpu.memory_space<vmem>>, %arg8: memref<16x1xf32, #tpu.memory_space<vmem>>, %arg9: memref<16x1xf32, #tpu.memory_space<vmem>>, %arg10: memref<16x16xbf16, #tpu.memory_space<vmem>>, %arg11: memref<16x1xf32, #tpu.memory_space<vmem>>, %arg12: memref<16x1xf32, #tpu.memory_space<vmem>>, %arg13: memref<16x1xf32, #tpu.memory_space<vmem>>, %arg14: memref<16x16xbf16, #tpu.memory_space<vmem>>, %arg15: memref<16x1xf32, #tpu.memory_space<vmem>>, %arg16: memref<16x1xf32, #tpu.memory_space<vmem>>, %arg17: memref<16x1xf32, #tpu.memory_space<vmem>>, %arg18: memref<16x16xbf16, #tpu.memory_space<vmem>>, %arg19: memref<16x1xf32, #tpu.memory_space<vmem>>, %arg20: memref<16x1xf32, #tpu.memory_space<vmem>>, %arg21: memref<16x1xf32, #tpu.memory_space<vmem>>, %arg22: memref<32x16xbf16, #tpu.memory_space<vmem>>, %arg23: memref<32x1xf32, #tpu.memory_space<vmem>>, %arg24: memref<32x1xf32, #tpu.memory_space<vmem>>, %arg25: memref<32x1xf32, #tpu.memory_space<vmem>>, %arg26: memref<32x32xbf16, #tpu.memory_space<vmem>>, %arg27: memref<32x1xf32, #tpu.memory_space<vmem>>, %arg28: memref<64x16xbf16, #tpu.memory_space<vmem>>, %arg29: memref<64x1xf32, #tpu.memory_space<vmem>>, %arg30: memref<32x1xf32, #tpu.memory_space<vmem>>, %arg31: memref<32x1xf32, #tpu.memory_space<vmem>>, %arg32: memref<32x32xbf16, #tpu.memory_space<vmem>>, %arg33: memref<32x1xf32, #tpu.memory_space<vmem>>, %arg34: memref<32x1xf32, #tpu.memory_space<vmem>>, %arg35: memref<32x1xf32, #tpu.memory_space<vmem>>, %arg36: memref<32x32xbf16, #tpu.memory_space<vmem>>, %arg37: memref<32x1xf32, #tpu.memory_space<vmem>>, %arg38: memref<32x1xf32, #tpu.memory_space<vmem>>, %arg39: memref<32x1xf32, #tpu.memory_space<vmem>>, %arg40: memref<16x32xbf16, #tpu.memory_space<vmem>>, %arg41: memref<16x1xf32, #tpu.memory_space<vmem>>, %arg42: memref<16x1xf32, #tpu.memory_space<vmem>>, %arg43: memref<16x1xf32, #tpu.memory_space<vmem>>, %arg44: memref<16x16xbf16, #tpu.memory_space<vmem>>, %arg45: memref<16x1xf32, #tpu.memory_space<vmem>>, %arg46: memref<32x32xbf16, #tpu.memory_space<vmem>>, %arg47: memref<32x1xf32, #tpu.memory_space<vmem>>, %arg48: memref<2x16xbf16, #tpu.memory_space<vmem>>, %arg49: memref<2x1xf32, #tpu.memory_space<vmem>>, %arg50: memref<2x1024xf32, #tpu.memory_space<vmem>>) attributes {dimension_semantics = [#tpu.dimension_semantics<parallel>], iteration_bounds = array<i64: 2>, scalar_prefetch = 0 : i64, scratch_operands = 0 : i64, tpu.core_type = #tpu.core_type<tc>, window_params = [{transform_indices = @transform_0, window_bounds = array<i64: 4, 1024>}, {pipeline_mode = #tpu.pipeline_mode<synchronous>, transform_indices = @transform_1, window_bounds = array<i64: 16, 4>}, {pipeline_mode = #tpu.pipeline_mode<synchronous>, transform_indices = @transform_2, window_bounds = array<i64: 16, 1>}, {pipeline_mode = #tpu.pipeline_mode<synchronous>, transform_indices = @transform_3, window_bounds = array<i64: 16, 1>}, {pipeline_mode = #tpu.pipeline_mode<synchronous>, transform_indices = @transform_4, window_bounds = array<i64: 16, 1>}, {pipeline_mode = #tpu.pipeline_mode<synchronous>, transform_indices = @transform_5, window_bounds = array<i64: 16, 16>}, {pipeline_mode = #tpu.pipeline_mode<synchronous>, transform_indices = @transform_6, window_bounds = array<i64: 16, 1>}, {pipeline_mode = #tpu.pipeline_mode<synchronous>, transform_indices = @transform_7, window_bounds = array<i64: 16, 1>}, {pipeline_mode = #tpu.pipeline_mode<synchronous>, transform_indices = @transform_8, window_bounds = array<i64: 16, 1>}, {pipeline_mode = #tpu.pipeline_mode<synchronous>, transform_indices = @transform_9, window_bounds = array<i64: 16, 16>}, {pipeline_mode = #tpu.pipeline_mode<synchronous>, transform_indices = @transform_10, window_bounds = array<i64: 16, 1>}, {pipeline_mode = #tpu.pipeline_mode<synchronous>, transform_indices = @transform_11, window_bounds = array<i64: 16, 1>}, {pipeline_mode = #tpu.pipeline_mode<synchronous>, transform_indices = @transform_12, window_bounds = array<i64: 16, 1>}, {pipeline_mode = #tpu.pipeline_mode<synchronous>, transform_indices = @transform_13, window_bounds = array<i64: 16, 16>}, {pipeline_mode = #tpu.pipeline_mode<synchronous>, transform_indices = @transform_14, window_bounds = array<i64: 16, 1>}, {pipeline_mode = #tpu.pipeline_mode<synchronous>, transform_indices = @transform_15, window_bounds = array<i64: 16, 1>}, {pipeline_mode = #tpu.pipeline_mode<synchronous>, transform_indices = @transform_16, window_bounds = array<i64: 16, 1>}, {pipeline_mode = #tpu.pipeline_mode<synchronous>, transform_indices = @transform_17, window_bounds = array<i64: 16, 16>}, {pipeline_mode = #tpu.pipeline_mode<synchronous>, transform_indices = @transform_18, window_bounds = array<i64: 16, 1>}, {pipeline_mode = #tpu.pipeline_mode<synchronous>, transform_indices = @transform_19, window_bounds = array<i64: 16, 1>}, {pipeline_mode = #tpu.pipeline_mode<synchronous>, transform_indices = @transform_20, window_bounds = array<i64: 16, 1>}, {pipeline_mode = #tpu.pipeline_mode<synchronous>, transform_indices = @transform_21, window_bounds = array<i64: 32, 16>}, {pipeline_mode = #tpu.pipeline_mode<synchronous>, transform_indices = @transform_22, window_bounds = array<i64: 32, 1>}, {pipeline_mode = #tpu.pipeline_mode<synchronous>, transform_indices = @transform_23, window_bounds = array<i64: 32, 1>}, {pipeline_mode = #tpu.pipeline_mode<synchronous>, transform_indices = @transform_24, window_bounds = array<i64: 32, 1>}, {pipeline_mode = #tpu.pipeline_mode<synchronous>, transform_indices = @transform_25, window_bounds = array<i64: 32, 32>}, {pipeline_mode = #tpu.pipeline_mode<synchronous>, transform_indices = @transform_26, window_bounds = array<i64: 32, 1>}, {pipeline_mode = #tpu.pipeline_mode<synchronous>, transform_indices = @transform_27, window_bounds = array<i64: 64, 16>}, {pipeline_mode = #tpu.pipeline_mode<synchronous>, transform_indices = @transform_28, window_bounds = array<i64: 64, 1>}, {pipeline_mode = #tpu.pipeline_mode<synchronous>, transform_indices = @transform_29, window_bounds = array<i64: 32, 1>}, {pipeline_mode = #tpu.pipeline_mode<synchronous>, transform_indices = @transform_30, window_bounds = array<i64: 32, 1>}, {pipeline_mode = #tpu.pipeline_mode<synchronous>, transform_indices = @transform_31, window_bounds = array<i64: 32, 32>}, {pipeline_mode = #tpu.pipeline_mode<synchronous>, transform_indices = @transform_32, window_bounds = array<i64: 32, 1>}, {pipeline_mode = #tpu.pipeline_mode<synchronous>, transform_indices = @transform_33, window_bounds = array<i64: 32, 1>}, {pipeline_mode = #tpu.pipeline_mode<synchronous>, transform_indices = @transform_34, window_bounds = array<i64: 32, 1>}, {pipeline_mode = #tpu.pipeline_mode<synchronous>, transform_indices = @transform_35, window_bounds = array<i64: 32, 32>}, {pipeline_mode = #tpu.pipeline_mode<synchronous>, transform_indices = @transform_36, window_bounds = array<i64: 32, 1>}, {pipeline_mode = #tpu.pipeline_mode<synchronous>, transform_indices = @transform_37, window_bounds = array<i64: 32, 1>}, {pipeline_mode = #tpu.pipeline_mode<synchronous>, transform_indices = @transform_38, window_bounds = array<i64: 32, 1>}, {pipeline_mode = #tpu.pipeline_mode<synchronous>, transform_indices = @transform_39, window_bounds = array<i64: 16, 32>}, {pipeline_mode = #tpu.pipeline_mode<synchronous>, transform_indices = @transform_40, window_bounds = array<i64: 16, 1>}, {pipeline_mode = #tpu.pipeline_mode<synchronous>, transform_indices = @transform_41, window_bounds = array<i64: 16, 1>}, {pipeline_mode = #tpu.pipeline_mode<synchronous>, transform_indices = @transform_42, window_bounds = array<i64: 16, 1>}, {pipeline_mode = #tpu.pipeline_mode<synchronous>, transform_indices = @transform_43, window_bounds = array<i64: 16, 16>}, {pipeline_mode = #tpu.pipeline_mode<synchronous>, transform_indices = @transform_44, window_bounds = array<i64: 16, 1>}, {pipeline_mode = #tpu.pipeline_mode<synchronous>, transform_indices = @transform_45, window_bounds = array<i64: 32, 32>}, {pipeline_mode = #tpu.pipeline_mode<synchronous>, transform_indices = @transform_46, window_bounds = array<i64: 32, 1>}, {pipeline_mode = #tpu.pipeline_mode<synchronous>, transform_indices = @transform_47, window_bounds = array<i64: 2, 16>}, {pipeline_mode = #tpu.pipeline_mode<synchronous>, transform_indices = @transform_48, window_bounds = array<i64: 2, 1>}, {transform_indices = @transform_49, window_bounds = array<i64: 2, 1024>}]} {
    %c0 = arith.constant 0 : index
    %c0_0 = arith.constant 0 : index
    %0 = vector.load %arg1[%c0, %c0_0] : memref<4x1024xf32, #tpu.memory_space<vmem>>, vector<4x1024xf32>
    %c0_1 = arith.constant 0 : index
    %c0_2 = arith.constant 0 : index
    %1 = vector.load %arg2[%c0_1, %c0_2] : memref<16x4xbf16, #tpu.memory_space<vmem>>, vector<16x4xbf16>
    %c0_3 = arith.constant 0 : index
    %c0_4 = arith.constant 0 : index
    %2 = vector.load %arg3[%c0_3, %c0_4] : memref<16x1xf32, #tpu.memory_space<vmem>>, vector<16x1xf32>
    %3 = arith.truncf %0 : vector<4x1024xf32> to vector<4x1024xbf16>
    %cst = arith.constant dense<0.000000e+00> : vector<16x1024xf32>
    %4 = tpu.matmul %1, %3, %cst {dimension_numbers = #tpu.dot_dimension_numbers<[1], [0], [0], [1], [0, 0, 1, 1], [], []>} : vector<16x4xbf16>, vector<4x1024xbf16>, vector<16x1024xf32> -> vector<16x1024xf32>
    %5 = vector.broadcast %2 : vector<16x1xf32> to vector<16x1024xf32>
    %6 = arith.addf %4, %5 : vector<16x1024xf32>
    %7 = tpu.iota {dimensions = array<i32: 1>} : vector<1x1024xi32>
    %c0_5 = arith.constant 0 : index
    %c0_6 = arith.constant 0 : index
    %8 = vector.load %arg4[%c0_5, %c0_6] : memref<16x1xf32, #tpu.memory_space<vmem>>, vector<16x1xf32>
    %c0_7 = arith.constant 0 : index
    %c0_8 = arith.constant 0 : index
    %9 = vector.load %arg5[%c0_7, %c0_8] : memref<16x1xf32, #tpu.memory_space<vmem>>, vector<16x1xf32>
    %c0_9 = arith.constant 0 : index
    %c0_10 = arith.constant 0 : index
    %10 = vector.load %arg6[%c0_9, %c0_10] : memref<16x16xbf16, #tpu.memory_space<vmem>>, vector<16x16xbf16>
    %c0_11 = arith.constant 0 : index
    %c0_12 = arith.constant 0 : index
    %11 = vector.load %arg7[%c0_11, %c0_12] : memref<16x1xf32, #tpu.memory_space<vmem>>, vector<16x1xf32>
    %c0_13 = arith.constant 0 : index
    %c0_14 = arith.constant 0 : index
    %12 = vector.load %arg8[%c0_13, %c0_14] : memref<16x1xf32, #tpu.memory_space<vmem>>, vector<16x1xf32>
    %c0_15 = arith.constant 0 : index
    %c0_16 = arith.constant 0 : index
    %13 = vector.load %arg9[%c0_15, %c0_16] : memref<16x1xf32, #tpu.memory_space<vmem>>, vector<16x1xf32>
    %c0_17 = arith.constant 0 : index
    %c0_18 = arith.constant 0 : index
    %14 = vector.load %arg10[%c0_17, %c0_18] : memref<16x16xbf16, #tpu.memory_space<vmem>>, vector<16x16xbf16>
    %c0_19 = arith.constant 0 : index
    %c0_20 = arith.constant 0 : index
    %15 = vector.load %arg11[%c0_19, %c0_20] : memref<16x1xf32, #tpu.memory_space<vmem>>, vector<16x1xf32>
    %16 = vector.broadcast %8 : vector<16x1xf32> to vector<16x1024xf32>
    %17 = arith.mulf %6, %16 : vector<16x1024xf32>
    %18 = vector.broadcast %9 : vector<16x1xf32> to vector<16x1024xf32>
    %19 = arith.addf %17, %18 : vector<16x1024xf32>
    %cst_21 = arith.constant 0.000000e+00 : f32
    %20 = vector.broadcast %cst_21 : f32 to vector<16x1024xf32>
    %21 = arith.maximumf %19, %20 : vector<16x1024xf32>
    %22 = arith.truncf %21 : vector<16x1024xf32> to vector<16x1024xbf16>
    %cst_22 = arith.constant dense<0.000000e+00> : vector<16x1024xf32>
    %23 = tpu.matmul %10, %22, %cst_22 {dimension_numbers = #tpu.dot_dimension_numbers<[1], [0], [0], [1], [0, 0, 1, 1], [], []>} : vector<16x16xbf16>, vector<16x1024xbf16>, vector<16x1024xf32> -> vector<16x1024xf32>
    %24 = vector.broadcast %11 : vector<16x1xf32> to vector<16x1024xf32>
    %25 = arith.addf %23, %24 : vector<16x1024xf32>
    %26 = vector.extract_strided_slice %25 {offsets = [0, 0], sizes = [16, 512], strides = [1, 1]} : vector<16x1024xf32> to vector<16x512xf32>
    %cst_23 = arith.constant dense<0xFF800000> : vector<16xf32>
    %27 = vector.multi_reduction <maximumf>, %26, %cst_23 [1] : vector<16x512xf32> to vector<16xf32>
    %28 = vector.shape_cast %27 : vector<16xf32> to vector<16x1xf32>
    %29 = arith.mulf %28, %12 : vector<16x1xf32>
    %30 = arith.addf %29, %13 : vector<16x1xf32>
    %cst_24 = arith.constant 0.000000e+00 : f32
    %31 = vector.broadcast %cst_24 : f32 to vector<16x1xf32>
    %32 = arith.maximumf %30, %31 : vector<16x1xf32>
    %33 = arith.truncf %32 : vector<16x1xf32> to vector<16x1xbf16>
    %cst_25 = arith.constant dense<0.000000e+00> : vector<16x1xf32>
    %34 = tpu.matmul %14, %33, %cst_25 {dimension_numbers = #tpu.dot_dimension_numbers<[1], [0], [0], [1], [0, 0, 1, 1], [], []>} : vector<16x16xbf16>, vector<16x1xbf16>, vector<16x1xf32> -> vector<16x1xf32>
    %35 = arith.addf %34, %15 : vector<16x1xf32>
    %cst_26 = arith.constant 0.000000e+00 : f32
    %36 = vector.broadcast %cst_26 : f32 to vector<16x1xf32>
    %37 = arith.subf %36, %35 : vector<16x1xf32>
    %38 = math.exp %37 : vector<16x1xf32>
    %cst_27 = arith.constant 1.000000e+00 : f32
    %39 = vector.broadcast %cst_27 : f32 to vector<16x1xf32>
    %40 = arith.addf %39, %38 : vector<16x1xf32>
    %41 = tpu.reciprocal %40 {approx = true} : vector<16x1xf32> -> vector<16x1xf32>
    %42 = vector.extract_strided_slice %25 {offsets = [0, 512], sizes = [16, 512], strides = [1, 1]} : vector<16x1024xf32> to vector<16x512xf32>
    %cst_28 = arith.constant dense<0xFF800000> : vector<16xf32>
    %43 = vector.multi_reduction <maximumf>, %42, %cst_28 [1] : vector<16x512xf32> to vector<16xf32>
    %44 = vector.shape_cast %43 : vector<16xf32> to vector<16x1xf32>
    %45 = arith.mulf %44, %12 : vector<16x1xf32>
    %46 = arith.addf %45, %13 : vector<16x1xf32>
    %cst_29 = arith.constant 0.000000e+00 : f32
    %47 = vector.broadcast %cst_29 : f32 to vector<16x1xf32>
    %48 = arith.maximumf %46, %47 : vector<16x1xf32>
    %49 = arith.truncf %48 : vector<16x1xf32> to vector<16x1xbf16>
    %cst_30 = arith.constant dense<0.000000e+00> : vector<16x1xf32>
    %50 = tpu.matmul %14, %49, %cst_30 {dimension_numbers = #tpu.dot_dimension_numbers<[1], [0], [0], [1], [0, 0, 1, 1], [], []>} : vector<16x16xbf16>, vector<16x1xbf16>, vector<16x1xf32> -> vector<16x1xf32>
    %51 = arith.addf %50, %15 : vector<16x1xf32>
    %cst_31 = arith.constant 0.000000e+00 : f32
    %52 = vector.broadcast %cst_31 : f32 to vector<16x1xf32>
    %53 = arith.subf %52, %51 : vector<16x1xf32>
    %54 = math.exp %53 : vector<16x1xf32>
    %cst_32 = arith.constant 1.000000e+00 : f32
    %55 = vector.broadcast %cst_32 : f32 to vector<16x1xf32>
    %56 = arith.addf %55, %54 : vector<16x1xf32>
    %57 = tpu.reciprocal %56 {approx = true} : vector<16x1xf32> -> vector<16x1xf32>
    %c512_i32 = arith.constant 512 : i32
    %58 = vector.broadcast %c512_i32 : i32 to vector<1x1024xi32>
    %59 = arith.cmpi sge, %7, %58 : vector<1x1024xi32>
    %60 = vector.shape_cast %59 : vector<1x1024xi1> to vector<1x1024xi1>
    %61 = vector.broadcast %60 : vector<1x1024xi1> to vector<16x1024xi1>
    %62 = vector.shape_cast %57 : vector<16x1xf32> to vector<16x1xf32>
    %63 = vector.broadcast %62 : vector<16x1xf32> to vector<16x1024xf32>
    %64 = vector.shape_cast %41 : vector<16x1xf32> to vector<16x1xf32>
    %65 = vector.broadcast %64 : vector<16x1xf32> to vector<16x1024xf32>
    %66 = arith.select %61, %63, %65 : vector<16x1024xi1>, vector<16x1024xf32>
    %cst_33 = arith.constant 1.000000e+00 : f32
    %67 = vector.broadcast %cst_33 : f32 to vector<16x1024xf32>
    %68 = arith.addf %66, %67 : vector<16x1024xf32>
    %69 = arith.mulf %6, %68 : vector<16x1024xf32>
    %c0_34 = arith.constant 0 : index
    %c0_35 = arith.constant 0 : index
    %70 = vector.load %arg12[%c0_34, %c0_35] : memref<16x1xf32, #tpu.memory_space<vmem>>, vector<16x1xf32>
    %c0_36 = arith.constant 0 : index
    %c0_37 = arith.constant 0 : index
    %71 = vector.load %arg13[%c0_36, %c0_37] : memref<16x1xf32, #tpu.memory_space<vmem>>, vector<16x1xf32>
    %c0_38 = arith.constant 0 : index
    %c0_39 = arith.constant 0 : index
    %72 = vector.load %arg14[%c0_38, %c0_39] : memref<16x16xbf16, #tpu.memory_space<vmem>>, vector<16x16xbf16>
    %c0_40 = arith.constant 0 : index
    %c0_41 = arith.constant 0 : index
    %73 = vector.load %arg15[%c0_40, %c0_41] : memref<16x1xf32, #tpu.memory_space<vmem>>, vector<16x1xf32>
    %c0_42 = arith.constant 0 : index
    %c0_43 = arith.constant 0 : index
    %74 = vector.load %arg16[%c0_42, %c0_43] : memref<16x1xf32, #tpu.memory_space<vmem>>, vector<16x1xf32>
    %c0_44 = arith.constant 0 : index
    %c0_45 = arith.constant 0 : index
    %75 = vector.load %arg17[%c0_44, %c0_45] : memref<16x1xf32, #tpu.memory_space<vmem>>, vector<16x1xf32>
    %c0_46 = arith.constant 0 : index
    %c0_47 = arith.constant 0 : index
    %76 = vector.load %arg18[%c0_46, %c0_47] : memref<16x16xbf16, #tpu.memory_space<vmem>>, vector<16x16xbf16>
    %c0_48 = arith.constant 0 : index
    %c0_49 = arith.constant 0 : index
    %77 = vector.load %arg19[%c0_48, %c0_49] : memref<16x1xf32, #tpu.memory_space<vmem>>, vector<16x1xf32>
    %78 = vector.broadcast %70 : vector<16x1xf32> to vector<16x1024xf32>
    %79 = arith.mulf %69, %78 : vector<16x1024xf32>
    %80 = vector.broadcast %71 : vector<16x1xf32> to vector<16x1024xf32>
    %81 = arith.addf %79, %80 : vector<16x1024xf32>
    %cst_50 = arith.constant 0.000000e+00 : f32
    %82 = vector.broadcast %cst_50 : f32 to vector<16x1024xf32>
    %83 = arith.maximumf %81, %82 : vector<16x1024xf32>
    %84 = arith.truncf %83 : vector<16x1024xf32> to vector<16x1024xbf16>
    %cst_51 = arith.constant dense<0.000000e+00> : vector<16x1024xf32>
    %85 = tpu.matmul %72, %84, %cst_51 {dimension_numbers = #tpu.dot_dimension_numbers<[1], [0], [0], [1], [0, 0, 1, 1], [], []>} : vector<16x16xbf16>, vector<16x1024xbf16>, vector<16x1024xf32> -> vector<16x1024xf32>
    %86 = vector.broadcast %73 : vector<16x1xf32> to vector<16x1024xf32>
    %87 = arith.addf %85, %86 : vector<16x1024xf32>
    %88 = vector.extract_strided_slice %87 {offsets = [0, 0], sizes = [16, 512], strides = [1, 1]} : vector<16x1024xf32> to vector<16x512xf32>
    %cst_52 = arith.constant dense<0xFF800000> : vector<16xf32>
    %89 = vector.multi_reduction <maximumf>, %88, %cst_52 [1] : vector<16x512xf32> to vector<16xf32>
    %90 = vector.shape_cast %89 : vector<16xf32> to vector<16x1xf32>
    %91 = arith.mulf %90, %74 : vector<16x1xf32>
    %92 = arith.addf %91, %75 : vector<16x1xf32>
    %cst_53 = arith.constant 0.000000e+00 : f32
    %93 = vector.broadcast %cst_53 : f32 to vector<16x1xf32>
    %94 = arith.maximumf %92, %93 : vector<16x1xf32>
    %95 = arith.truncf %94 : vector<16x1xf32> to vector<16x1xbf16>
    %cst_54 = arith.constant dense<0.000000e+00> : vector<16x1xf32>
    %96 = tpu.matmul %76, %95, %cst_54 {dimension_numbers = #tpu.dot_dimension_numbers<[1], [0], [0], [1], [0, 0, 1, 1], [], []>} : vector<16x16xbf16>, vector<16x1xbf16>, vector<16x1xf32> -> vector<16x1xf32>
    %97 = arith.addf %96, %77 : vector<16x1xf32>
    %cst_55 = arith.constant 0.000000e+00 : f32
    %98 = vector.broadcast %cst_55 : f32 to vector<16x1xf32>
    %99 = arith.subf %98, %97 : vector<16x1xf32>
    %100 = math.exp %99 : vector<16x1xf32>
    %cst_56 = arith.constant 1.000000e+00 : f32
    %101 = vector.broadcast %cst_56 : f32 to vector<16x1xf32>
    %102 = arith.addf %101, %100 : vector<16x1xf32>
    %103 = tpu.reciprocal %102 {approx = true} : vector<16x1xf32> -> vector<16x1xf32>
    %104 = vector.extract_strided_slice %87 {offsets = [0, 512], sizes = [16, 512], strides = [1, 1]} : vector<16x1024xf32> to vector<16x512xf32>
    %cst_57 = arith.constant dense<0xFF800000> : vector<16xf32>
    %105 = vector.multi_reduction <maximumf>, %104, %cst_57 [1] : vector<16x512xf32> to vector<16xf32>
    %106 = vector.shape_cast %105 : vector<16xf32> to vector<16x1xf32>
    %107 = arith.mulf %106, %74 : vector<16x1xf32>
    %108 = arith.addf %107, %75 : vector<16x1xf32>
    %cst_58 = arith.constant 0.000000e+00 : f32
    %109 = vector.broadcast %cst_58 : f32 to vector<16x1xf32>
    %110 = arith.maximumf %108, %109 : vector<16x1xf32>
    %111 = arith.truncf %110 : vector<16x1xf32> to vector<16x1xbf16>
    %cst_59 = arith.constant dense<0.000000e+00> : vector<16x1xf32>
    %112 = tpu.matmul %76, %111, %cst_59 {dimension_numbers = #tpu.dot_dimension_numbers<[1], [0], [0], [1], [0, 0, 1, 1], [], []>} : vector<16x16xbf16>, vector<16x1xbf16>, vector<16x1xf32> -> vector<16x1xf32>
    %113 = arith.addf %112, %77 : vector<16x1xf32>
    %cst_60 = arith.constant 0.000000e+00 : f32
    %114 = vector.broadcast %cst_60 : f32 to vector<16x1xf32>
    %115 = arith.subf %114, %113 : vector<16x1xf32>
    %116 = math.exp %115 : vector<16x1xf32>
    %cst_61 = arith.constant 1.000000e+00 : f32
    %117 = vector.broadcast %cst_61 : f32 to vector<16x1xf32>
    %118 = arith.addf %117, %116 : vector<16x1xf32>
    %119 = tpu.reciprocal %118 {approx = true} : vector<16x1xf32> -> vector<16x1xf32>
    %c512_i32_62 = arith.constant 512 : i32
    %120 = vector.broadcast %c512_i32_62 : i32 to vector<1x1024xi32>
    %121 = arith.cmpi sge, %7, %120 : vector<1x1024xi32>
    %122 = vector.shape_cast %121 : vector<1x1024xi1> to vector<1x1024xi1>
    %123 = vector.broadcast %122 : vector<1x1024xi1> to vector<16x1024xi1>
    %124 = vector.shape_cast %119 : vector<16x1xf32> to vector<16x1xf32>
    %125 = vector.broadcast %124 : vector<16x1xf32> to vector<16x1024xf32>
    %126 = vector.shape_cast %103 : vector<16x1xf32> to vector<16x1xf32>
    %127 = vector.broadcast %126 : vector<16x1xf32> to vector<16x1024xf32>
    %128 = arith.select %123, %125, %127 : vector<16x1024xi1>, vector<16x1024xf32>
    %cst_63 = arith.constant 1.000000e+00 : f32
    %129 = vector.broadcast %cst_63 : f32 to vector<16x1024xf32>
    %130 = arith.addf %128, %129 : vector<16x1024xf32>
    %131 = arith.mulf %69, %130 : vector<16x1024xf32>
    %c0_64 = arith.constant 0 : index
    %c0_65 = arith.constant 0 : index
    %132 = vector.load %arg20[%c0_64, %c0_65] : memref<16x1xf32, #tpu.memory_space<vmem>>, vector<16x1xf32>
    %c0_66 = arith.constant 0 : index
    %c0_67 = arith.constant 0 : index
    %133 = vector.load %arg21[%c0_66, %c0_67] : memref<16x1xf32, #tpu.memory_space<vmem>>, vector<16x1xf32>
    %c0_68 = arith.constant 0 : index
    %c0_69 = arith.constant 0 : index
    %134 = vector.load %arg22[%c0_68, %c0_69] : memref<32x16xbf16, #tpu.memory_space<vmem>>, vector<32x16xbf16>
    %c0_70 = arith.constant 0 : index
    %c0_71 = arith.constant 0 : index
    %135 = vector.load %arg23[%c0_70, %c0_71] : memref<32x1xf32, #tpu.memory_space<vmem>>, vector<32x1xf32>
    %c0_72 = arith.constant 0 : index
    %c0_73 = arith.constant 0 : index
    %136 = vector.load %arg24[%c0_72, %c0_73] : memref<32x1xf32, #tpu.memory_space<vmem>>, vector<32x1xf32>
    %c0_74 = arith.constant 0 : index
    %c0_75 = arith.constant 0 : index
    %137 = vector.load %arg25[%c0_74, %c0_75] : memref<32x1xf32, #tpu.memory_space<vmem>>, vector<32x1xf32>
    %c0_76 = arith.constant 0 : index
    %c0_77 = arith.constant 0 : index
    %138 = vector.load %arg26[%c0_76, %c0_77] : memref<32x32xbf16, #tpu.memory_space<vmem>>, vector<32x32xbf16>
    %c0_78 = arith.constant 0 : index
    %c0_79 = arith.constant 0 : index
    %139 = vector.load %arg27[%c0_78, %c0_79] : memref<32x1xf32, #tpu.memory_space<vmem>>, vector<32x1xf32>
    %140 = vector.broadcast %132 : vector<16x1xf32> to vector<16x1024xf32>
    %141 = arith.mulf %131, %140 : vector<16x1024xf32>
    %142 = vector.broadcast %133 : vector<16x1xf32> to vector<16x1024xf32>
    %143 = arith.addf %141, %142 : vector<16x1024xf32>
    %cst_80 = arith.constant 0.000000e+00 : f32
    %144 = vector.broadcast %cst_80 : f32 to vector<16x1024xf32>
    %145 = arith.maximumf %143, %144 : vector<16x1024xf32>
    %146 = arith.truncf %145 : vector<16x1024xf32> to vector<16x1024xbf16>
    %cst_81 = arith.constant dense<0.000000e+00> : vector<32x1024xf32>
    %147 = tpu.matmul %134, %146, %cst_81 {dimension_numbers = #tpu.dot_dimension_numbers<[1], [0], [0], [1], [0, 0, 1, 1], [], []>} : vector<32x16xbf16>, vector<16x1024xbf16>, vector<32x1024xf32> -> vector<32x1024xf32>
    %148 = vector.broadcast %135 : vector<32x1xf32> to vector<32x1024xf32>
    %149 = arith.addf %147, %148 : vector<32x1024xf32>
    %150 = vector.extract_strided_slice %149 {offsets = [0, 0], sizes = [32, 512], strides = [1, 1]} : vector<32x1024xf32> to vector<32x512xf32>
    %cst_82 = arith.constant dense<0xFF800000> : vector<32xf32>
    %151 = vector.multi_reduction <maximumf>, %150, %cst_82 [1] : vector<32x512xf32> to vector<32xf32>
    %152 = vector.shape_cast %151 : vector<32xf32> to vector<32x1xf32>
    %153 = arith.mulf %152, %136 : vector<32x1xf32>
    %154 = arith.addf %153, %137 : vector<32x1xf32>
    %cst_83 = arith.constant 0.000000e+00 : f32
    %155 = vector.broadcast %cst_83 : f32 to vector<32x1xf32>
    %156 = arith.maximumf %154, %155 : vector<32x1xf32>
    %157 = arith.truncf %156 : vector<32x1xf32> to vector<32x1xbf16>
    %cst_84 = arith.constant dense<0.000000e+00> : vector<32x1xf32>
    %158 = tpu.matmul %138, %157, %cst_84 {dimension_numbers = #tpu.dot_dimension_numbers<[1], [0], [0], [1], [0, 0, 1, 1], [], []>} : vector<32x32xbf16>, vector<32x1xbf16>, vector<32x1xf32> -> vector<32x1xf32>
    %159 = arith.addf %158, %139 : vector<32x1xf32>
    %cst_85 = arith.constant 0.000000e+00 : f32
    %160 = vector.broadcast %cst_85 : f32 to vector<32x1xf32>
    %161 = arith.subf %160, %159 : vector<32x1xf32>
    %162 = math.exp %161 : vector<32x1xf32>
    %cst_86 = arith.constant 1.000000e+00 : f32
    %163 = vector.broadcast %cst_86 : f32 to vector<32x1xf32>
    %164 = arith.addf %163, %162 : vector<32x1xf32>
    %165 = tpu.reciprocal %164 {approx = true} : vector<32x1xf32> -> vector<32x1xf32>
    %166 = vector.extract_strided_slice %149 {offsets = [0, 512], sizes = [32, 512], strides = [1, 1]} : vector<32x1024xf32> to vector<32x512xf32>
    %cst_87 = arith.constant dense<0xFF800000> : vector<32xf32>
    %167 = vector.multi_reduction <maximumf>, %166, %cst_87 [1] : vector<32x512xf32> to vector<32xf32>
    %168 = vector.shape_cast %167 : vector<32xf32> to vector<32x1xf32>
    %169 = arith.mulf %168, %136 : vector<32x1xf32>
    %170 = arith.addf %169, %137 : vector<32x1xf32>
    %cst_88 = arith.constant 0.000000e+00 : f32
    %171 = vector.broadcast %cst_88 : f32 to vector<32x1xf32>
    %172 = arith.maximumf %170, %171 : vector<32x1xf32>
    %173 = arith.truncf %172 : vector<32x1xf32> to vector<32x1xbf16>
    %cst_89 = arith.constant dense<0.000000e+00> : vector<32x1xf32>
    %174 = tpu.matmul %138, %173, %cst_89 {dimension_numbers = #tpu.dot_dimension_numbers<[1], [0], [0], [1], [0, 0, 1, 1], [], []>} : vector<32x32xbf16>, vector<32x1xbf16>, vector<32x1xf32> -> vector<32x1xf32>
    %175 = arith.addf %174, %139 : vector<32x1xf32>
    %cst_90 = arith.constant 0.000000e+00 : f32
    %176 = vector.broadcast %cst_90 : f32 to vector<32x1xf32>
    %177 = arith.subf %176, %175 : vector<32x1xf32>
    %178 = math.exp %177 : vector<32x1xf32>
    %cst_91 = arith.constant 1.000000e+00 : f32
    %179 = vector.broadcast %cst_91 : f32 to vector<32x1xf32>
    %180 = arith.addf %179, %178 : vector<32x1xf32>
    %181 = tpu.reciprocal %180 {approx = true} : vector<32x1xf32> -> vector<32x1xf32>
    %c512_i32_92 = arith.constant 512 : i32
    %182 = vector.broadcast %c512_i32_92 : i32 to vector<1x1024xi32>
    %183 = arith.cmpi sge, %7, %182 : vector<1x1024xi32>
    %184 = vector.shape_cast %183 : vector<1x1024xi1> to vector<1x1024xi1>
    %185 = vector.broadcast %184 : vector<1x1024xi1> to vector<32x1024xi1>
    %186 = vector.shape_cast %181 : vector<32x1xf32> to vector<32x1xf32>
    %187 = vector.broadcast %186 : vector<32x1xf32> to vector<32x1024xf32>
    %188 = vector.shape_cast %165 : vector<32x1xf32> to vector<32x1xf32>
    %189 = vector.broadcast %188 : vector<32x1xf32> to vector<32x1024xf32>
    %190 = arith.select %185, %187, %189 : vector<32x1024xi1>, vector<32x1024xf32>
    %c0_93 = arith.constant 0 : index
    %c0_94 = arith.constant 0 : index
    %191 = vector.load %arg28[%c0_93, %c0_94] : memref<64x16xbf16, #tpu.memory_space<vmem>>, vector<64x16xbf16>
    %c0_95 = arith.constant 0 : index
    %c0_96 = arith.constant 0 : index
    %192 = vector.load %arg29[%c0_95, %c0_96] : memref<64x1xf32, #tpu.memory_space<vmem>>, vector<64x1xf32>
    %193 = arith.truncf %131 : vector<16x1024xf32> to vector<16x1024xbf16>
    %cst_97 = arith.constant dense<0.000000e+00> : vector<64x1024xf32>
    %194 = tpu.matmul %191, %193, %cst_97 {dimension_numbers = #tpu.dot_dimension_numbers<[1], [0], [0], [1], [0, 0, 1, 1], [], []>} : vector<64x16xbf16>, vector<16x1024xbf16>, vector<64x1024xf32> -> vector<64x1024xf32>
    %195 = vector.broadcast %192 : vector<64x1xf32> to vector<64x1024xf32>
    %196 = arith.addf %194, %195 : vector<64x1024xf32>
    %197 = vector.extract_strided_slice %196 {offsets = [0, 0], sizes = [32, 1024], strides = [1, 1]} : vector<64x1024xf32> to vector<32x1024xf32>
    %198 = arith.mulf %190, %197 : vector<32x1024xf32>
    %199 = vector.extract_strided_slice %196 {offsets = [32, 0], sizes = [32, 1024], strides = [1, 1]} : vector<64x1024xf32> to vector<32x1024xf32>
    %200 = arith.addf %198, %199 : vector<32x1024xf32>
    %c0_98 = arith.constant 0 : index
    %c0_99 = arith.constant 0 : index
    %201 = vector.load %arg30[%c0_98, %c0_99] : memref<32x1xf32, #tpu.memory_space<vmem>>, vector<32x1xf32>
    %c0_100 = arith.constant 0 : index
    %c0_101 = arith.constant 0 : index
    %202 = vector.load %arg31[%c0_100, %c0_101] : memref<32x1xf32, #tpu.memory_space<vmem>>, vector<32x1xf32>
    %c0_102 = arith.constant 0 : index
    %c0_103 = arith.constant 0 : index
    %203 = vector.load %arg32[%c0_102, %c0_103] : memref<32x32xbf16, #tpu.memory_space<vmem>>, vector<32x32xbf16>
    %c0_104 = arith.constant 0 : index
    %c0_105 = arith.constant 0 : index
    %204 = vector.load %arg33[%c0_104, %c0_105] : memref<32x1xf32, #tpu.memory_space<vmem>>, vector<32x1xf32>
    %c0_106 = arith.constant 0 : index
    %c0_107 = arith.constant 0 : index
    %205 = vector.load %arg34[%c0_106, %c0_107] : memref<32x1xf32, #tpu.memory_space<vmem>>, vector<32x1xf32>
    %c0_108 = arith.constant 0 : index
    %c0_109 = arith.constant 0 : index
    %206 = vector.load %arg35[%c0_108, %c0_109] : memref<32x1xf32, #tpu.memory_space<vmem>>, vector<32x1xf32>
    %c0_110 = arith.constant 0 : index
    %c0_111 = arith.constant 0 : index
    %207 = vector.load %arg36[%c0_110, %c0_111] : memref<32x32xbf16, #tpu.memory_space<vmem>>, vector<32x32xbf16>
    %c0_112 = arith.constant 0 : index
    %c0_113 = arith.constant 0 : index
    %208 = vector.load %arg37[%c0_112, %c0_113] : memref<32x1xf32, #tpu.memory_space<vmem>>, vector<32x1xf32>
    %209 = vector.broadcast %201 : vector<32x1xf32> to vector<32x1024xf32>
    %210 = arith.mulf %200, %209 : vector<32x1024xf32>
    %211 = vector.broadcast %202 : vector<32x1xf32> to vector<32x1024xf32>
    %212 = arith.addf %210, %211 : vector<32x1024xf32>
    %cst_114 = arith.constant 0.000000e+00 : f32
    %213 = vector.broadcast %cst_114 : f32 to vector<32x1024xf32>
    %214 = arith.maximumf %212, %213 : vector<32x1024xf32>
    %215 = arith.truncf %214 : vector<32x1024xf32> to vector<32x1024xbf16>
    %cst_115 = arith.constant dense<0.000000e+00> : vector<32x1024xf32>
    %216 = tpu.matmul %203, %215, %cst_115 {dimension_numbers = #tpu.dot_dimension_numbers<[1], [0], [0], [1], [0, 0, 1, 1], [], []>} : vector<32x32xbf16>, vector<32x1024xbf16>, vector<32x1024xf32> -> vector<32x1024xf32>
    %217 = vector.broadcast %204 : vector<32x1xf32> to vector<32x1024xf32>
    %218 = arith.addf %216, %217 : vector<32x1024xf32>
    %219 = vector.extract_strided_slice %218 {offsets = [0, 0], sizes = [32, 512], strides = [1, 1]} : vector<32x1024xf32> to vector<32x512xf32>
    %cst_116 = arith.constant dense<0xFF800000> : vector<32xf32>
    %220 = vector.multi_reduction <maximumf>, %219, %cst_116 [1] : vector<32x512xf32> to vector<32xf32>
    %221 = vector.shape_cast %220 : vector<32xf32> to vector<32x1xf32>
    %222 = arith.mulf %221, %205 : vector<32x1xf32>
    %223 = arith.addf %222, %206 : vector<32x1xf32>
    %cst_117 = arith.constant 0.000000e+00 : f32
    %224 = vector.broadcast %cst_117 : f32 to vector<32x1xf32>
    %225 = arith.maximumf %223, %224 : vector<32x1xf32>
    %226 = arith.truncf %225 : vector<32x1xf32> to vector<32x1xbf16>
    %cst_118 = arith.constant dense<0.000000e+00> : vector<32x1xf32>
    %227 = tpu.matmul %207, %226, %cst_118 {dimension_numbers = #tpu.dot_dimension_numbers<[1], [0], [0], [1], [0, 0, 1, 1], [], []>} : vector<32x32xbf16>, vector<32x1xbf16>, vector<32x1xf32> -> vector<32x1xf32>
    %228 = arith.addf %227, %208 : vector<32x1xf32>
    %cst_119 = arith.constant 0.000000e+00 : f32
    %229 = vector.broadcast %cst_119 : f32 to vector<32x1xf32>
    %230 = arith.subf %229, %228 : vector<32x1xf32>
    %231 = math.exp %230 : vector<32x1xf32>
    %cst_120 = arith.constant 1.000000e+00 : f32
    %232 = vector.broadcast %cst_120 : f32 to vector<32x1xf32>
    %233 = arith.addf %232, %231 : vector<32x1xf32>
    %234 = tpu.reciprocal %233 {approx = true} : vector<32x1xf32> -> vector<32x1xf32>
    %235 = vector.extract_strided_slice %218 {offsets = [0, 512], sizes = [32, 512], strides = [1, 1]} : vector<32x1024xf32> to vector<32x512xf32>
    %cst_121 = arith.constant dense<0xFF800000> : vector<32xf32>
    %236 = vector.multi_reduction <maximumf>, %235, %cst_121 [1] : vector<32x512xf32> to vector<32xf32>
    %237 = vector.shape_cast %236 : vector<32xf32> to vector<32x1xf32>
    %238 = arith.mulf %237, %205 : vector<32x1xf32>
    %239 = arith.addf %238, %206 : vector<32x1xf32>
    %cst_122 = arith.constant 0.000000e+00 : f32
    %240 = vector.broadcast %cst_122 : f32 to vector<32x1xf32>
    %241 = arith.maximumf %239, %240 : vector<32x1xf32>
    %242 = arith.truncf %241 : vector<32x1xf32> to vector<32x1xbf16>
    %cst_123 = arith.constant dense<0.000000e+00> : vector<32x1xf32>
    %243 = tpu.matmul %207, %242, %cst_123 {dimension_numbers = #tpu.dot_dimension_numbers<[1], [0], [0], [1], [0, 0, 1, 1], [], []>} : vector<32x32xbf16>, vector<32x1xbf16>, vector<32x1xf32> -> vector<32x1xf32>
    %244 = arith.addf %243, %208 : vector<32x1xf32>
    %cst_124 = arith.constant 0.000000e+00 : f32
    %245 = vector.broadcast %cst_124 : f32 to vector<32x1xf32>
    %246 = arith.subf %245, %244 : vector<32x1xf32>
    %247 = math.exp %246 : vector<32x1xf32>
    %cst_125 = arith.constant 1.000000e+00 : f32
    %248 = vector.broadcast %cst_125 : f32 to vector<32x1xf32>
    %249 = arith.addf %248, %247 : vector<32x1xf32>
    %250 = tpu.reciprocal %249 {approx = true} : vector<32x1xf32> -> vector<32x1xf32>
    %c512_i32_126 = arith.constant 512 : i32
    %251 = vector.broadcast %c512_i32_126 : i32 to vector<1x1024xi32>
    %252 = arith.cmpi sge, %7, %251 : vector<1x1024xi32>
    %253 = vector.shape_cast %252 : vector<1x1024xi1> to vector<1x1024xi1>
    %254 = vector.broadcast %253 : vector<1x1024xi1> to vector<32x1024xi1>
    %255 = vector.shape_cast %250 : vector<32x1xf32> to vector<32x1xf32>
    %256 = vector.broadcast %255 : vector<32x1xf32> to vector<32x1024xf32>
    %257 = vector.shape_cast %234 : vector<32x1xf32> to vector<32x1xf32>
    %258 = vector.broadcast %257 : vector<32x1xf32> to vector<32x1024xf32>
    %259 = arith.select %254, %256, %258 : vector<32x1024xi1>, vector<32x1024xf32>
    %cst_127 = arith.constant 1.000000e+00 : f32
    %260 = vector.broadcast %cst_127 : f32 to vector<32x1024xf32>
    %261 = arith.addf %259, %260 : vector<32x1024xf32>
    %262 = arith.mulf %200, %261 : vector<32x1024xf32>
    %c0_128 = arith.constant 0 : index
    %c0_129 = arith.constant 0 : index
    %263 = vector.load %arg38[%c0_128, %c0_129] : memref<32x1xf32, #tpu.memory_space<vmem>>, vector<32x1xf32>
    %c0_130 = arith.constant 0 : index
    %c0_131 = arith.constant 0 : index
    %264 = vector.load %arg39[%c0_130, %c0_131] : memref<32x1xf32, #tpu.memory_space<vmem>>, vector<32x1xf32>
    %c0_132 = arith.constant 0 : index
    %c0_133 = arith.constant 0 : index
    %265 = vector.load %arg40[%c0_132, %c0_133] : memref<16x32xbf16, #tpu.memory_space<vmem>>, vector<16x32xbf16>
    %c0_134 = arith.constant 0 : index
    %c0_135 = arith.constant 0 : index
    %266 = vector.load %arg41[%c0_134, %c0_135] : memref<16x1xf32, #tpu.memory_space<vmem>>, vector<16x1xf32>
    %c0_136 = arith.constant 0 : index
    %c0_137 = arith.constant 0 : index
    %267 = vector.load %arg42[%c0_136, %c0_137] : memref<16x1xf32, #tpu.memory_space<vmem>>, vector<16x1xf32>
    %c0_138 = arith.constant 0 : index
    %c0_139 = arith.constant 0 : index
    %268 = vector.load %arg43[%c0_138, %c0_139] : memref<16x1xf32, #tpu.memory_space<vmem>>, vector<16x1xf32>
    %c0_140 = arith.constant 0 : index
    %c0_141 = arith.constant 0 : index
    %269 = vector.load %arg44[%c0_140, %c0_141] : memref<16x16xbf16, #tpu.memory_space<vmem>>, vector<16x16xbf16>
    %c0_142 = arith.constant 0 : index
    %c0_143 = arith.constant 0 : index
    %270 = vector.load %arg45[%c0_142, %c0_143] : memref<16x1xf32, #tpu.memory_space<vmem>>, vector<16x1xf32>
    %271 = vector.broadcast %263 : vector<32x1xf32> to vector<32x1024xf32>
    %272 = arith.mulf %262, %271 : vector<32x1024xf32>
    %273 = vector.broadcast %264 : vector<32x1xf32> to vector<32x1024xf32>
    %274 = arith.addf %272, %273 : vector<32x1024xf32>
    %cst_144 = arith.constant 0.000000e+00 : f32
    %275 = vector.broadcast %cst_144 : f32 to vector<32x1024xf32>
    %276 = arith.maximumf %274, %275 : vector<32x1024xf32>
    %277 = arith.truncf %276 : vector<32x1024xf32> to vector<32x1024xbf16>
    %cst_145 = arith.constant dense<0.000000e+00> : vector<16x1024xf32>
    %278 = tpu.matmul %265, %277, %cst_145 {dimension_numbers = #tpu.dot_dimension_numbers<[1], [0], [0], [1], [0, 0, 1, 1], [], []>} : vector<16x32xbf16>, vector<32x1024xbf16>, vector<16x1024xf32> -> vector<16x1024xf32>
    %279 = vector.broadcast %266 : vector<16x1xf32> to vector<16x1024xf32>
    %280 = arith.addf %278, %279 : vector<16x1024xf32>
    %281 = vector.extract_strided_slice %280 {offsets = [0, 0], sizes = [16, 512], strides = [1, 1]} : vector<16x1024xf32> to vector<16x512xf32>
    %cst_146 = arith.constant dense<0xFF800000> : vector<16xf32>
    %282 = vector.multi_reduction <maximumf>, %281, %cst_146 [1] : vector<16x512xf32> to vector<16xf32>
    %283 = vector.shape_cast %282 : vector<16xf32> to vector<16x1xf32>
    %284 = arith.mulf %283, %267 : vector<16x1xf32>
    %285 = arith.addf %284, %268 : vector<16x1xf32>
    %cst_147 = arith.constant 0.000000e+00 : f32
    %286 = vector.broadcast %cst_147 : f32 to vector<16x1xf32>
    %287 = arith.maximumf %285, %286 : vector<16x1xf32>
    %288 = arith.truncf %287 : vector<16x1xf32> to vector<16x1xbf16>
    %cst_148 = arith.constant dense<0.000000e+00> : vector<16x1xf32>
    %289 = tpu.matmul %269, %288, %cst_148 {dimension_numbers = #tpu.dot_dimension_numbers<[1], [0], [0], [1], [0, 0, 1, 1], [], []>} : vector<16x16xbf16>, vector<16x1xbf16>, vector<16x1xf32> -> vector<16x1xf32>
    %290 = arith.addf %289, %270 : vector<16x1xf32>
    %cst_149 = arith.constant 0.000000e+00 : f32
    %291 = vector.broadcast %cst_149 : f32 to vector<16x1xf32>
    %292 = arith.subf %291, %290 : vector<16x1xf32>
    %293 = math.exp %292 : vector<16x1xf32>
    %cst_150 = arith.constant 1.000000e+00 : f32
    %294 = vector.broadcast %cst_150 : f32 to vector<16x1xf32>
    %295 = arith.addf %294, %293 : vector<16x1xf32>
    %296 = tpu.reciprocal %295 {approx = true} : vector<16x1xf32> -> vector<16x1xf32>
    %297 = vector.extract_strided_slice %280 {offsets = [0, 512], sizes = [16, 512], strides = [1, 1]} : vector<16x1024xf32> to vector<16x512xf32>
    %cst_151 = arith.constant dense<0xFF800000> : vector<16xf32>
    %298 = vector.multi_reduction <maximumf>, %297, %cst_151 [1] : vector<16x512xf32> to vector<16xf32>
    %299 = vector.shape_cast %298 : vector<16xf32> to vector<16x1xf32>
    %300 = arith.mulf %299, %267 : vector<16x1xf32>
    %301 = arith.addf %300, %268 : vector<16x1xf32>
    %cst_152 = arith.constant 0.000000e+00 : f32
    %302 = vector.broadcast %cst_152 : f32 to vector<16x1xf32>
    %303 = arith.maximumf %301, %302 : vector<16x1xf32>
    %304 = arith.truncf %303 : vector<16x1xf32> to vector<16x1xbf16>
    %cst_153 = arith.constant dense<0.000000e+00> : vector<16x1xf32>
    %305 = tpu.matmul %269, %304, %cst_153 {dimension_numbers = #tpu.dot_dimension_numbers<[1], [0], [0], [1], [0, 0, 1, 1], [], []>} : vector<16x16xbf16>, vector<16x1xbf16>, vector<16x1xf32> -> vector<16x1xf32>
    %306 = arith.addf %305, %270 : vector<16x1xf32>
    %cst_154 = arith.constant 0.000000e+00 : f32
    %307 = vector.broadcast %cst_154 : f32 to vector<16x1xf32>
    %308 = arith.subf %307, %306 : vector<16x1xf32>
    %309 = math.exp %308 : vector<16x1xf32>
    %cst_155 = arith.constant 1.000000e+00 : f32
    %310 = vector.broadcast %cst_155 : f32 to vector<16x1xf32>
    %311 = arith.addf %310, %309 : vector<16x1xf32>
    %312 = tpu.reciprocal %311 {approx = true} : vector<16x1xf32> -> vector<16x1xf32>
    %c512_i32_156 = arith.constant 512 : i32
    %313 = vector.broadcast %c512_i32_156 : i32 to vector<1x1024xi32>
    %314 = arith.cmpi sge, %7, %313 : vector<1x1024xi32>
    %315 = vector.shape_cast %314 : vector<1x1024xi1> to vector<1x1024xi1>
    %316 = vector.broadcast %315 : vector<1x1024xi1> to vector<16x1024xi1>
    %317 = vector.shape_cast %312 : vector<16x1xf32> to vector<16x1xf32>
    %318 = vector.broadcast %317 : vector<16x1xf32> to vector<16x1024xf32>
    %319 = vector.shape_cast %296 : vector<16x1xf32> to vector<16x1xf32>
    %320 = vector.broadcast %319 : vector<16x1xf32> to vector<16x1024xf32>
    %321 = arith.select %316, %318, %320 : vector<16x1024xi1>, vector<16x1024xf32>
    %c0_157 = arith.constant 0 : index
    %c0_158 = arith.constant 0 : index
    %322 = vector.load %arg46[%c0_157, %c0_158] : memref<32x32xbf16, #tpu.memory_space<vmem>>, vector<32x32xbf16>
    %c0_159 = arith.constant 0 : index
    %c0_160 = arith.constant 0 : index
    %323 = vector.load %arg47[%c0_159, %c0_160] : memref<32x1xf32, #tpu.memory_space<vmem>>, vector<32x1xf32>
    %324 = arith.truncf %262 : vector<32x1024xf32> to vector<32x1024xbf16>
    %cst_161 = arith.constant dense<0.000000e+00> : vector<32x1024xf32>
    %325 = tpu.matmul %322, %324, %cst_161 {dimension_numbers = #tpu.dot_dimension_numbers<[1], [0], [0], [1], [0, 0, 1, 1], [], []>} : vector<32x32xbf16>, vector<32x1024xbf16>, vector<32x1024xf32> -> vector<32x1024xf32>
    %326 = vector.broadcast %323 : vector<32x1xf32> to vector<32x1024xf32>
    %327 = arith.addf %325, %326 : vector<32x1024xf32>
    %328 = vector.extract_strided_slice %327 {offsets = [0, 0], sizes = [16, 1024], strides = [1, 1]} : vector<32x1024xf32> to vector<16x1024xf32>
    %329 = arith.mulf %321, %328 : vector<16x1024xf32>
    %330 = vector.extract_strided_slice %327 {offsets = [16, 0], sizes = [16, 1024], strides = [1, 1]} : vector<32x1024xf32> to vector<16x1024xf32>
    %331 = arith.addf %329, %330 : vector<16x1024xf32>
    %c0_162 = arith.constant 0 : index
    %c0_163 = arith.constant 0 : index
    %332 = vector.load %arg48[%c0_162, %c0_163] : memref<2x16xbf16, #tpu.memory_space<vmem>>, vector<2x16xbf16>
    %c0_164 = arith.constant 0 : index
    %c0_165 = arith.constant 0 : index
    %333 = vector.load %arg49[%c0_164, %c0_165] : memref<2x1xf32, #tpu.memory_space<vmem>>, vector<2x1xf32>
    %334 = arith.truncf %331 : vector<16x1024xf32> to vector<16x1024xbf16>
    %cst_166 = arith.constant dense<0.000000e+00> : vector<2x1024xf32>
    %335 = tpu.matmul %332, %334, %cst_166 {dimension_numbers = #tpu.dot_dimension_numbers<[1], [0], [0], [1], [0, 0, 1, 1], [], []>} : vector<2x16xbf16>, vector<16x1024xbf16>, vector<2x1024xf32> -> vector<2x1024xf32>
    %336 = vector.broadcast %333 : vector<2x1xf32> to vector<2x1024xf32>
    %337 = arith.addf %335, %336 : vector<2x1024xf32>
    %c0_167 = arith.constant 0 : index
    %c0_168 = arith.constant 0 : index
    %338 = vector.load %arg50[%c0_167, %c0_168] : memref<2x1024xf32, #tpu.memory_space<vmem>>, vector<2x1024xf32>
    tpu.vector_store %arg50[%c0_167, %c0_168], %337 {strides = array<i32>} : memref<2x1024xf32, #tpu.memory_space<vmem>>, vector<2x1024xf32>,
    return
  }
  func.func @transform_0(%arg0: i32) -> (i32, i32) {
    %c0_i32 = arith.constant 0 : i32
    %c0_i32_0 = arith.constant 0 : i32
    return %c0_i32, %arg0 : i32, i32
  }
  func.func @transform_1(%arg0: i32) -> (i32, i32) {
    %c0_i32 = arith.constant 0 : i32
    %c0_i32_0 = arith.constant 0 : i32
    %c0_i32_1 = arith.constant 0 : i32
    return %c0_i32, %c0_i32_0 : i32, i32
  }
  func.func @transform_2(%arg0: i32) -> (i32, i32) {
    %c0_i32 = arith.constant 0 : i32
    %c0_i32_0 = arith.constant 0 : i32
    %c0_i32_1 = arith.constant 0 : i32
    return %c0_i32, %c0_i32_0 : i32, i32
  }
  func.func @transform_3(%arg0: i32) -> (i32, i32) {
    %c0_i32 = arith.constant 0 : i32
    %c0_i32_0 = arith.constant 0 : i32
    %c0_i32_1 = arith.constant 0 : i32
    return %c0_i32, %c0_i32_0 : i32, i32
  }
  func.func @transform_4(%arg0: i32) -> (i32, i32) {
    %c0_i32 = arith.constant 0 : i32
    %c0_i32_0 = arith.constant 0 : i32
    %c0_i32_1 = arith.constant 0 : i32
    return %c0_i32, %c0_i32_0 : i32, i32
  }
  func.func @transform_5(%arg0: i32) -> (i32, i32) {
    %c0_i32 = arith.constant 0 : i32
    %c0_i32_0 = arith.constant 0 : i32
    %c0_i32_1 = arith.constant 0 : i32
    return %c0_i32, %c0_i32_0 : i32, i32
  }
  func.func @transform_6(%arg0: i32) -> (i32, i32) {
    %c0_i32 = arith.constant 0 : i32
    %c0_i32_0 = arith.constant 0 : i32
    %c0_i32_1 = arith.constant 0 : i32
    return %c0_i32, %c0_i32_0 : i32, i32
  }
  func.func @transform_7(%arg0: i32) -> (i32, i32) {
    %c0_i32 = arith.constant 0 : i32
    %c0_i32_0 = arith.constant 0 : i32
    %c0_i32_1 = arith.constant 0 : i32
    return %c0_i32, %c0_i32_0 : i32, i32
  }
  func.func @transform_8(%arg0: i32) -> (i32, i32) {
    %c0_i32 = arith.constant 0 : i32
    %c0_i32_0 = arith.constant 0 : i32
    %c0_i32_1 = arith.constant 0 : i32
    return %c0_i32, %c0_i32_0 : i32, i32
  }
  func.func @transform_9(%arg0: i32) -> (i32, i32) {
    %c0_i32 = arith.constant 0 : i32
    %c0_i32_0 = arith.constant 0 : i32
    %c0_i32_1 = arith.constant 0 : i32
    return %c0_i32, %c0_i32_0 : i32, i32
  }
  func.func @transform_10(%arg0: i32) -> (i32, i32) {
    %c0_i32 = arith.constant 0 : i32
    %c0_i32_0 = arith.constant 0 : i32
    %c0_i32_1 = arith.constant 0 : i32
    return %c0_i32, %c0_i32_0 : i32, i32
  }
  func.func @transform_11(%arg0: i32) -> (i32, i32) {
    %c0_i32 = arith.constant 0 : i32
    %c0_i32_0 = arith.constant 0 : i32
    %c0_i32_1 = arith.constant 0 : i32
    return %c0_i32, %c0_i32_0 : i32, i32
  }
  func.func @transform_12(%arg0: i32) -> (i32, i32) {
    %c0_i32 = arith.constant 0 : i32
    %c0_i32_0 = arith.constant 0 : i32
    %c0_i32_1 = arith.constant 0 : i32
    return %c0_i32, %c0_i32_0 : i32, i32
  }
  func.func @transform_13(%arg0: i32) -> (i32, i32) {
    %c0_i32 = arith.constant 0 : i32
    %c0_i32_0 = arith.constant 0 : i32
    %c0_i32_1 = arith.constant 0 : i32
    return %c0_i32, %c0_i32_0 : i32, i32
  }
  func.func @transform_14(%arg0: i32) -> (i32, i32) {
    %c0_i32 = arith.constant 0 : i32
    %c0_i32_0 = arith.constant 0 : i32
    %c0_i32_1 = arith.constant 0 : i32
    return %c0_i32, %c0_i32_0 : i32, i32
  }
  func.func @transform_15(%arg0: i32) -> (i32, i32) {
    %c0_i32 = arith.constant 0 : i32
    %c0_i32_0 = arith.constant 0 : i32
    %c0_i32_1 = arith.constant 0 : i32
    return %c0_i32, %c0_i32_0 : i32, i32
  }
  func.func @transform_16(%arg0: i32) -> (i32, i32) {
    %c0_i32 = arith.constant 0 : i32
    %c0_i32_0 = arith.constant 0 : i32
    %c0_i32_1 = arith.constant 0 : i32
    return %c0_i32, %c0_i32_0 : i32, i32
  }
  func.func @transform_17(%arg0: i32) -> (i32, i32) {
    %c0_i32 = arith.constant 0 : i32
    %c0_i32_0 = arith.constant 0 : i32
    %c0_i32_1 = arith.constant 0 : i32
    return %c0_i32, %c0_i32_0 : i32, i32
  }
  func.func @transform_18(%arg0: i32) -> (i32, i32) {
    %c0_i32 = arith.constant 0 : i32
    %c0_i32_0 = arith.constant 0 : i32
    %c0_i32_1 = arith.constant 0 : i32
    return %c0_i32, %c0_i32_0 : i32, i32
  }
  func.func @transform_19(%arg0: i32) -> (i32, i32) {
    %c0_i32 = arith.constant 0 : i32
    %c0_i32_0 = arith.constant 0 : i32
    %c0_i32_1 = arith.constant 0 : i32
    return %c0_i32, %c0_i32_0 : i32, i32
  }
  func.func @transform_20(%arg0: i32) -> (i32, i32) {
    %c0_i32 = arith.constant 0 : i32
    %c0_i32_0 = arith.constant 0 : i32
    %c0_i32_1 = arith.constant 0 : i32
    return %c0_i32, %c0_i32_0 : i32, i32
  }
  func.func @transform_21(%arg0: i32) -> (i32, i32) {
    %c0_i32 = arith.constant 0 : i32
    %c0_i32_0 = arith.constant 0 : i32
    %c0_i32_1 = arith.constant 0 : i32
    return %c0_i32, %c0_i32_0 : i32, i32
  }
  func.func @transform_22(%arg0: i32) -> (i32, i32) {
    %c0_i32 = arith.constant 0 : i32
    %c0_i32_0 = arith.constant 0 : i32
    %c0_i32_1 = arith.constant 0 : i32
    return %c0_i32, %c0_i32_0 : i32, i32
  }
  func.func @transform_23(%arg0: i32) -> (i32, i32) {
    %c0_i32 = arith.constant 0 : i32
    %c0_i32_0 = arith.constant 0 : i32
    %c0_i32_1 = arith.constant 0 : i32
    return %c0_i32, %c0_i32_0 : i32, i32
  }
  func.func @transform_24(%arg0: i32) -> (i32, i32) {
    %c0_i32 = arith.constant 0 : i32
    %c0_i32_0 = arith.constant 0 : i32
    %c0_i32_1 = arith.constant 0 : i32
    return %c0_i32, %c0_i32_0 : i32, i32
  }
  func.func @transform_25(%arg0: i32) -> (i32, i32) {
    %c0_i32 = arith.constant 0 : i32
    %c0_i32_0 = arith.constant 0 : i32
    %c0_i32_1 = arith.constant 0 : i32
    return %c0_i32, %c0_i32_0 : i32, i32
  }
  func.func @transform_26(%arg0: i32) -> (i32, i32) {
    %c0_i32 = arith.constant 0 : i32
    %c0_i32_0 = arith.constant 0 : i32
    %c0_i32_1 = arith.constant 0 : i32
    return %c0_i32, %c0_i32_0 : i32, i32
  }
  func.func @transform_27(%arg0: i32) -> (i32, i32) {
    %c0_i32 = arith.constant 0 : i32
    %c0_i32_0 = arith.constant 0 : i32
    %c0_i32_1 = arith.constant 0 : i32
    return %c0_i32, %c0_i32_0 : i32, i32
  }
  func.func @transform_28(%arg0: i32) -> (i32, i32) {
    %c0_i32 = arith.constant 0 : i32
    %c0_i32_0 = arith.constant 0 : i32
    %c0_i32_1 = arith.constant 0 : i32
    return %c0_i32, %c0_i32_0 : i32, i32
  }
  func.func @transform_29(%arg0: i32) -> (i32, i32) {
    %c0_i32 = arith.constant 0 : i32
    %c0_i32_0 = arith.constant 0 : i32
    %c0_i32_1 = arith.constant 0 : i32
    return %c0_i32, %c0_i32_0 : i32, i32
  }
  func.func @transform_30(%arg0: i32) -> (i32, i32) {
    %c0_i32 = arith.constant 0 : i32
    %c0_i32_0 = arith.constant 0 : i32
    %c0_i32_1 = arith.constant 0 : i32
    return %c0_i32, %c0_i32_0 : i32, i32
  }
  func.func @transform_31(%arg0: i32) -> (i32, i32) {
    %c0_i32 = arith.constant 0 : i32
    %c0_i32_0 = arith.constant 0 : i32
    %c0_i32_1 = arith.constant 0 : i32
    return %c0_i32, %c0_i32_0 : i32, i32
  }
  func.func @transform_32(%arg0: i32) -> (i32, i32) {
    %c0_i32 = arith.constant 0 : i32
    %c0_i32_0 = arith.constant 0 : i32
    %c0_i32_1 = arith.constant 0 : i32
    return %c0_i32, %c0_i32_0 : i32, i32
  }
  func.func @transform_33(%arg0: i32) -> (i32, i32) {
    %c0_i32 = arith.constant 0 : i32
    %c0_i32_0 = arith.constant 0 : i32
    %c0_i32_1 = arith.constant 0 : i32
    return %c0_i32, %c0_i32_0 : i32, i32
  }
  func.func @transform_34(%arg0: i32) -> (i32, i32) {
    %c0_i32 = arith.constant 0 : i32
    %c0_i32_0 = arith.constant 0 : i32
    %c0_i32_1 = arith.constant 0 : i32
    return %c0_i32, %c0_i32_0 : i32, i32
  }
  func.func @transform_35(%arg0: i32) -> (i32, i32) {
    %c0_i32 = arith.constant 0 : i32
    %c0_i32_0 = arith.constant 0 : i32
    %c0_i32_1 = arith.constant 0 : i32
    return %c0_i32, %c0_i32_0 : i32, i32
  }
  func.func @transform_36(%arg0: i32) -> (i32, i32) {
    %c0_i32 = arith.constant 0 : i32
    %c0_i32_0 = arith.constant 0 : i32
    %c0_i32_1 = arith.constant 0 : i32
    return %c0_i32, %c0_i32_0 : i32, i32
  }
  func.func @transform_37(%arg0: i32) -> (i32, i32) {
    %c0_i32 = arith.constant 0 : i32
    %c0_i32_0 = arith.constant 0 : i32
    %c0_i32_1 = arith.constant 0 : i32
    return %c0_i32, %c0_i32_0 : i32, i32
  }
  func.func @transform_38(%arg0: i32) -> (i32, i32) {
    %c0_i32 = arith.constant 0 : i32
    %c0_i32_0 = arith.constant 0 : i32
    %c0_i32_1 = arith.constant 0 : i32
    return %c0_i32, %c0_i32_0 : i32, i32
  }
  func.func @transform_39(%arg0: i32) -> (i32, i32) {
    %c0_i32 = arith.constant 0 : i32
    %c0_i32_0 = arith.constant 0 : i32
    %c0_i32_1 = arith.constant 0 : i32
    return %c0_i32, %c0_i32_0 : i32, i32
  }
  func.func @transform_40(%arg0: i32) -> (i32, i32) {
    %c0_i32 = arith.constant 0 : i32
    %c0_i32_0 = arith.constant 0 : i32
    %c0_i32_1 = arith.constant 0 : i32
    return %c0_i32, %c0_i32_0 : i32, i32
  }
  func.func @transform_41(%arg0: i32) -> (i32, i32) {
    %c0_i32 = arith.constant 0 : i32
    %c0_i32_0 = arith.constant 0 : i32
    %c0_i32_1 = arith.constant 0 : i32
    return %c0_i32, %c0_i32_0 : i32, i32
  }
  func.func @transform_42(%arg0: i32) -> (i32, i32) {
    %c0_i32 = arith.constant 0 : i32
    %c0_i32_0 = arith.constant 0 : i32
    %c0_i32_1 = arith.constant 0 : i32
    return %c0_i32, %c0_i32_0 : i32, i32
  }
  func.func @transform_43(%arg0: i32) -> (i32, i32) {
    %c0_i32 = arith.constant 0 : i32
    %c0_i32_0 = arith.constant 0 : i32
    %c0_i32_1 = arith.constant 0 : i32
    return %c0_i32, %c0_i32_0 : i32, i32
  }
  func.func @transform_44(%arg0: i32) -> (i32, i32) {
    %c0_i32 = arith.constant 0 : i32
    %c0_i32_0 = arith.constant 0 : i32
    %c0_i32_1 = arith.constant 0 : i32
    return %c0_i32, %c0_i32_0 : i32, i32
  }
  func.func @transform_45(%arg0: i32) -> (i32, i32) {
    %c0_i32 = arith.constant 0 : i32
    %c0_i32_0 = arith.constant 0 : i32
    %c0_i32_1 = arith.constant 0 : i32
    return %c0_i32, %c0_i32_0 : i32, i32
  }
  func.func @transform_46(%arg0: i32) -> (i32, i32) {
    %c0_i32 = arith.constant 0 : i32
    %c0_i32_0 = arith.constant 0 : i32
    %c0_i32_1 = arith.constant 0 : i32
    return %c0_i32, %c0_i32_0 : i32, i32
  }
  func.func @transform_47(%arg0: i32) -> (i32, i32) {
    %c0_i32 = arith.constant 0 : i32
    %c0_i32_0 = arith.constant 0 : i32
    %c0_i32_1 = arith.constant 0 : i32
    return %c0_i32, %c0_i32_0 : i32, i32
  }
  func.func @transform_48(%arg0: i32) -> (i32, i32) {
    %c0_i32 = arith.constant 0 : i32
    %c0_i32_0 = arith.constant 0 : i32
    %c0_i32_1 = arith.constant 0 : i32
    return %c0_i32, %c0_i32_0 : i32, i32
  }
  func.func @transform_49(%arg0: i32) -> (i32, i32) {
    %c0_i32 = arith.constant 0 : i32
    %c0_i32_0 = arith.constant 0 : i32
    return %c0_i32, %arg0 : i32, i32
  }
}

</mosaic_0001>

<bundles_post_ra>
// kernel: tpu_custom_call.1
= control target key start
LH: loop header
LB: loop body
LE: loop exit
PB: predicated region body
PF: predicated region fallthrough
CT: control target
= control target key end

     0   :  { %s5512_s6 = smov 1   ;;  %s5513_s10 = smov 2   ;;  %s7400_s0 = inlined_call_operand.smem [shape: u32[50], index: -1, kind: input, shape index: {}] }
   0x1   :  { %s5570_s5 = sld [smem:[%s7400_s0]]   ;;  %s5514_s14 = smov 3  }
   0x2   :  { %s5575_s9 = sld [smem:[%s7400_s0 + %s5512_s6]]   ;;  %s5515_s18 = smov 4  }
   0x3   :  { %s5580_s13 = sld [smem:[%s7400_s0 + %s5513_s10]]   ;;  %s5516_s22 = smov 5  }
   0x4   :  { %s5585_s17 = sld [smem:[%s7400_s0 + %s5514_s14]]   ;;  %s5517_s26 = smov 6  }
   0x5   :  { %s5590_s21 = sld [smem:[%s7400_s0 + %s5515_s18]]   ;;  %s5518_s30 = smov 7  }
   0x6   :  { %s5595_s25 = sld [smem:[%s7400_s0 + %s5516_s22]]   ;;  %s5519_s4 = smov 8  }
   0x7   :  { %7478 = sst [smem:[#allocation5_spill]] %s5570_s5  ;;  %s5520_s10 = smov 9  }
   0x8   :  { %7479 = sst [smem:[#allocation6_spill]] %s5575_s9  ;;  %s5521_s15 = smov 10  }
   0x9   :  { %s5600_s29 = sld [smem:[%s7400_s0 + %s5517_s26]]   ;;  %s5522_s20 = smov 11  }
   0xa   :  { %s5605_s3 = sld [smem:[%s7400_s0 + %s5518_s30]]   ;;  %s5523_s26 = smov 12  }
   0xb   :  { %s5610_s8 = sld [smem:[%s7400_s0 + %s5519_s4]]   ;;  %s5524_s1 = smov 13  }
   0xc   :  { %s5615_s14 = sld [smem:[%s7400_s0 + %s5520_s10]]   ;;  %s5525_s7 = smov 14  }
   0xd   :  { %s5620_s19 = sld [smem:[%s7400_s0 + %s5521_s15]]   ;;  %s5526_s15 = smov 15  }
   0xe   :  { %s5625_s24 = sld [smem:[%s7400_s0 + %s5522_s20]]   ;;  %s5527_s22 = smov 16  }
   0xf   :  { %s5630_s30 = sld [smem:[%s7400_s0 + %s5523_s26]]   ;;  %s5528_s28 = smov 17  }
  0x10   :  { %7480 = sst [smem:[#allocation7_spill]] %s5605_s3 }
  0x11   :  { %7481 = sst [smem:[#allocation8_spill]] %s5610_s8 }
  0x12   :  { %s5635_s6 = sld [smem:[%s7400_s0 + %s5524_s1]]  }
  0x13   :  { %s5640_s12 = sld [smem:[%s7400_s0 + %s5525_s7]]   ;;  %s5529_s7 = smov 18  }
  0x14   :  { %s5645_s20 = sld [smem:[%s7400_s0 + %s5526_s15]]   ;;  %s5530_s15 = smov 19  }
  0x15   :  { %s5650_s27 = sld [smem:[%s7400_s0 + %s5527_s22]]   ;;  %s5531_s22 = smov 20  }
  0x16   :  { %s5655_s4 = sld [smem:[%s7400_s0 + %s5528_s28]]   ;;  %s5532_s28 = smov 21  }
  0x18   :  { %7482 = sst [smem:[#allocation9_spill]] %s5635_s6 }
  0x19   :  { %7483 = sst [smem:[#allocation10_spill]] %s5640_s12 }
  0x1a   :  { %7484 = sst [smem:[#allocation11_spill]] %s5645_s20 }
  0x1b   :  { %7485 = sst [smem:[#allocation12_spill]] %s5650_s27 }
  0x1c   :  { %7486 = sst [smem:[#allocation13_spill]] %s5655_s4 }
  0x1d   :  { %s5660_s6 = sld [smem:[%s7400_s0 + %s5529_s7]]   ;;  %s5533_s7 = smov 22  }
  0x1e   :  { %s5665_s20 = sld [smem:[%s7400_s0 + %s5530_s15]]   ;;  %s5534_s15 = smov 23  }
  0x1f   :  { %s5670_s27 = sld [smem:[%s7400_s0 + %s5531_s22]]   ;;  %s5535_s22 = smov 24  }
  0x20   :  { %s5675_s4 = sld [smem:[%s7400_s0 + %s5532_s28]]   ;;  %s5536_s28 = smov 25  }
  0x23   :  { %7487 = sst [smem:[#allocation14_spill]] %s5660_s6 }
  0x24   :  { %7488 = sst [smem:[#allocation15_spill]] %s5665_s20 }
  0x25   :  { %7489 = sst [smem:[#allocation16_spill]] %s5670_s27 }
  0x26   :  { %7490 = sst [smem:[#allocation17_spill]] %s5675_s4 }
  0x27   :  { %s5680_s6 = sld [smem:[%s7400_s0 + %s5533_s7]]   ;;  %s5537_s7 = smov 26  }
  0x28   :  { %s5685_s20 = sld [smem:[%s7400_s0 + %s5534_s15]]   ;;  %s5538_s15 = smov 27  }
  0x29   :  { %s5690_s27 = sld [smem:[%s7400_s0 + %s5535_s22]]   ;;  %s5539_s22 = smov 28  }
  0x2a   :  { %s5695_s4 = sld [smem:[%s7400_s0 + %s5536_s28]]   ;;  %s5540_s28 = smov 29  }
  0x2d   :  { %7491 = sst [smem:[#allocation18_spill]] %s5680_s6 }
  0x2e   :  { %7492 = sst [smem:[#allocation19_spill]] %s5685_s20 }
  0x2f   :  { %7493 = sst [smem:[#allocation20_spill]] %s5690_s27 }
  0x30   :  { %7494 = sst [smem:[#allocation21_spill]] %s5695_s4 }
  0x31   :  { %s5700_s6 = sld [smem:[%s7400_s0 + %s5537_s7]]   ;;  %s5541_s7 = smov 30  }
  0x32   :  { %s5705_s20 = sld [smem:[%s7400_s0 + %s5538_s15]]   ;;  %s5542_s15 = smov 31  }
  0x33   :  { %s5710_s27 = sld [smem:[%s7400_s0 + %s5539_s22]]   ;;  %s5543_s22 = smov 32  }
  0x34   :  { %s5715_s4 = sld [smem:[%s7400_s0 + %s5540_s28]]   ;;  %s5544_s28 = smov 33  }
  0x37   :  { %7495 = sst [smem:[#allocation22_spill]] %s5700_s6 }
  0x38   :  { %7496 = sst [smem:[#allocation23_spill]] %s5705_s20 }
  0x39   :  { %7497 = sst [smem:[#allocation24_spill]] %s5710_s27 }
  0x3a   :  { %7498 = sst [smem:[#allocation25_spill]] %s5715_s4 }
  0x3b   :  { %s5720_s6 = sld [smem:[%s7400_s0 + %s5541_s7]]   ;;  %s5545_s7 = smov 34  }
  0x3c   :  { %s5725_s20 = sld [smem:[%s7400_s0 + %s5542_s15]]   ;;  %s5546_s15 = smov 35  }
  0x3d   :  { %s5730_s27 = sld [smem:[%s7400_s0 + %s5543_s22]]   ;;  %s5547_s22 = smov 36  }
  0x3e   :  { %s5735_s4 = sld [smem:[%s7400_s0 + %s5544_s28]]   ;;  %s5548_s28 = smov 37  }
  0x41   :  { %7499 = sst [smem:[#allocation26_spill]] %s5720_s6 }
  0x42   :  { %7500 = sst [smem:[#allocation27_spill]] %s5725_s20 }
  0x43   :  { %7501 = sst [smem:[#allocation28_spill]] %s5730_s27 }
  0x44   :  { %7502 = sst [smem:[#allocation29_spill]] %s5735_s4 }
  0x45   :  { %s5740_s6 = sld [smem:[%s7400_s0 + %s5545_s7]]   ;;  %s5549_s7 = smov 38  }
  0x46   :  { %s5745_s20 = sld [smem:[%s7400_s0 + %s5546_s15]]   ;;  %s5550_s15 = smov 39  }
  0x47   :  { %s5750_s27 = sld [smem:[%s7400_s0 + %s5547_s22]]   ;;  %s5551_s22 = smov 40  }
  0x48   :  { %s5755_s4 = sld [smem:[%s7400_s0 + %s5548_s28]]   ;;  %s5552_s28 = smov 41  }
  0x4b   :  { %7503 = sst [smem:[#allocation30_spill]] %s5740_s6 }
  0x4c   :  { %7504 = sst [smem:[#allocation31_spill]] %s5745_s20 }
  0x4d   :  { %7505 = sst [smem:[#allocation32_spill]] %s5750_s27 }
  0x4e   :  { %7506 = sst [smem:[#allocation33_spill]] %s5755_s4 }
  0x4f   :  { %s5760_s6 = sld [smem:[%s7400_s0 + %s5549_s7]]   ;;  %s5553_s7 = smov 42  }
  0x50   :  { %s5765_s20 = sld [smem:[%s7400_s0 + %s5550_s15]]   ;;  %s5554_s15 = smov 43  }
  0x51   :  { %s5770_s27 = sld [smem:[%s7400_s0 + %s5551_s22]]   ;;  %s5555_s22 = smov 44  }
  0x52   :  { %s5775_s4 = sld [smem:[%s7400_s0 + %s5552_s28]]   ;;  %s5556_s28 = smov 45  }
  0x55   :  { %7507 = sst [smem:[#allocation34_spill]] %s5760_s6 }
  0x56   :  { %7508 = sst [smem:[#allocation35_spill]] %s5765_s20 }
  0x57   :  { %7509 = sst [smem:[#allocation36_spill]] %s5770_s27 }
  0x58   :  { %7510 = sst [smem:[#allocation37_spill]] %s5775_s4 }
  0x59   :  { %s5780_s6 = sld [smem:[%s7400_s0 + %s5553_s7]]   ;;  %s5557_s7 = smov 46  }
  0x5a   :  { %s5785_s20 = sld [smem:[%s7400_s0 + %s5554_s15]]   ;;  %s5558_s15 = smov 47  }
  0x5b   :  { %s5790_s27 = sld [smem:[%s7400_s0 + %s5555_s22]]   ;;  %s5559_s22 = smov 48  }
  0x5c   :  { %s5795_s4 = sld [smem:[%s7400_s0 + %s5556_s28]]   ;;  %s5560_s28 = smov 49  }
  0x5f   :  { %7511 = sst [smem:[#allocation38_spill]] %s5780_s6 }
  0x60   :  { %7512 = sst [smem:[#allocation39_spill]] %s5785_s20 }
  0x61   :  { %7513 = sst [smem:[#allocation40_spill]] %s5790_s27 }
  0x62   :  { %7514 = sst [smem:[#allocation41_spill]] %s5795_s4 }
  0x63   :  { %s5800_s6 = sld [smem:[%s7400_s0 + %s5557_s7]]  }
  0x64   :  { %s5805_s20 = sld [smem:[%s7400_s0 + %s5558_s15]]  }
  0x65   :  { %s5810_s27 = sld [smem:[%s7400_s0 + %s5559_s22]]  }
  0x66   :  { %s5815_s4 = sld [smem:[%s7400_s0 + %s5560_s28]]  }
  0x69   :  { %7515 = sst [smem:[#allocation42_spill]] %s5800_s6 }
  0x6a   :  { %104 = vsyncpa [#allocation3], 0 }
  0x6b   :  { %106 = vsyncpa [#allocation3 + $0x1], 0  ;;  %s5817_s7 = smov 0   ;;  %s5819_s10 = smov 0  }
  0x6c   :  { %s5821_s11 = smov 0   ;;  %s5823_s15 = smov 0  }
  0x6d LB: > { %s7516_s12 = sld [smem:[#allocation10_spill]]  ;;  %s5838_s0 = sadd.s32 4294967295, %s5510_s15   ;;  %s5510_s15 = sphi %s5823_s15, %s7641_s15   ;;  %s5506_s11 = sphi %s5821_s11, %s7640_s11   ;;  %s5502_s10 = sphi %s5819_s10, %s7639_s10   ;;  %s5498_s7 = sphi %s5817_s7, %s7638_s7  }
  0x6e   : > { %s7517_s6 = sld [smem:[#allocation42_spill]]  ;;  %s4992_s16 = sadd.s32 4294967294, %s5510_s15  }
  0x6f   : > { %s7518_s8 = sld [smem:[#allocation8_spill]]  ;;  %s5842_s18 = sadd.s32 1, %s5510_s15  }
  0x70   : > { %s7519_s3 = sld [smem:[#allocation7_spill]]  ;;  %s1153_s22 = sadd.s32 1, %s5506_s11 }
  0x71   : > { %s1150_s23 = ssub.s32 %s5510_s15, %s5842_s18  ;;  %p1163_p0 = scmp.ne.s32.totalorder %s5506_s11, %s5502_s10 }
  0x72   : > { %p1151_p1 = scmp.eq.s32.totalorder %s1150_s23, 0  ;;  %p1164_p2 = scmp.eq.s32.totalorder %s5838_s0, 1 }
  0x73   : > { %p1169_p3 = scmp.ne.s32.totalorder %s5502_s10, %s5498_s7  ;;  %p1170_p4 = scmp.eq.s32.totalorder %s4992_s16, 1 }
  0x74   : > { %s5853_s26 = scalar_select %p1151_p1, %s5506_s11, %s1153_s22  }
  0x75   : > { %p5855_p5 = por %p1164_p2, %p1163_p0  ;;  %p5859_p6 = por %p1170_p4, %p1169_p3 }
  0x76   : > { %p4995_p7 = scmp.ge.s32.totalorder %s5510_s15, 1  ;;  %p1341_p8 = scmp.lt.s32.totalorder %s5510_s15, 3 }
  0x78   : > { %p1342_p9 = pnand %p4995_p7, %p1341_p8 }
  0x7a   : > { %1345 = sbr.rel (%p1342_p9) target bundleno = 3403 (0xd4b), region = 216 }
  0x7f   : > { %s7522_s5 = sld [smem:[#allocation5_spill]]  ;;  %s4997_s2 = sshll.u32 %s5838_s0, 3  ;;  %v1471_v0 = vld [vmem:[%s5580_s13] sm:$0xff]  ;;  %v5561_v1 = vmov 0   ;;  %v1472_v3 = vld [vmem:[%s5580_s13 + $0x8] sm:$0xff]  ;;  %vm1527_vm0 = vcmask 1041408  }
  0x80   : > { %p1458_p10 = scmp.lt.s32.totalorder %s4997_s2, 15  ;;  %5333 = vset.pattern.permute.xlu0 %v5561_v1  ;;  %5334 = vset.pattern.permute.xlu1 %v5561_v1  ;;  %v1673_v2 = vld [vmem:[%s5585_s17] sm:$0xff]  ;;  %v1674_v4 = vld [vmem:[%s5585_s17 + $0x8] sm:$0xff]  ;;  %s7523_s9 = sld [smem:[#allocation6_spill]]  ;;  %vm1523_vm1 = vcmask 31744   ;;  %vm1780_vm2 = vcmask 130048  }
  0x81   : > { %1510 = vperm.xlu0 %5333, %v1471_v0   ;;  %1691 = vperm.xlu1 %5334, %v1673_v2   ;;  %v1675_v9 = vld [vmem:[%s5590_s21] sm:$0xff]  ;;  %v1680_v11 = vld [vmem:[%s5600_s29 + $0x8] sm:$0xff]  ;;  %s7524_s23 = sld [smem:[#allocation9_spill]]  ;;  %vm2794_vm3 = vcmask 261120   ;;  %vm4856_vm4 = vcmask 1045508   ;;  %vm4858_vm5 = vcmask 1043456  }
  0x82   : > { %s7643_s2 = smov (!%p1458_p10, %s4997_s2), 15  ;;  %5335 = vset.pattern.permute.xlu2 %v5561_v1  ;;  %v1679_v10 = vld [vmem:[%s5600_s29] sm:$0xff]  ;;  %v1676_v37 = vld [vmem:[%s5590_s21 + $0x8] sm:$0xff] }
  0x83   : > { %s4998_s16 = sshll.u32 %s7643_s2, 2  ;;  %1717 = vperm.xlu2 %5335, %v1675_v9   ;;  %s7525_s2 = sld [smem:[#allocation15_spill]] }
  0x85   : > { %s1461_s22 = scalar_lea.vmem %s7522_s5, %s4998_s16  ;;  %s7526_s16 = sld [smem:[#allocation16_spill]] }
  0x86   : > { %v1465_v5 = vld [vmem:[%s1461_s22] sm:$0xff]  ;;  %v1466_v6 = vld [vmem:[%s1461_s22 + $0x8] sm:$0xff]  ;;  %v1467_v7 = vld [vmem:[%s1461_s22 + $0x10] sm:$0xff]  ;;  %s7530_s5 = sld [smem:[#allocation13_spill]] }
  0x87   : > { %1477 = vst [vmem:[#allocation1] ss:$2 sm:$0xff] %v1465_v5  ;;  %v1468_v8 = vld [vmem:[%s1461_s22 + $0x18] sm:$0xff]  ;;  %v5222_v24 = vld [vmem:[%s7523_s9] sm:$0xff]  ;;  %s7527_s22 = sld [smem:[#allocation18_spill]] }
  0x88   : > { %1479 = vst [vmem:[#allocation1 + $0x10] ss:$2 sm:$0xff] %v1466_v6  ;;  %s7538_s9 = sld [smem:[#allocation20_spill]] }
  0x89   : > { %1515 = vperm.xlu0 %5333, %v1472_v3   ;;  %1696 = vperm.xlu1 %5334, %v1674_v4   ;;  %1481 = vst [vmem:[#allocation1 + $0x20] ss:$2 sm:$0xff] %v1467_v7 }
  0x8a   : > { %1483 = vst [vmem:[#allocation1 + $0x30] ss:$2 sm:$0xff] %v1468_v8 }
  0x8b   : > { %1722 = vperm.xlu2 %5335, %v1676_v37  }
  0x8e   : > { %v1484_v12 = vld.sshfl [vmem:[#allocation1] sm:$0xff pattern:$0x75316420]  ;;  %v1485_v13 = vld.sshfl [vmem:[#allocation1 + $0x8] sm:$0xff pattern:$0x75316420] }
  0x8f   : > { %v1500_v14 = vpack.c.bf16 %v1484_v12, %v1484_v12  ;;  %v1501_v15 = vpack.c.bf16 %v1485_v13, %v1485_v13  ;;  %v1486_v16 = vld.sshfl [vmem:[#allocation1 + $0x10] sm:$0xff pattern:$0x75316420]  ;;  %v1487_v17 = vld.sshfl [vmem:[#allocation1 + $0x18] sm:$0xff pattern:$0x75316420] }
  0x90   : > { %v1502_v18 = vpack.c.bf16 %v1486_v16, %v1486_v16  ;;  %v1503_v19 = vpack.c.bf16 %v1487_v17, %v1487_v17  ;;  %v1488_v20 = vld.sshfl [vmem:[#allocation1 + $0x20] sm:$0xff pattern:$0x75316420]  ;;  %v1489_v21 = vld.sshfl [vmem:[#allocation1 + $0x28] sm:$0xff pattern:$0x75316420] }
  0x91   : > { %v1529_v22 = vsel %vm1527_vm0, %v1500_v14, 0  ;;  %v1532_v23 = vsel %vm1527_vm0, %v1501_v15, 0  ;;  %v1504_v25 = vpack.c.bf16 %v1488_v20, %v1488_v20  ;;  %v1505_v26 = vpack.c.bf16 %v1489_v21, %v1489_v21  ;;  %v1490_v27 = vld.sshfl [vmem:[#allocation1 + $0x30] sm:$0xff pattern:$0x75316420]  ;;  %1767 = vperm.xlu0 %5333, %v1679_v10   ;;  %1772 = vperm.xlu1 %5334, %v1680_v11  }
  0x92   : > { %1559 = vmatpush.bf16.msra.mxu0 %v1529_v22  ;;  %1573 = vmatpush.bf16.msra.mxu1 %v1532_v23  ;;  %v1535_v28 = vsel %vm1527_vm0, %v1502_v18, 0  ;;  %v1538_v29 = vsel %vm1527_vm0, %v1503_v19, 0  ;;  %v1506_v30 = vpack.c.bf16 %v1490_v27, %v1490_v27  ;;  %v1491_v31 = vld.sshfl [vmem:[#allocation1 + $0x38] sm:$0xff pattern:$0x75316420]  ;;  %v5951_v18 = vld [vmem:[%s5595_s25] sm:$0xff] }
  0x93   : > { %1587 = vmatpush.bf16.msra.mxu2 %v1535_v28  ;;  %1601 = vmatpush.bf16.msra.mxu3 %v1538_v29  ;;  %v1541_v32 = vsel %vm1527_vm0, %v1504_v25, 0  ;;  %v1544_v33 = vsel %vm1527_vm0, %v1505_v26, 0  ;;  %v1507_v34 = vpack.c.bf16 %v1491_v31, %v1491_v31 }
  0x94   : > { %v1547_v35 = vsel %vm1527_vm0, %v1506_v30, 0 }
  0x95   : > { %5003 = vmatmul.msk.bf16.vlgmr.msra.gmra.mxu0 %vm1523_vm1, %v5222_v24  ;;  %5004 = vmatmul.msk.bf16.vlgmr.msra.gmra.mxu1 %vm1523_vm1, %v5222_v24  ;;  %v1550_v36 = vsel %vm1527_vm0, %v1507_v34, 0 }
  0x96   : > { %1615 = vmatpush.bf16.msrb.mxu0 %v1541_v32  ;;  %1629 = vmatpush.bf16.msrb.mxu1 %v1544_v33 }
  0x97   : > { %5005 = vmatmul.msk.bf16.vlgmr.msra.gmra.mxu2 %vm1523_vm1, %v5222_v24  ;;  %5006 = vmatmul.msk.bf16.vlgmr.msra.gmra.mxu3 %vm1523_vm1, %v5222_v24 }
  0x98   : > { %1643 = vmatpush.bf16.msrb.mxu2 %v1547_v35  ;;  %1657 = vmatpush.bf16.msrb.mxu3 %v1550_v36 }
  0xa5   : > { %5007 = vmatmul.msk.bf16.vlgmr.msrb.gmra.mxu0 %vm1523_vm1, %v5222_v24  ;;  %5008 = vmatmul.msk.bf16.vlgmr.msrb.gmra.mxu1 %vm1523_vm1, %v5222_v24 }
  0xa7   : > { %5009 = vmatmul.msk.bf16.vlgmr.msrb.gmra.mxu2 %vm1523_vm1, %v5222_v24  ;;  %5010 = vmatmul.msk.bf16.vlgmr.msrb.gmra.mxu3 %vm1523_vm1, %v5222_v24 }
  0xdd   : > { %v5896_v42 = vpop.permute.xlu2 %1717 }
  0xe5   : > { %v5930_v61 = vpop.permute.xlu2 %1722 }
  0xf3   : > { %v5892_v38 = vpop.permute.xlu0 %1510  ;;  %v5894_v39 = vpop.permute.xlu1 %1691 }
  0xfb   : > { %v5904_v45 = vpop.permute.xlu0 %1515  ;;  %v5916_v54 = vpop.permute.xlu1 %1696 }
 0x112   : > { %v1561_v40 = vpop.f32.mrf.mxu0  ;;  %v1575_v41 = vpop.f32.mrf.mxu1 }
 0x113   : > { %v5899_v43 = vadd.f32 %v1561_v40, %v5892_v38  ;;  %v5902_v44 = vadd.f32 %v1575_v41, %v5892_v38 }
 0x115   : > { %v1699_v46 = vmul.f32 %v5894_v39, %v5899_v43  ;;  %v1700_v47 = vmul.f32 %v5894_v39, %v5902_v44 }
 0x117   : > { %v1725_v59 = vadd.f32 %v5896_v42, %v1699_v46  ;;  %v1726_v60 = vadd.f32 %v5896_v42, %v1700_v47 }
 0x119   : > { %v1741_v4 = vmax.f32 %v1725_v59, 0.0  ;;  %v1742_v6 = vmax.f32 %v1726_v60, 0.0 }
 0x11a   : > { %v1589_v48 = vpop.f32.mrf.mxu2  ;;  %v1603_v49 = vpop.f32.mrf.mxu3 }
 0x11b   : > { %v1563_v50 = vpop.f32.mrf.mxu0  ;;  %v1577_v51 = vpop.f32.mrf.mxu1  ;;  %v5919_v55 = vadd.f32 %v1589_v48, %v5892_v38  ;;  %v5922_v56 = vadd.f32 %v1603_v49, %v5892_v38 }
 0x11c   : > { %v5911_v52 = vadd.f32 %v1563_v50, %v5904_v45  ;;  %v5914_v53 = vadd.f32 %v1577_v51, %v5904_v45 }
 0x11d   : > { %v1701_v0 = vmul.f32 %v5894_v39, %v5919_v55  ;;  %v1702_v1 = vmul.f32 %v5894_v39, %v5922_v56 }
 0x11e   : > { %v1707_v57 = vmul.f32 %v5916_v54, %v5911_v52  ;;  %v1708_v58 = vmul.f32 %v5916_v54, %v5914_v53 }
 0x11f   : > { %v1727_v14 = vadd.f32 %v5896_v42, %v1701_v0  ;;  %v1728_v15 = vadd.f32 %v5896_v42, %v1702_v1 }
 0x120   : > { %v1733_v62 = vadd.f32 %v5930_v61, %v1707_v57  ;;  %v1734_v63 = vadd.f32 %v5930_v61, %v1708_v58 }
 0x121   : > { %v1743_v23 = vmax.f32 %v1727_v14, 0.0  ;;  %v1744_v24 = vmax.f32 %v1728_v15, 0.0  ;;  %v1768_v15 = vpop.permute.xlu0 %1767 }
 0x122   : > { %v1591_v2 = vpop.f32.mrf.mxu2  ;;  %v1605_v3 = vpop.f32.mrf.mxu3  ;;  %v1749_v5 = vmax.f32 %v1733_v62, 0.0  ;;  %v1750_v7 = vmax.f32 %v1734_v63, 0.0 }
 0x123   : > { %v5939_v8 = vadd.f32 %v1591_v2, %v5904_v45  ;;  %v5942_v9 = vadd.f32 %v1605_v3, %v5904_v45  ;;  %v1617_v10 = vpop.f32.mrf.mxu0  ;;  %v1631_v11 = vpop.f32.mrf.mxu1 }
 0x124   : > { %v1757_v12 = vpack.c.bf16 %v1749_v5, %v1741_v4  ;;  %v1758_v13 = vpack.c.bf16 %v1750_v7, %v1742_v6  ;;  %v5954_v19 = vadd.f32 %v1617_v10, %v5892_v38  ;;  %v5957_v20 = vadd.f32 %v1631_v11, %v5892_v38 }
 0x125   : > { %v1709_v16 = vmul.f32 %v5916_v54, %v5939_v8  ;;  %v1710_v17 = vmul.f32 %v5916_v54, %v5942_v9 }
 0x126   : > { %1791 = vmatpush.bf16.msra.mxu0 %v1757_v12  ;;  %1805 = vmatpush.bf16.msra.mxu1 %v1758_v13  ;;  %v1703_v27 = vmul.f32 %v5894_v39, %v5954_v19  ;;  %v1704_v28 = vmul.f32 %v5894_v39, %v5957_v20 }
 0x127   : > { %v1735_v21 = vadd.f32 %v5930_v61, %v1709_v16  ;;  %v1736_v22 = vadd.f32 %v5930_v61, %v1710_v17 }
 0x128   : > { %v1729_v41 = vadd.f32 %v5896_v42, %v1703_v27  ;;  %v1730_v46 = vadd.f32 %v5896_v42, %v1704_v28 }
 0x129   : > { %v1751_v25 = vmax.f32 %v1735_v21, 0.0  ;;  %v1752_v26 = vmax.f32 %v1736_v22, 0.0  ;;  %5015 = vmatmul.msk.bf16.vlgmr.msra.gmra.mxu0 %vm1780_vm2, %v5951_v18  ;;  %5016 = vmatmul.msk.bf16.vlgmr.msra.gmra.mxu1 %vm1780_vm2, %v5951_v18 }
 0x12a   : > { %v1645_v29 = vpop.f32.mrf.mxu2  ;;  %v1659_v30 = vpop.f32.mrf.mxu3  ;;  %v1745_v57 = vmax.f32 %v1729_v41, 0.0  ;;  %v1746_v58 = vmax.f32 %v1730_v46, 0.0 }
 0x12b   : > { %v1619_v31 = vpop.f32.mrf.mxu0  ;;  %v1633_v32 = vpop.f32.mrf.mxu1  ;;  %v1759_v33 = vpack.c.bf16 %v1751_v25, %v1743_v23  ;;  %v1760_v34 = vpack.c.bf16 %v1752_v26, %v1744_v24  ;;  %v5976_v37 = vadd.f32 %v1645_v29, %v5892_v38  ;;  %v5979_v40 = vadd.f32 %v1659_v30, %v5892_v38 }
 0x12c   : > { %v5970_v35 = vadd.f32 %v1619_v31, %v5904_v45  ;;  %v5973_v36 = vadd.f32 %v1633_v32, %v5904_v45  ;;  %v1773_v30 = vpop.permute.xlu1 %1772 }
 0x12d   : > { %1819 = vmatpush.bf16.msra.mxu2 %v1759_v33  ;;  %1833 = vmatpush.bf16.msra.mxu3 %v1760_v34  ;;  %v1705_v38 = vmul.f32 %v5894_v39, %v5976_v37  ;;  %v1706_v51 = vmul.f32 %v5894_v39, %v5979_v40 }
 0x12e   : > { %v1711_v47 = vmul.f32 %v5916_v54, %v5970_v35  ;;  %v1712_v48 = vmul.f32 %v5916_v54, %v5973_v36 }
 0x12f   : > { %v1731_v4 = vadd.f32 %v5896_v42, %v1705_v38  ;;  %v1732_v5 = vadd.f32 %v5896_v42, %v1706_v51 }
 0x130   : > { %v1737_v49 = vadd.f32 %v5930_v61, %v1711_v47  ;;  %v1738_v50 = vadd.f32 %v5930_v61, %v1712_v48  ;;  %5017 = vmatmul.msk.bf16.vlgmr.msra.gmra.mxu2 %vm1780_vm2, %v5951_v18  ;;  %5018 = vmatmul.msk.bf16.vlgmr.msra.gmra.mxu3 %vm1780_vm2, %v5951_v18 }
 0x131   : > { %v1748_v11 = vmax.f32 %v1732_v5, 0.0 }
 0x132   : > { %v1753_v59 = vmax.f32 %v1737_v49, 0.0  ;;  %v1754_v60 = vmax.f32 %v1738_v50, 0.0  ;;  %v1647_v62 = vpop.f32.mrf.mxu2  ;;  %v1661_v63 = vpop.f32.mrf.mxu3 }
 0x133   : > { %v5998_v0 = vadd.f32 %v1647_v62, %v5904_v45  ;;  %v6001_v1 = vadd.f32 %v1661_v63, %v5904_v45  ;;  %v1747_v45 = vmax.f32 %v1731_v4, 0.0 }
 0x134   : > { %v1761_v2 = vpack.c.bf16 %v1753_v59, %v1745_v57  ;;  %v1762_v3 = vpack.c.bf16 %v1754_v60, %v1746_v58 }
 0x135   : > { %v1713_v39 = vmul.f32 %v5916_v54, %v5998_v0  ;;  %v1714_v6 = vmul.f32 %v5916_v54, %v6001_v1 }
 0x136   : > { %1847 = vmatpush.bf16.msrb.mxu0 %v1761_v2  ;;  %1861 = vmatpush.bf16.msrb.mxu1 %v1762_v3 }
 0x137   : > { %v1739_v7 = vadd.f32 %v5930_v61, %v1713_v39  ;;  %v1740_v10 = vadd.f32 %v5930_v61, %v1714_v6 }
 0x139   : > { %v1755_v12 = vmax.f32 %v1739_v7, 0.0  ;;  %v1756_v13 = vmax.f32 %v1740_v10, 0.0  ;;  %5019 = vmatmul.msk.bf16.vlgmr.msrb.gmra.mxu0 %vm1780_vm2, %v5951_v18  ;;  %5020 = vmatmul.msk.bf16.vlgmr.msrb.gmra.mxu1 %vm1780_vm2, %v5951_v18 }
 0x13b   : > { %v1763_v42 = vpack.c.bf16 %v1755_v12, %v1747_v45  ;;  %v1764_v14 = vpack.c.bf16 %v1756_v13, %v1748_v11 }
 0x13d   : > { %1875 = vmatpush.bf16.msrb.mxu2 %v1763_v42  ;;  %1889 = vmatpush.bf16.msrb.mxu3 %v1764_v14  ;;  %v2078_v42 = vld [vmem:[%s5625_s24] sm:$0xff]  ;;  %v2081_v14 = vld [vmem:[%s5630_s30 + $0x8] sm:$0xff] }
 0x140   : > { %5021 = vmatmul.msk.bf16.vlgmr.msrb.gmra.mxu2 %vm1780_vm2, %v5951_v18  ;;  %5022 = vmatmul.msk.bf16.vlgmr.msrb.gmra.mxu3 %vm1780_vm2, %v5951_v18 }
 0x1a6   : > { %v1793_v54 = vpop.f32.mrf.mxu0  ;;  %v1807_v61 = vpop.f32.mrf.mxu1 }
 0x1a7   : > { %v1794_v21 = vadd.f32 %v1793_v54, %v1768_v15  ;;  %v1808_v22 = vadd.f32 %v1807_v61, %v1768_v15  ;;  %v2084_v54 = vld [vmem:[%s7516_s12] sm:$0xff] }
 0x1a8   : > { %v1681_v61 = vld [vmem:[%s7519_s3] sm:$0xff] }
 0x1ae   : > { %v1795_v25 = vpop.f32.mrf.mxu0  ;;  %v1809_v26 = vpop.f32.mrf.mxu1 }
 0x1af   : > { %v1796_v33 = vadd.f32 %v1795_v25, %v1773_v30  ;;  %v1810_v18 = vadd.f32 %v1809_v26, %v1773_v30 }
 0x1b3   : > { %v1821_v16 = vpop.f32.mrf.mxu2  ;;  %v1835_v17 = vpop.f32.mrf.mxu3 }
 0x1b4   : > { %v1822_v23 = vadd.f32 %v1821_v16, %v1768_v15  ;;  %v1836_v24 = vadd.f32 %v1835_v17, %v1768_v15  ;;  %v1683_v17 = vld [vmem:[%s7518_s8] sm:$0xff] }
 0x1b6   : > { %v1896_v27 = vmax.f32 %v1794_v21, %v1822_v23  ;;  %v1897_v28 = vmax.f32 %v1808_v22, %v1836_v24  ;;  %v1849_v48 = vpop.f32.mrf.mxu0  ;;  %v1863_v49 = vpop.f32.mrf.mxu1  ;;  %v1682_v21 = vld [vmem:[%s7519_s3 + $0x8] sm:$0xff]  ;;  %s7529_s3 = sld [smem:[#allocation12_spill]] }
 0x1b7   : > { %v1850_v57 = vadd.f32 %v1849_v48, %v1768_v15  ;;  %v1864_v58 = vadd.f32 %v1863_v49, %v1768_v15  ;;  %v1684_v22 = vld [vmem:[%s7518_s8 + $0x8] sm:$0xff]  ;;  %v1687_v49 = vld [vmem:[%s5620_s19] sm:$0xff]  ;;  %s7531_s8 = sld [smem:[#allocation14_spill]] }
 0x1b8   : > { %v1898_v29 = vmax.f32 %v1896_v27, %v1897_v28 }
 0x1ba   : > { %1899 = vmax.xlane.f32.xlu2 %v1898_v29 }
 0x1bb   : > { %v1823_v31 = vpop.f32.mrf.mxu2  ;;  %v1837_v32 = vpop.f32.mrf.mxu3 }
 0x1bc   : > { %v1824_v34 = vadd.f32 %v1823_v31, %v1773_v30  ;;  %v1838_v41 = vadd.f32 %v1837_v32, %v1773_v30 }
 0x1be   : > { %v1901_v46 = vmax.f32 %v1796_v33, %v1824_v34  ;;  %v1902_v47 = vmax.f32 %v1810_v18, %v1838_v41  ;;  %v1851_v3 = vpop.f32.mrf.mxu0  ;;  %v1865_v4 = vpop.f32.mrf.mxu1 }
 0x1bf   : > { %v1852_v6 = vadd.f32 %v1851_v3, %v1773_v30  ;;  %v1866_v7 = vadd.f32 %v1865_v4, %v1773_v30 }
 0x1c0   : > { %v1903_v50 = vmax.f32 %v1901_v46, %v1902_v47 }
 0x1c2   : > { %1904 = vmax.xlane.f32.xlu0 %v1903_v50 }
 0x1c3   : > { %v1877_v38 = vpop.f32.mrf.mxu2  ;;  %v1891_v51 = vpop.f32.mrf.mxu3 }
 0x1c4   : > { %v1878_v59 = vadd.f32 %v1877_v38, %v1768_v15  ;;  %v1892_v60 = vadd.f32 %v1891_v51, %v1768_v15 }
 0x1c6   : > { %v1945_v62 = vmax.f32 %v1850_v57, %v1878_v59  ;;  %v1946_v63 = vmax.f32 %v1864_v58, %v1892_v60  ;;  %v1688_v58 = vld [vmem:[%s5620_s19 + $0x8] sm:$0xff] }
 0x1c8   : > { %v1947_v2 = vmax.f32 %v1945_v62, %v1946_v63 }
 0x1ca   : > { %1948 = vmax.xlane.f32.xlu1 %v1947_v2 }
 0x1cb   : > { %v1879_v5 = vpop.f32.mrf.mxu2  ;;  %v1893_v39 = vpop.f32.mrf.mxu3 }
 0x1cc   : > { %v1880_v10 = vadd.f32 %v1879_v5, %v1773_v30  ;;  %v1894_v45 = vadd.f32 %v1893_v39, %v1773_v30  ;;  %v5224_v30 = vld [vmem:[%s5615_s14] sm:$0xff] }
 0x1ce   : > { %v1950_v11 = vmax.f32 %v1852_v6, %v1880_v10  ;;  %v1951_v12 = vmax.f32 %v1866_v7, %v1894_v45 }
 0x1d0   : > { %v1952_v13 = vmax.f32 %v1950_v11, %v1951_v12 }
 0x1d2   : > { %1953 = vmax.xlane.f32.xlu2 %v1952_v13 }
 0x1e3   : > { %2096 = vperm.xlu1 %5334, %v2078_v42   ;;  %v2080_v42 = vld [vmem:[%s5630_s30] sm:$0xff] }
 0x1eb   : > { %2127 = vperm.xlu1 %5334, %v2081_v14  }
 0x1f3   : > { %2172 = vperm.xlu1 %5334, %v2084_v54  }
 0x22d   : > { %v1900_v15 = vpop.xlane.xlu2 %1899 }
 0x22e   : > { %v1906_v16 = vmul.f32 %v1900_v15, %v1681_v61 }
 0x230   : > { %v1908_v24 = vadd.f32 %v1906_v16, %v1683_v17  ;;  %v2079_v16 = vld [vmem:[%s5625_s24 + $0x8] sm:$0xff] }
 0x232   : > { %v1910_v27 = vmax.f32 %v1908_v24, 0.0  ;;  %v2085_v24 = vld [vmem:[%s7516_s12 + $0x8] sm:$0xff]  ;;  %s5468_s12 = scalar_lea.hbm %s5815_s4, 32 }
 0x235   : > { %v1905_v23 = vpop.xlane.xlu0 %1904 }
 0x236   : > { %v1907_v25 = vmul.f32 %v1905_v23, %v1682_v21 }
 0x238   : > { %v1909_v26 = vadd.f32 %v1907_v25, %v1684_v22 }
 0x23a   : > { %v1911_v28 = vmax.f32 %v1909_v26, 0.0 }
 0x23c   : > { %v1912_v29 = vpack.c.bf16 %v1911_v28, %v1910_v27 }
 0x23d   : > { %v1949_v31 = vpop.xlane.xlu1 %1948 }
 0x23e   : > { %1928 = vmatpush.bf16.msra.mxu0 %v1912_v29  ;;  %v1955_v32 = vmul.f32 %v1949_v31, %v1681_v61 }
 0x240   : > { %v1957_v18 = vadd.f32 %v1955_v32, %v1683_v17 }
 0x241   : > { %5027 = vmatmul.msk.bf16.vlgmr.msra.gmra.mxu0 %vm1780_vm2, %v5224_v30 }
 0x242   : > { %v1959_v46 = vmax.f32 %v1957_v18, 0.0 }
 0x245   : > { %v1954_v33 = vpop.xlane.xlu2 %1953 }
 0x246   : > { %v1956_v34 = vmul.f32 %v1954_v33, %v1682_v21 }
 0x248   : > { %v1958_v41 = vadd.f32 %v1956_v34, %v1684_v22 }
 0x24a   : > { %v1960_v47 = vmax.f32 %v1958_v41, 0.0 }
 0x24c   : > { %v1961_v48 = vpack.c.bf16 %v1960_v47, %v1959_v46 }
 0x24e   : > { %1969 = vmatpush.bf16.msra.mxu1 %v1961_v48 }
 0x251   : > { %5028 = vmatmul.msk.bf16.vlgmr.msra.gmra.mxu1 %vm1780_vm2, %v5224_v30 }
 0x255   : > { %v6036_v28 = vpop.permute.xlu1 %2096 }
 0x2be   : > { %v1930_v50 = vpop.f32.mrf.mxu0 }
 0x2bf   : > { %v1931_v38 = vadd.f32 %v1930_v50, %v1687_v49 }
 0x2c1   : > { %v1935_v51 = vsub.f32 0.0, %v1931_v38 }
 0x2c3   : > { %v1937_v57 = vmul.f32 1.442695, %v1935_v51 }
 0x2c5   : > { %5336 = vpow2.f32 %v1937_v57 }
 0x2c6   : > { %v1932_v59 = vpop.f32.mrf.mxu0 }
 0x2c7   : > { %v1933_v60 = vadd.f32 %v1932_v59, %v1688_v58 }
 0x2c9   : > { %v1936_v62 = vsub.f32 0.0, %v1933_v60  ;;  %v2128_v60 = vpop.permute.xlu1 %2127 }
 0x2cb   : > { %v5337_v63 = vpop.eup %5336  ;;  %v1939_v2 = vmul.f32 1.442695, %v1936_v62 }
 0x2cc   : > { %v1941_v3 = vadd.f32 1.0, %v5337_v63 }
 0x2cd   : > { %5338 = vpow2.f32 %v1939_v2 }
 0x2ce   : > { %5340 = vrcp.f32 %v1941_v3  ;;  %v1971_v4 = vpop.f32.mrf.mxu1 }
 0x2cf   : > { %v1972_v5 = vadd.f32 %v1971_v4, %v1687_v49 }
 0x2d1   : > { %v1976_v39 = vsub.f32 0.0, %v1972_v5 }
 0x2d3   : > { %v5339_v6 = vpop.eup %5338  ;;  %v1978_v7 = vmul.f32 1.442695, %v1976_v39 }
 0x2d4   : > { %v5341_v10 = vpop.eup %5340  ;;  %v1942_v45 = vadd.f32 1.0, %v5339_v6 }
 0x2d5   : > { %2022 = vperm.xlu2 %5335, %v5341_v10  }
 0x2d6   : > { %5342 = vrcp.f32 %v1942_v45  ;;  %v1973_v11 = vpop.f32.mrf.mxu1 }
 0x2d7   : > { %5344 = vpow2.f32 %v1978_v7  ;;  %v1974_v12 = vadd.f32 %v1973_v11, %v1688_v58 }
 0x2d9   : > { %v1977_v13 = vsub.f32 0.0, %v1974_v12 }
 0x2db   : > { %v1980_v14 = vmul.f32 1.442695, %v1977_v13 }
 0x2dc   : > { %v5343_v54 = vpop.eup %5342 }
 0x2dd   : > { %v5345_v61 = vpop.eup %5344  ;;  %5346 = vpow2.f32 %v1980_v14  ;;  %2027 = vperm.xlu0 %5333, %v5343_v54   ;;  %2122 = vperm.xlu2 %5335, %v2080_v42  }
 0x2de   : > { %v1982_v15 = vadd.f32 1.0, %v5345_v61 }
 0x2e0   : > { %5348 = vrcp.f32 %v1982_v15 }
 0x2e3   : > { %v5347_v17 = vpop.eup %5346 }
 0x2e4   : > { %v1983_v21 = vadd.f32 1.0, %v5347_v17  ;;  %v5225_v17 = vld [vmem:[%s7524_s23] sm:$0xff]  ;;  %s7528_s23 = sld [smem:[#allocation11_spill]] }
 0x2e5   : > { %2101 = vperm.xlu0 %5333, %v2079_v16  }
 0x2e6   : > { %5350 = vrcp.f32 %v1983_v21  ;;  %v5349_v22 = vpop.eup %5348 }
 0x2ec   : > { %v5351_v23 = vpop.eup %5350 }
 0x2ed   : > { %2017 = vperm.xlu2 %5335, %v5351_v23   ;;  %2012 = vperm.xlu0 %5333, %v5349_v22  }
 0x2f5   : > { %2177 = vperm.xlu0 %5333, %v2085_v24  }
 0x32f   : > { %v2023_v25 = vpop.permute.xlu2 %2022 }
 0x330   : > { %v2046_v26 = vadd.f32 1.0, %v2023_v25 }
 0x332   : > { %v6039_v29 = vmul.f32 %v2046_v26, %v5899_v43  ;;  %v6042_v31 = vmul.f32 %v2046_v26, %v5902_v44  ;;  %v6045_v32 = vmul.f32 %v2046_v26, %v5919_v55  ;;  %v6048_v33 = vmul.f32 %v2046_v26, %v5922_v56 }
 0x334   : > { %v2104_v34 = vmul.f32 %v6036_v28, %v6039_v29  ;;  %v2105_v46 = vmul.f32 %v6036_v28, %v6042_v31  ;;  %v2106_v43 = vmul.f32 %v6036_v28, %v6045_v32  ;;  %v2107_v44 = vmul.f32 %v6036_v28, %v6048_v33 }
 0x337   : > { %v6034_v27 = vpop.permute.xlu2 %2122 }
 0x338   : > { %v2130_v55 = vadd.f32 %v6034_v27, %v2104_v34  ;;  %v2131_v51 = vadd.f32 %v6034_v27, %v2105_v46  ;;  %v2132_v57 = vadd.f32 %v6034_v27, %v2106_v43  ;;  %v2133_v58 = vadd.f32 %v6034_v27, %v2107_v44 }
 0x33a   : > { %v2146_v62 = vmax.f32 %v2130_v55, 0.0  ;;  %v2147_v5 = vmax.f32 %v2131_v51, 0.0  ;;  %v2148_v39 = vmax.f32 %v2132_v57, 0.0  ;;  %v2149_v6 = vmax.f32 %v2133_v58, 0.0 }
 0x347   : > { %v2018_v41 = vpop.permute.xlu2 %2017 }
 0x348   : > { %v2058_v50 = vadd.f32 1.0, %v2018_v41 }
 0x34a   : > { %v6079_v4 = vmul.f32 %v2058_v50, %v5970_v35  ;;  %v6082_v12 = vmul.f32 %v2058_v50, %v5973_v36  ;;  %v6085_v13 = vmul.f32 %v2058_v50, %v5998_v0  ;;  %v6088_v42 = vmul.f32 %v2058_v50, %v6001_v1 }
 0x34f   : > { %v2028_v30 = vpop.permute.xlu0 %2027 }
 0x350   : > { %v2054_v18 = vadd.f32 1.0, %v2028_v30 }
 0x352   : > { %v6060_v47 = vmul.f32 %v2054_v18, %v5911_v52  ;;  %v6063_v56 = vmul.f32 %v2054_v18, %v5914_v53  ;;  %v6066_v48 = vmul.f32 %v2054_v18, %v5939_v8  ;;  %v6069_v49 = vmul.f32 %v2054_v18, %v5942_v9 }
 0x357   : > { %v2102_v38 = vpop.permute.xlu0 %2101 }
 0x358   : > { %v2112_v52 = vmul.f32 %v2102_v38, %v6060_v47  ;;  %v2113_v59 = vmul.f32 %v2102_v38, %v6063_v56  ;;  %v2114_v53 = vmul.f32 %v2102_v38, %v6066_v48  ;;  %v2115_v8 = vmul.f32 %v2102_v38, %v6069_v49 }
 0x359   : > { %v2116_v35 = vmul.f32 %v2102_v38, %v6079_v4  ;;  %v2117_v21 = vmul.f32 %v2102_v38, %v6082_v12  ;;  %v2118_v22 = vmul.f32 %v2102_v38, %v6085_v13  ;;  %v2119_v36 = vmul.f32 %v2102_v38, %v6088_v42 }
 0x35a   : > { %v2138_v9 = vadd.f32 %v2128_v60, %v2112_v52  ;;  %v2139_v63 = vadd.f32 %v2128_v60, %v2113_v59  ;;  %v2140_v2 = vadd.f32 %v2128_v60, %v2114_v53  ;;  %v2141_v3 = vadd.f32 %v2128_v60, %v2115_v8 }
 0x35b   : > { %v2142_v0 = vadd.f32 %v2128_v60, %v2116_v35  ;;  %v2143_v30 = vadd.f32 %v2128_v60, %v2117_v21  ;;  %v2144_v18 = vadd.f32 %v2128_v60, %v2118_v22  ;;  %v2145_v34 = vadd.f32 %v2128_v60, %v2119_v36 }
 0x35c   : > { %v2154_v7 = vmax.f32 %v2138_v9, 0.0  ;;  %v2155_v10 = vmax.f32 %v2139_v63, 0.0  ;;  %v2156_v45 = vmax.f32 %v2140_v2, 0.0  ;;  %v2157_v11 = vmax.f32 %v2141_v3, 0.0  ;;  %v2173_v9 = vpop.permute.xlu1 %2172 }
 0x35d   : > { %v2158_v55 = vmax.f32 %v2142_v0, 0.0  ;;  %v2159_v50 = vmax.f32 %v2143_v30, 0.0  ;;  %v2160_v38 = vmax.f32 %v2144_v18, 0.0  ;;  %v2161_v51 = vmax.f32 %v2145_v34, 0.0 }
 0x35e   : > { %v2162_v14 = vpack.c.bf16 %v2154_v7, %v2146_v62  ;;  %v2163_v54 = vpack.c.bf16 %v2155_v10, %v2147_v5  ;;  %v2164_v61 = vpack.c.bf16 %v2156_v45, %v2148_v39  ;;  %v2165_v15 = vpack.c.bf16 %v2157_v11, %v2149_v6 }
 0x35f   : > { %v2013_v16 = vpop.permute.xlu0 %2012 }
 0x360   : > { %v2050_v23 = vadd.f32 1.0, %v2013_v16  ;;  %2195 = vmatpush.bf16.msra.mxu2 %v2162_v14  ;;  %2209 = vmatpush.bf16.msra.mxu3 %v2163_v54 }
 0x361   : > { %2223 = vmatpush.bf16.msrb.mxu0 %v2164_v61  ;;  %2237 = vmatpush.bf16.msrb.mxu1 %v2165_v15 }
 0x362   : > { %v6096_v1 = vmul.f32 %v2050_v23, %v5954_v19  ;;  %v6099_v24 = vmul.f32 %v2050_v23, %v5957_v20  ;;  %v6102_v25 = vmul.f32 %v2050_v23, %v5976_v37  ;;  %v6105_v26 = vmul.f32 %v2050_v23, %v5979_v40 }
 0x363   : > { %5033 = vmatmul.msk.bf16.vlgmr.msra.gmra.mxu2 %vm1780_vm2, %v5225_v17  ;;  %5034 = vmatmul.msk.bf16.vlgmr.msra.gmra.mxu3 %vm1780_vm2, %v5225_v17 }
 0x364   : > { %v2108_v19 = vmul.f32 %v6036_v28, %v6096_v1  ;;  %v2109_v20 = vmul.f32 %v6036_v28, %v6099_v24  ;;  %v2110_v37 = vmul.f32 %v6036_v28, %v6102_v25  ;;  %v2111_v40 = vmul.f32 %v6036_v28, %v6105_v26  ;;  %5035 = vmatmul.msk.bf16.vlgmr.msrb.gmra.mxu0 %vm1780_vm2, %v5225_v17 }
 0x365   : > { %5036 = vmatmul.msk.bf16.vlgmr.msrb.gmra.mxu1 %vm1780_vm2, %v5225_v17 }
 0x366   : > { %v2134_v41 = vadd.f32 %v6034_v27, %v2108_v19  ;;  %v2135_v46 = vadd.f32 %v6034_v27, %v2109_v20  ;;  %v2136_v43 = vadd.f32 %v6034_v27, %v2110_v37  ;;  %v2137_v44 = vadd.f32 %v6034_v27, %v2111_v40 }
 0x367   : > { %v2178_v14 = vpop.permute.xlu0 %2177 }
 0x368   : > { %v2150_v57 = vmax.f32 %v2134_v41, 0.0  ;;  %v2151_v58 = vmax.f32 %v2135_v46, 0.0  ;;  %v2152_v52 = vmax.f32 %v2136_v43, 0.0  ;;  %v2153_v28 = vmax.f32 %v2137_v44, 0.0 }
 0x36a   : > { %v2166_v59 = vpack.c.bf16 %v2158_v55, %v2150_v57  ;;  %v2167_v53 = vpack.c.bf16 %v2159_v50, %v2151_v58  ;;  %v2168_v8 = vpack.c.bf16 %v2160_v38, %v2152_v52  ;;  %v2169_v60 = vpack.c.bf16 %v2161_v51, %v2153_v28 }
 0x36c   : > { %2251 = vmatpush.bf16.msrb.mxu2 %v2166_v59  ;;  %2265 = vmatpush.bf16.msrb.mxu3 %v2167_v53 }
 0x36d   : > { %2279 = vmatpush.bf16.msra.mxu0 %v2168_v8  ;;  %2293 = vmatpush.bf16.msra.mxu1 %v2169_v60  ;;  %v2458_v8 = vld [vmem:[%s7525_s2] sm:$0xff]  ;;  %v2461_v60 = vld [vmem:[%s7526_s16 + $0x8] sm:$0xff] }
 0x373   : > { %5037 = vmatmul.msk.bf16.vlgmr.msrb.gmra.mxu2 %vm1780_vm2, %v5225_v17  ;;  %5038 = vmatmul.msk.bf16.vlgmr.msrb.gmra.mxu3 %vm1780_vm2, %v5225_v17 }
 0x374   : > { %5039 = vmatmul.msk.bf16.vlgmr.msra.gmra.mxu0 %vm1780_vm2, %v5225_v17 }
 0x375   : > { %5040 = vmatmul.msk.bf16.vlgmr.msra.gmra.mxu1 %vm1780_vm2, %v5225_v17 }
 0x3e1   : > { %v2225_v27 = vpop.f32.mrf.mxu0 }
 0x3e2   : > { %v2239_v62 = vpop.f32.mrf.mxu1  ;;  %v2226_v3 = vadd.f32 %v2225_v27, %v2173_v9  ;;  %v2468_v27 = vld [vmem:[%s7527_s22 + $0x10] sm:$0xff] }
 0x3e3   : > { %v2240_v5 = vadd.f32 %v2239_v62, %v2173_v9  ;;  %v2467_v62 = vld [vmem:[%s7527_s22 + $0x8] sm:$0xff] }
 0x3e6   : > { %v2197_v63 = vpop.f32.mrf.mxu2  ;;  %v2211_v2 = vpop.f32.mrf.mxu3 }
 0x3e7   : > { %v2198_v39 = vadd.f32 %v2197_v63, %v2173_v9  ;;  %v2212_v6 = vadd.f32 %v2211_v2, %v2173_v9 }
 0x3e9   : > { %v2300_v7 = vmax.f32 %v2198_v39, %v2226_v3  ;;  %v2301_v10 = vmax.f32 %v2212_v6, %v2240_v5  ;;  %v2227_v45 = vpop.f32.mrf.mxu0  ;;  %v2088_v3 = vld [vmem:[%s7529_s3] sm:$0xff]  ;;  %v2087_v5 = vld [vmem:[%s7528_s23 + $0x8] sm:$0xff] }
 0x3ea   : > { %v2241_v11 = vpop.f32.mrf.mxu1  ;;  %v2228_v15 = vadd.f32 %v2227_v45, %v2178_v14  ;;  %v2089_v39 = vld [vmem:[%s7529_s3 + $0x8] sm:$0xff]  ;;  %s7535_s3 = sld [smem:[#allocation26_spill]] }
 0x3eb   : > { %v2302_v35 = vmax.f32 %v2300_v7, %v2301_v10  ;;  %v2242_v16 = vadd.f32 %v2241_v11, %v2178_v14 }
 0x3ed   : > { %2303 = vmax.xlane.f32.xlu2 %v2302_v35 }
 0x3ee   : > { %v2199_v54 = vpop.f32.mrf.mxu2  ;;  %v2213_v61 = vpop.f32.mrf.mxu3 }
 0x3ef   : > { %v2200_v17 = vadd.f32 %v2199_v54, %v2178_v14  ;;  %v2214_v21 = vadd.f32 %v2213_v61, %v2178_v14  ;;  %v5226_v54 = vld [vmem:[%s7530_s5] sm:$0xff]  ;;  %s7532_s5 = sld [smem:[#allocation17_spill]] }
 0x3f1   : > { %v2305_v22 = vmax.f32 %v2200_v17, %v2228_v15  ;;  %v2306_v36 = vmax.f32 %v2214_v21, %v2242_v16  ;;  %v2281_v23 = vpop.f32.mrf.mxu0 }
 0x3f2   : > { %v2295_v0 = vpop.f32.mrf.mxu1  ;;  %v2282_v19 = vadd.f32 %v2281_v23, %v2173_v9 }
 0x3f3   : > { %v2307_v30 = vmax.f32 %v2305_v22, %v2306_v36  ;;  %v2296_v20 = vadd.f32 %v2295_v0, %v2173_v9 }
 0x3f5   : > { %2308 = vmax.xlane.f32.xlu1 %v2307_v30  ;;  %v2092_v30 = vld [vmem:[%s7531_s8] sm:$0xff] }
 0x3f6   : > { %v2253_v18 = vpop.f32.mrf.mxu2  ;;  %v2267_v34 = vpop.f32.mrf.mxu3 }
 0x3f7   : > { %v2254_v37 = vadd.f32 %v2253_v18, %v2173_v9  ;;  %v2268_v40 = vadd.f32 %v2267_v34, %v2173_v9  ;;  %v2086_v9 = vld [vmem:[%s7528_s23] sm:$0xff] }
 0x3f9   : > { %v2349_v41 = vmax.f32 %v2254_v37, %v2282_v19  ;;  %v2350_v46 = vmax.f32 %v2268_v40, %v2296_v20  ;;  %v2283_v44 = vpop.f32.mrf.mxu0  ;;  %v2093_v37 = vld [vmem:[%s7531_s8 + $0x8] sm:$0xff]  ;;  %s7537_s8 = sld [smem:[#allocation19_spill]] }
 0x3fa   : > { %v2297_v55 = vpop.f32.mrf.mxu1  ;;  %v2284_v51 = vadd.f32 %v2283_v44, %v2178_v14 }
 0x3fb   : > { %v2351_v43 = vmax.f32 %v2349_v41, %v2350_v46  ;;  %v2298_v57 = vadd.f32 %v2297_v55, %v2178_v14 }
 0x3fd   : > { %2352 = vmax.xlane.f32.xlu0 %v2351_v43 }
 0x3fe   : > { %v2255_v50 = vpop.f32.mrf.mxu2  ;;  %v2269_v38 = vpop.f32.mrf.mxu3 }
 0x3ff   : > { %v2256_v58 = vadd.f32 %v2255_v50, %v2178_v14  ;;  %v2270_v52 = vadd.f32 %v2269_v38, %v2178_v14 }
 0x401   : > { %v2354_v28 = vmax.f32 %v2256_v58, %v2284_v51  ;;  %v2355_v59 = vmax.f32 %v2270_v52, %v2298_v57 }
 0x403   : > { %v2356_v53 = vmax.f32 %v2354_v28, %v2355_v59 }
 0x405   : > { %2357 = vmax.xlane.f32.xlu2 %v2356_v53 }
 0x41d   : > { %2488 = vperm.xlu2 %5335, %v2458_v8  }
 0x425   : > { %2519 = vperm.xlu2 %5335, %v2461_v60   ;;  %v2460_v60 = vld [vmem:[%s7526_s16] sm:$0xff] }
 0x42d   : > { %2574 = vperm.xlu2 %5335, %v2468_v27  }
 0x435   : > { %2569 = vperm.xlu2 %5335, %v2467_v62  }
 0x460   : > { %v2304_v63 = vpop.xlane.xlu2 %2303 }
 0x461   : > { %v2310_v2 = vmul.f32 %v2304_v63, %v2086_v9 }
 0x463   : > { %v2312_v7 = vadd.f32 %v2310_v2, %v2088_v3  ;;  %v2459_v2 = vld [vmem:[%s7525_s2 + $0x8] sm:$0xff]  ;;  %s7533_s2 = sld [smem:[#allocation23_spill]] }
 0x465   : > { %v2314_v11 = vmax.f32 %v2312_v7, 0.0  ;;  %v2466_v7 = vld [vmem:[%s7527_s22] sm:$0xff] }
 0x468   : > { %v2309_v6 = vpop.xlane.xlu1 %2308 }
 0x469   : > { %v2311_v10 = vmul.f32 %v2309_v6, %v2087_v5 }
 0x46b   : > { %v2313_v45 = vadd.f32 %v2311_v10, %v2089_v39  ;;  %v2469_v10 = vld [vmem:[%s7527_s22 + $0x18] sm:$0xff] }
 0x46d   : > { %v2315_v35 = vmax.f32 %v2313_v45, 0.0 }
 0x46f   : > { %v2316_v14 = vpack.c.bf16 %v2315_v35, %v2314_v11 }
 0x470   : > { %v2353_v61 = vpop.xlane.xlu0 %2352 }
 0x471   : > { %2332 = vmatpush.bf16.msra.mxu2 %v2316_v14  ;;  %v2359_v15 = vmul.f32 %v2353_v61, %v2086_v9 }
 0x473   : > { %v2361_v17 = vadd.f32 %v2359_v15, %v2088_v3 }
 0x474   : > { %5045 = vmatmul.msk.bf16.vlgmr.msra.gmra.mxu2 %vm1780_vm2, %v5226_v54 }
 0x475   : > { %v2363_v36 = vmax.f32 %v2361_v17, 0.0 }
 0x478   : > { %v2358_v16 = vpop.xlane.xlu2 %2357 }
 0x479   : > { %v2360_v21 = vmul.f32 %v2358_v16, %v2087_v5 }
 0x47b   : > { %v2362_v22 = vadd.f32 %v2360_v21, %v2089_v39 }
 0x47d   : > { %v2364_v23 = vmax.f32 %v2362_v22, 0.0 }
 0x47f   : > { %v2365_v0 = vpack.c.bf16 %v2364_v23, %v2363_v36 }
 0x480   : > { %v6144_v35 = vpop.permute.xlu2 %2488 }
 0x481   : > { %2373 = vmatpush.bf16.msra.mxu3 %v2365_v0 }
 0x484   : > { %5046 = vmatmul.msk.bf16.vlgmr.msra.gmra.mxu3 %vm1780_vm2, %v5226_v54 }
 0x4f7   : > { %v2334_v18 = vpop.f32.mrf.mxu2 }
 0x4f8   : > { %v2335_v34 = vadd.f32 %v2334_v18, %v2092_v30 }
 0x4fa   : > { %v2339_v19 = vsub.f32 0.0, %v2335_v34 }
 0x4fc   : > { %v2341_v20 = vmul.f32 1.442695, %v2339_v19 }
 0x4fe   : > { %5352 = vpow2.f32 %v2341_v20 }
 0x4ff   : > { %v2336_v40 = vpop.f32.mrf.mxu2 }
 0x500   : > { %v2337_v41 = vadd.f32 %v2336_v40, %v2093_v37 }
 0x502   : > { %v2340_v46 = vsub.f32 0.0, %v2337_v41 }
 0x504   : > { %v5353_v43 = vpop.eup %5352  ;;  %v2343_v44 = vmul.f32 1.442695, %v2340_v46  ;;  %v2520_v46 = vpop.permute.xlu2 %2519 }
 0x505   : > { %v2345_v55 = vadd.f32 1.0, %v5353_v43 }
 0x506   : > { %5354 = vpow2.f32 %v2343_v44 }
 0x507   : > { %5356 = vrcp.f32 %v2345_v55  ;;  %v2375_v50 = vpop.f32.mrf.mxu3 }
 0x508   : > { %v2376_v38 = vadd.f32 %v2375_v50, %v2092_v30 }
 0x50a   : > { %v2380_v51 = vsub.f32 0.0, %v2376_v38 }
 0x50c   : > { %v5355_v57 = vpop.eup %5354  ;;  %v2382_v58 = vmul.f32 1.442695, %v2380_v51 }
 0x50d   : > { %v5357_v52 = vpop.eup %5356  ;;  %v2346_v28 = vadd.f32 1.0, %v5355_v57 }
 0x50e   : > { %2402 = vperm.xlu1 %5334, %v5357_v52  }
 0x50f   : > { %5358 = vrcp.f32 %v2346_v28  ;;  %v2377_v59 = vpop.f32.mrf.mxu3 }
 0x510   : > { %5360 = vpow2.f32 %v2382_v58  ;;  %v2378_v53 = vadd.f32 %v2377_v59, %v2093_v37 }
 0x512   : > { %v2381_v8 = vsub.f32 0.0, %v2378_v53 }
 0x514   : > { %v2384_v27 = vmul.f32 1.442695, %v2381_v8 }
 0x515   : > { %v5359_v62 = vpop.eup %5358 }
 0x516   : > { %v5361_v9 = vpop.eup %5360  ;;  %5362 = vpow2.f32 %v2384_v27  ;;  %2407 = vperm.xlu0 %5333, %v5359_v62   ;;  %2514 = vperm.xlu1 %5334, %v2460_v60  }
 0x517   : > { %v2386_v63 = vadd.f32 1.0, %v5361_v9 }
 0x519   : > { %5364 = vrcp.f32 %v2386_v63  ;;  %v6193_v63 = vld [vmem:[%s7532_s5] sm:$0xff] }
 0x51c   : > { %v5363_v3 = vpop.eup %5362 }
 0x51d   : > { %v2387_v5 = vadd.f32 1.0, %v5363_v3 }
 0x51e   : > { %2493 = vperm.xlu0 %5333, %v2459_v2  }
 0x51f   : > { %5366 = vrcp.f32 %v2387_v5  ;;  %v5365_v39 = vpop.eup %5364 }
 0x525   : > { %v5367_v6 = vpop.eup %5366 }
 0x526   : > { %2397 = vperm.xlu1 %5334, %v5367_v6   ;;  %2392 = vperm.xlu0 %5333, %v5365_v39  }
 0x52e   : > { %2564 = vperm.xlu1 %5334, %v2466_v7   ;;  %2579 = vperm.xlu0 %5333, %v2469_v10  }
 0x580   : > { %v2403_v45 = vpop.permute.xlu1 %2402 }
 0x581   : > { %v2426_v11 = vadd.f32 1.0, %v2403_v45 }
 0x583   : > { %v6147_v61 = vmul.f32 %v2426_v11, %v6039_v29  ;;  %v6150_v15 = vmul.f32 %v2426_v11, %v6042_v31  ;;  %v6153_v16 = vmul.f32 %v2426_v11, %v6045_v32  ;;  %v6156_v17 = vmul.f32 %v2426_v11, %v6048_v33 }
 0x585   : > { %v2496_v32 = vmul.f32 %v6144_v35, %v6147_v61  ;;  %v2497_v33 = vmul.f32 %v6144_v35, %v6150_v15 }
 0x588   : > { %v2408_v14 = vpop.permute.xlu0 %2407  ;;  %v6164_v36 = vpop.permute.xlu1 %2514 }
 0x589   : > { %v2434_v54 = vadd.f32 1.0, %v2408_v14  ;;  %v2522_v18 = vadd.f32 %v6164_v36, %v2496_v32  ;;  %v2523_v34 = vadd.f32 %v6164_v36, %v2497_v33 }
 0x58b   : > { %v6159_v21 = vmul.f32 %v2434_v54, %v6066_v48  ;;  %v6162_v22 = vmul.f32 %v2434_v54, %v6069_v49  ;;  %v2498_v48 = vmul.f32 %v6144_v35, %v6153_v16  ;;  %v2499_v49 = vmul.f32 %v6144_v35, %v6156_v17 }
 0x58c   : > { %v6179_v23 = vmul.f32 %v2434_v54, %v6060_v47  ;;  %v6182_v0 = vmul.f32 %v2434_v54, %v6063_v56  ;;  %v2538_v50 = vmax.f32 %v2522_v18, 0.0  ;;  %v2539_v38 = vmax.f32 %v2523_v34, 0.0 }
 0x58d   : > { %v3003_v29 = vpack.c.bf16 %v6159_v21, %v6153_v16  ;;  %v3004_v31 = vpack.c.bf16 %v6162_v22, %v6156_v17  ;;  %v2524_v19 = vadd.f32 %v6164_v36, %v2498_v48  ;;  %v2525_v20 = vadd.f32 %v6164_v36, %v2499_v49 }
 0x58f   : > { %v2540_v51 = vmax.f32 %v2524_v19, 0.0  ;;  %v2541_v57 = vmax.f32 %v2525_v20, 0.0 }
 0x590   : > { %v2494_v30 = vpop.permute.xlu0 %2493 }
 0x591   : > { %v2504_v37 = vmul.f32 %v2494_v30, %v6179_v23  ;;  %v2505_v40 = vmul.f32 %v2494_v30, %v6182_v0  ;;  %v2506_v41 = vmul.f32 %v2494_v30, %v6159_v21  ;;  %v2507_v47 = vmul.f32 %v2494_v30, %v6162_v22 }
 0x593   : > { %v2530_v56 = vadd.f32 %v2520_v46, %v2504_v37  ;;  %v2531_v43 = vadd.f32 %v2520_v46, %v2505_v40  ;;  %v2532_v44 = vadd.f32 %v2520_v46, %v2506_v41  ;;  %v2533_v55 = vadd.f32 %v2520_v46, %v2507_v47 }
 0x595   : > { %v2546_v58 = vmax.f32 %v2530_v56, 0.0  ;;  %v2547_v52 = vmax.f32 %v2531_v43, 0.0  ;;  %v2548_v28 = vmax.f32 %v2532_v44, 0.0  ;;  %v2549_v59 = vmax.f32 %v2533_v55, 0.0 }
 0x597   : > { %v2554_v53 = vpack.c.bf16 %v2546_v58, %v2538_v50  ;;  %v2555_v8 = vpack.c.bf16 %v2547_v52, %v2539_v38  ;;  %v2556_v60 = vpack.c.bf16 %v2548_v28, %v2540_v51  ;;  %v2557_v27 = vpack.c.bf16 %v2549_v59, %v2541_v57  ;;  %v5228_v57 = vld [vmem:[%s7532_s5 + $0x8] sm:$0xff]  ;;  %v6271_v58 = vld [vmem:[%s7533_s2 + $0x10] sm:$0xff]  ;;  %v6278_v52 = vld [vmem:[%s7533_s2 + $0x18] sm:$0xff]  ;;  %s7536_s5 = sld [smem:[#allocation25_spill]] }
 0x598   : > { %v2398_v62 = vpop.permute.xlu1 %2397  ;;  %v2393_v9 = vpop.permute.xlu0 %2392  ;;  %v3002_v51 = vpack.c.bf16 %v6182_v0, %v6150_v15  ;;  %v6264_v0 = vld [vmem:[%s7533_s2 + $0x8] sm:$0xff] }
 0x599   : > { %v2438_v2 = vadd.f32 1.0, %v2398_v62  ;;  %v2430_v3 = vadd.f32 1.0, %v2393_v9  ;;  %2605 = vmatpush.bf16.msrb.mxu0 %v2554_v53  ;;  %2624 = vmatpush.bf16.msrb.mxu1 %v2555_v8 }
 0x59a   : > { %2643 = vmatpush.bf16.msrb.mxu2 %v2556_v60  ;;  %2662 = vmatpush.bf16.msrb.mxu3 %v2557_v27 }
 0x59b   : > { %v2454_v5 = vmul.f32 %v2438_v2, %v6079_v4  ;;  %v2455_v39 = vmul.f32 %v2438_v2, %v6082_v12  ;;  %v6198_v6 = vmul.f32 %v2438_v2, %v6085_v13  ;;  %v6201_v7 = vmul.f32 %v2438_v2, %v6088_v42 }
 0x59c   : > { %v2446_v10 = vmul.f32 %v2430_v3, %v6096_v1  ;;  %v2447_v45 = vmul.f32 %v2430_v3, %v6099_v24  ;;  %v6206_v11 = vmul.f32 %v2430_v3, %v6102_v25  ;;  %v6209_v14 = vmul.f32 %v2430_v3, %v6105_v26  ;;  %5055 = vmatmul.msk.bf16.vlgmr.msrb.gmra.mxu0 %vm1780_vm2, %v6193_v63 }
 0x59d   : > { %v2508_v4 = vmul.f32 %v2494_v30, %v2454_v5  ;;  %v2509_v12 = vmul.f32 %v2494_v30, %v2455_v39  ;;  %v2510_v13 = vmul.f32 %v2494_v30, %v6198_v6  ;;  %v2511_v42 = vmul.f32 %v2494_v30, %v6201_v7  ;;  %5057 = vmatmul.msk.bf16.vlgmr.msrb.gmra.mxu1 %vm1780_vm2, %v6193_v63 }
 0x59e   : > { %v2500_v1 = vmul.f32 %v6144_v35, %v2446_v10  ;;  %v2501_v24 = vmul.f32 %v6144_v35, %v2447_v45  ;;  %v2502_v25 = vmul.f32 %v6144_v35, %v6206_v11  ;;  %v2503_v26 = vmul.f32 %v6144_v35, %v6209_v14  ;;  %5059 = vmatmul.msk.bf16.vlgmr.msrb.gmra.mxu2 %vm1780_vm2, %v6193_v63 }
 0x59f   : > { %5061 = vmatmul.msk.bf16.vlgmr.msrb.gmra.mxu3 %vm1780_vm2, %v6193_v63  ;;  %v2534_v54 = vadd.f32 %v2520_v46, %v2508_v4  ;;  %v2535_v32 = vadd.f32 %v2520_v46, %v2509_v12  ;;  %v2536_v33 = vadd.f32 %v2520_v46, %v2510_v13  ;;  %v2537_v48 = vadd.f32 %v2520_v46, %v2511_v42  ;;  %v2575_v42 = vpop.permute.xlu2 %2574 }
 0x5a0   : > { %v2526_v49 = vadd.f32 %v6164_v36, %v2500_v1  ;;  %v2527_v30 = vadd.f32 %v6164_v36, %v2501_v24  ;;  %v2528_v18 = vadd.f32 %v6164_v36, %v2502_v25  ;;  %v2529_v34 = vadd.f32 %v6164_v36, %v2503_v26  ;;  %v6284_v53 = vpop.permute.xlu1 %2564 }
 0x5a1   : > { %v2550_v19 = vmax.f32 %v2534_v54, 0.0  ;;  %v2551_v35 = vmax.f32 %v2535_v32, 0.0  ;;  %v2552_v20 = vmax.f32 %v2536_v33, 0.0  ;;  %v2553_v37 = vmax.f32 %v2537_v48, 0.0 }
 0x5a2   : > { %v2542_v40 = vmax.f32 %v2526_v49, 0.0  ;;  %v2543_v41 = vmax.f32 %v2527_v30, 0.0  ;;  %v2544_v47 = vmax.f32 %v2528_v18, 0.0  ;;  %v2545_v56 = vmax.f32 %v2529_v34, 0.0  ;;  %v2580_v18 = vpop.permute.xlu0 %2579 }
 0x5a3   : > { %v3007_v46 = vpack.c.bf16 %v6198_v6, %v6206_v11  ;;  %v3008_v43 = vpack.c.bf16 %v6201_v7, %v6209_v14  ;;  %v3001_v36 = vpack.c.bf16 %v6179_v23, %v6147_v61  ;;  %v3005_v61 = vpack.c.bf16 %v2454_v5, %v2446_v10  ;;  %v6257_v23 = vld [vmem:[%s7533_s2] sm:$0xff]  ;;  %s7534_s2 = sld [smem:[#allocation24_spill]] }
 0x5a4   : > { %v2558_v44 = vpack.c.bf16 %v2550_v19, %v2542_v40  ;;  %v2559_v55 = vpack.c.bf16 %v2551_v35, %v2543_v41  ;;  %v2560_v50 = vpack.c.bf16 %v2552_v20, %v2544_v47  ;;  %v2561_v38 = vpack.c.bf16 %v2553_v37, %v2545_v56 }
 0x5a5   : > { %v3006_v15 = vpack.c.bf16 %v2455_v39, %v2447_v45 }
 0x5a6   : > { %2681 = vmatpush.bf16.msra.mxu0 %v2558_v44  ;;  %2700 = vmatpush.bf16.msra.mxu1 %v2559_v55 }
 0x5a7   : > { %2719 = vmatpush.bf16.msra.mxu2 %v2560_v50  ;;  %2738 = vmatpush.bf16.msra.mxu3 %v2561_v38 }
 0x5ab   : > { %3088 = vmatpush.bf16.msrb.mxu2 %v3001_v36  ;;  %3117 = vmatpush.bf16.msrb.mxu3 %v3002_v51 }
 0x5ac   : > { %5056 = vmatmul.msk.bf16.gmra.mxu0 %vm1780_vm2, %v5228_v57 }
 0x5ad   : > { %5058 = vmatmul.msk.bf16.gmra.mxu1 %vm1780_vm2, %v5228_v57 }
 0x5ae   : > { %5060 = vmatmul.msk.bf16.gmra.mxu2 %vm1780_vm2, %v5228_v57 }
 0x5af   : > { %5062 = vmatmul.msk.bf16.gmra.mxu3 %vm1780_vm2, %v5228_v57 }
 0x5bc   : > { %5063 = vmatmul.msk.bf16.vlgmr.msra.gmra.mxu0 %vm1780_vm2, %v6193_v63 }
 0x5bd   : > { %5065 = vmatmul.msk.bf16.vlgmr.msra.gmra.mxu1 %vm1780_vm2, %v6193_v63 }
 0x5be   : > { %5067 = vmatmul.msk.bf16.vlgmr.msra.gmra.mxu2 %vm1780_vm2, %v6193_v63 }
 0x5bf   : > { %5069 = vmatmul.msk.bf16.vlgmr.msra.gmra.mxu3 %vm1780_vm2, %v6193_v63  ;;  %3204 = vmatpush.bf16.msra.mxu2 %v3005_v61  ;;  %v2570_v61 = vpop.permute.xlu2 %2569 }
 0x5c0   : > { %3233 = vmatpush.bf16.msra.mxu3 %v3006_v15 }
 0x5cc   : > { %5064 = vmatmul.msk.bf16.gmra.mxu0 %vm1780_vm2, %v5228_v57 }
 0x5cd   : > { %5066 = vmatmul.msk.bf16.gmra.mxu1 %vm1780_vm2, %v5228_v57 }
 0x5ce   : > { %5068 = vmatmul.msk.bf16.gmra.mxu2 %vm1780_vm2, %v5228_v57 }
 0x5cf   : > { %5070 = vmatmul.msk.bf16.gmra.mxu3 %vm1780_vm2, %v5228_v57 }
 0x5de   : > { %5099 = vmatmul.msk.bf16.vlgmr.msrb.gmra.mxu2 %vm1780_vm2, %v6257_v23 }
 0x5df   : > { %5103 = vmatmul.msk.bf16.vlgmr.msrb.gmra.mxu3 %vm1780_vm2, %v6257_v23 }
 0x5ee   : > { %5100 = vmatmul.msk.bf16.gmra.mxu2 %vm1780_vm2, %v6264_v0 }
 0x5ef   : > { %5104 = vmatmul.msk.bf16.gmra.mxu3 %vm1780_vm2, %v6264_v0 }
 0x5fe   : > { %5101 = vmatmul.msk.bf16.gmra.mxu2 %vm1780_vm2, %v6271_v58 }
 0x5ff   : > { %5105 = vmatmul.msk.bf16.gmra.mxu3 %vm1780_vm2, %v6271_v58 }
 0x60e   : > { %5102 = vmatmul.msk.bf16.gmra.mxu2 %vm1780_vm2, %v6278_v52 }
 0x60f   : > { %5106 = vmatmul.msk.bf16.gmra.mxu3 %vm1780_vm2, %v6278_v52 }
 0x619   : > { %v2607_v28 = vpop.f32.mrf.mxu0 }
 0x61a   : > { %v2626_v59 = vpop.f32.mrf.mxu1  ;;  %v2608_v8 = vadd.f32 %v2607_v28, %v6284_v53 }
 0x61b   : > { %v2627_v60 = vadd.f32 %v2626_v59, %v6284_v53 }
 0x61d   : > { %v2750_v9 = vmax.f32 %v2608_v8, %v2627_v60 }
 0x61e   : > { %5115 = vmatmul.msk.bf16.vlgmr.msra.gmra.mxu2 %vm1780_vm2, %v6257_v23 }
 0x61f   : > { %5119 = vmatmul.msk.bf16.vlgmr.msra.gmra.mxu3 %vm1780_vm2, %v6257_v23 }
 0x621   : > { %v2645_v27 = vpop.f32.mrf.mxu2  ;;  %v6292_v62 = vpop.f32.mrf.mxu0 }
 0x622   : > { %v2646_v63 = vadd.f32 %v2645_v27, %v6284_v53  ;;  %v2664_v2 = vpop.f32.mrf.mxu3  ;;  %v6295_v3 = vpop.f32.mrf.mxu1 }
 0x623   : > { %v2665_v39 = vadd.f32 %v2664_v2, %v6284_v53 }
 0x624   : > { %v2751_v5 = vmax.f32 %v2750_v9, %v2646_v63 }
 0x626   : > { %v2752_v10 = vmax.f32 %v2751_v5, %v2665_v39 }
 0x628   : > { %2753 = vmax.xlane.f32.xlu1 %v2752_v10 }
 0x629   : > { %v6298_v45 = vpop.f32.mrf.mxu2  ;;  %v2612_v4 = vpop.f32.mrf.mxu0 }
 0x62a   : > { %v6300_v12 = vpop.f32.mrf.mxu3  ;;  %v2631_v13 = vpop.f32.mrf.mxu1  ;;  %v2613_v1 = vadd.f32 %v2612_v4, %v2575_v42 }
 0x62b   : > { %v2632_v24 = vadd.f32 %v2631_v13, %v2575_v42 }
 0x62d   : > { %v2760_v54 = vmax.f32 %v2613_v1, %v2632_v24 }
 0x62e   : > { %5116 = vmatmul.msk.bf16.gmra.mxu2 %vm1780_vm2, %v6264_v0 }
 0x62f   : > { %5120 = vmatmul.msk.bf16.gmra.mxu3 %vm1780_vm2, %v6264_v0 }
 0x631   : > { %v2650_v25 = vpop.f32.mrf.mxu2  ;;  %v2614_v26 = vpop.f32.mrf.mxu0 }
 0x632   : > { %v2651_v32 = vadd.f32 %v2650_v25, %v2575_v42  ;;  %v2669_v33 = vpop.f32.mrf.mxu3  ;;  %v2633_v48 = vpop.f32.mrf.mxu1  ;;  %v2615_v34 = vadd.f32 %v2614_v26, %v2580_v18 }
 0x633   : > { %v2670_v30 = vadd.f32 %v2669_v33, %v2575_v42  ;;  %v2634_v19 = vadd.f32 %v2633_v48, %v2580_v18  ;;  %v2629_v33 = vadd.f32 %v6295_v3, %v2570_v61 }
 0x634   : > { %v2761_v49 = vmax.f32 %v2760_v54, %v2651_v32  ;;  %v2610_v32 = vadd.f32 %v6292_v62, %v2570_v61 }
 0x635   : > { %v2765_v40 = vmax.f32 %v2615_v34, %v2634_v19 }
 0x636   : > { %v2762_v35 = vmax.f32 %v2761_v49, %v2670_v30  ;;  %v2648_v30 = vadd.f32 %v6298_v45, %v2570_v61 }
 0x638   : > { %2763 = vmax.xlane.f32.xlu0 %v2762_v35 }
 0x639   : > { %v2652_v20 = vpop.f32.mrf.mxu2  ;;  %v2683_v37 = vpop.f32.mrf.mxu0 }
 0x63a   : > { %v2653_v41 = vadd.f32 %v2652_v20, %v2580_v18  ;;  %v2671_v47 = vpop.f32.mrf.mxu3  ;;  %v2702_v56 = vpop.f32.mrf.mxu1  ;;  %v2755_v20 = vmax.f32 %v2610_v32, %v2629_v33  ;;  %v2684_v62 = vadd.f32 %v2683_v37, %v6284_v53 }
 0x63b   : > { %v2672_v44 = vadd.f32 %v2671_v47, %v2580_v18  ;;  %v2703_v3 = vadd.f32 %v2702_v56, %v6284_v53  ;;  %v3000_v56 = vld [vmem:[%s7534_s2 + $0x38] sm:$0xff] }
 0x63c   : > { %v2766_v55 = vmax.f32 %v2765_v40, %v2653_v41 }
 0x63e   : > { %5117 = vmatmul.msk.bf16.gmra.mxu2 %vm1780_vm2, %v6271_v58  ;;  %v2767_v50 = vmax.f32 %v2766_v55, %v2672_v44  ;;  %v2756_v55 = vmax.f32 %v2755_v20, %v2648_v30  ;;  %v2474_v20 = vld [vmem:[%s7538_s9] sm:$0xff] }
 0x63f   : > { %5121 = vmatmul.msk.bf16.gmra.mxu3 %vm1780_vm2, %v6271_v58 }
 0x640   : > { %2768 = vmax.xlane.f32.xlu1 %v2767_v50  ;;  %v2667_v50 = vadd.f32 %v6300_v12, %v2570_v61 }
 0x641   : > { %v2721_v38 = vpop.f32.mrf.mxu2  ;;  %v2685_v36 = vpop.f32.mrf.mxu0 }
 0x642   : > { %v2740_v51 = vpop.f32.mrf.mxu3  ;;  %v2704_v57 = vpop.f32.mrf.mxu1  ;;  %v2686_v15 = vadd.f32 %v2685_v36, %v2570_v61  ;;  %v2722_v36 = vadd.f32 %v2721_v38, %v6284_v53  ;;  %v2995_v38 = vld [vmem:[%s7534_s2 + $0x10] sm:$0xff] }
 0x643   : > { %v2705_v28 = vadd.f32 %v2704_v57, %v2570_v61  ;;  %v2741_v12 = vadd.f32 %v2740_v51, %v6284_v53  ;;  %v2993_v53 = vld [vmem:[%s7534_s2] sm:$0xff]  ;;  %v2994_v51 = vld [vmem:[%s7534_s2 + $0x8] sm:$0xff] }
 0x645   : > { %v2845_v60 = vmax.f32 %v2686_v15, %v2705_v28  ;;  %v2757_v15 = vmax.f32 %v2756_v55, %v2667_v50  ;;  %v2840_v28 = vmax.f32 %v2684_v62, %v2703_v3 }
 0x649   : > { %v2723_v59 = vpop.f32.mrf.mxu2  ;;  %v2688_v8 = vpop.f32.mrf.mxu0 }
 0x64a   : > { %v2724_v27 = vadd.f32 %v2723_v59, %v2570_v61  ;;  %v2742_v9 = vpop.f32.mrf.mxu3  ;;  %v2707_v63 = vpop.f32.mrf.mxu1  ;;  %v2689_v39 = vadd.f32 %v2688_v8, %v2575_v42  ;;  %v2841_v59 = vmax.f32 %v2840_v28, %v2722_v36  ;;  %v2996_v8 = vld [vmem:[%s7534_s2 + $0x18] sm:$0xff] }
 0x64b   : > { %v2743_v2 = vadd.f32 %v2742_v9, %v2570_v61  ;;  %v2708_v10 = vadd.f32 %v2707_v63, %v2575_v42  ;;  %v3383_v61 = vld [vmem:[%s7535_s3 + $0x10] sm:$0xff]  ;;  %v2997_v9 = vld [vmem:[%s7534_s2 + $0x20] sm:$0xff]  ;;  %v3380_v63 = vld [vmem:[%s7536_s5 + $0x18] sm:$0xff] }
 0x64c   : > { %v2846_v5 = vmax.f32 %v2845_v60, %v2724_v27  ;;  %v2842_v37 = vmax.f32 %v2841_v59, %v2741_v12  ;;  %v2999_v60 = vld [vmem:[%s7534_s2 + $0x30] sm:$0xff] }
 0x64d   : > { %v2850_v1 = vmax.f32 %v2689_v39, %v2708_v10  ;;  %v3379_v27 = vld [vmem:[%s7536_s5 + $0x10] sm:$0xff] }
 0x64e   : > { %5118 = vmatmul.msk.bf16.gmra.mxu2 %vm1780_vm2, %v6278_v52  ;;  %v2847_v4 = vmax.f32 %v2846_v5, %v2743_v2  ;;  %v3377_v2 = vld [vmem:[%s7536_s5] sm:$0xff]  ;;  %v3382_v5 = vld [vmem:[%s7535_s3 + $0x8] sm:$0xff]  ;;  %v2472_v10 = vld [vmem:[%s7537_s8 + $0x10] sm:$0xff] }
 0x64f   : > { %5122 = vmatmul.msk.bf16.gmra.mxu3 %vm1780_vm2, %v6278_v52 }
 0x650   : > { %2848 = vmax.xlane.f32.xlu1 %v2847_v4 }
 0x651   : > { %v2726_v13 = vpop.f32.mrf.mxu2  ;;  %v2690_v26 = vpop.f32.mrf.mxu0 }
 0x652   : > { %v2727_v24 = vadd.f32 %v2726_v13, %v2575_v42  ;;  %v2745_v25 = vpop.f32.mrf.mxu3  ;;  %v2709_v54 = vpop.f32.mrf.mxu1  ;;  %v2691_v34 = vadd.f32 %v2690_v26, %v2580_v18 }
 0x653   : > { %v2746_v49 = vadd.f32 %v2745_v25, %v2575_v42  ;;  %v2710_v19 = vadd.f32 %v2709_v54, %v2580_v18  ;;  %v2477_v25 = vld [vmem:[%s7538_s9 + $0x18] sm:$0xff] }
 0x654   : > { %v2851_v48 = vmax.f32 %v2850_v1, %v2727_v24  ;;  %v2476_v1 = vld [vmem:[%s7538_s9 + $0x10] sm:$0xff]  ;;  %v2473_v24 = vld [vmem:[%s7537_s8 + $0x18] sm:$0xff] }
 0x655   : > { %v2855_v41 = vmax.f32 %v2691_v34, %v2710_v19  ;;  %v2470_v19 = vld [vmem:[%s7537_s8] sm:$0xff] }
 0x656   : > { %v2852_v35 = vmax.f32 %v2851_v48, %v2746_v49 }
 0x658   : > { %2853 = vmax.xlane.f32.xlu2 %v2852_v35 }
 0x659   : > { %v2728_v40 = vpop.f32.mrf.mxu2 }
 0x65a   : > { %v2729_v47 = vadd.f32 %v2728_v40, %v2580_v18  ;;  %v2747_v44 = vpop.f32.mrf.mxu3 }
 0x65b   : > { %v2748_v42 = vadd.f32 %v2747_v44, %v2580_v18  ;;  %v2998_v18 = vld [vmem:[%s7534_s2 + $0x28] sm:$0xff]  ;;  %s7539_s2 = sld [smem:[#allocation21_spill]] }
 0x65c   : > { %v2856_v45 = vmax.f32 %v2855_v41, %v2729_v47  ;;  %v2471_v47 = vld [vmem:[%s7537_s8 + $0x8] sm:$0xff]  ;;  %s7540_s8 = sld [smem:[#allocation22_spill]] }
 0x65e   : > { %v2857_v57 = vmax.f32 %v2856_v45, %v2748_v42  ;;  %v2475_v42 = vld [vmem:[%s7538_s9 + $0x8] sm:$0xff]  ;;  %s7610_s9 = sld [smem:[#allocation31_spill]] }
 0x660   : > { %2858 = vmax.xlane.f32.xlu0 %v2857_v57  ;;  %2758 = vmax.xlane.f32.xlu2 %v2757_v15 }
 0x661   : > { %v5230_v16 = vld [vmem:[%s7539_s2 + $0x8] sm:$0xff]  ;;  %v6381_v17 = vpop.f32.mrf.mxu2 }
 0x662   : > { %v6385_v21 = vpop.f32.mrf.mxu3 }
 0x668   : > { %2843 = vmax.xlane.f32.xlu0 %v2842_v37 }
 0x669   : > { %3046 = vperm.xlu1 %5334, %v3000_v56   ;;  %v6389_v22 = vpop.f32.mrf.mxu2 }
 0x671   : > { %3036 = vperm.xlu1 %5334, %v2998_v18  }
 0x678   : > { %3021 = vperm.xlu2 %5335, %v2995_v38  }
 0x679   : > { %3473 = vperm.xlu1 %5334, %v3383_v61   ;;  %v5229_v61 = vld [vmem:[%s7539_s2] sm:$0xff]  ;;  %s7541_s2 = sld [smem:[#allocation28_spill]] }
 0x67c   : > { %3026 = vperm.xlu0 %5333, %v2996_v8  }
 0x680   : > { %3041 = vperm.xlu2 %5335, %v2999_v60  }
 0x684   : > { %3011 = vperm.xlu0 %5333, %v2993_v53  }
 0x688   : > { %3016 = vperm.xlu2 %5335, %v2994_v51  }
 0x68c   : > { %3421 = vperm.xlu0 %5333, %v3379_v27  }
 0x690   : > { %3031 = vperm.xlu2 %5335, %v2997_v9  }
 0x698   : > { %3426 = vperm.xlu2 %5335, %v3380_v63  }
 0x69b   : > { %v2754_v39 = vpop.xlane.xlu1 %2753 }
 0x69c   : > { %v2770_v35 = vmul.f32 %v2754_v39, %v2470_v19 }
 0x69e   : > { %v2774_v41 = vadd.f32 %v2770_v35, %v2474_v20  ;;  %v2485_v35 = vld [vmem:[%s7540_s8 + $0x18] sm:$0xff] }
 0x6a0   : > { %3411 = vperm.xlu2 %5335, %v3377_v2   ;;  %v2778_v15 = vmax.f32 %v2774_v41, 0.0 }
 0x6a8   : > { %3468 = vperm.xlu2 %5335, %v3382_v5  }
 0x6ab   : > { %v2764_v4 = vpop.xlane.xlu0 %2763 }
 0x6ac   : > { %v2772_v13 = vmul.f32 %v2764_v4, %v2472_v10 }
 0x6ae   : > { %v2776_v54 = vadd.f32 %v2772_v13, %v2476_v1 }
 0x6b0   : > { %v2780_v48 = vmax.f32 %v2776_v54, 0.0 }
 0x6b3   : > { %v2769_v26 = vpop.xlane.xlu1 %2768 }
 0x6b4   : > { %v2773_v32 = vmul.f32 %v2769_v26, %v2473_v24 }
 0x6b6   : > { %v2777_v33 = vadd.f32 %v2773_v32, %v2477_v25 }
 0x6b8   : > { %v2781_v49 = vmax.f32 %v2777_v33, 0.0 }
 0x6ba   : > { %v2783_v30 = vpack.c.bf16 %v2781_v49, %v2780_v48 }
 0x6bc   : > { %2807 = vmatpush.bf16.msrb.mxu0 %v2783_v30 }
 0x6c3   : > { %v2849_v45 = vpop.xlane.xlu1 %2848 }
 0x6c4   : > { %v2861_v28 = vmul.f32 %v2849_v45, %v2471_v47 }
 0x6c6   : > { %v2865_v8 = vadd.f32 %v2861_v28, %v2475_v42 }
 0x6c8   : > { %v2869_v51 = vmax.f32 %v2865_v8, 0.0 }
 0x6cb   : > { %v2854_v34 = vpop.xlane.xlu2 %2853 }
 0x6cc   : > { %v2862_v40 = vmul.f32 %v2854_v34, %v2472_v10 }
 0x6ce   : > { %v2866_v50 = vadd.f32 %v2862_v40, %v2476_v1 }
 0x6d0   : > { %v2870_v59 = vmax.f32 %v2866_v50, 0.0 }
 0x6d3   : > { %v2859_v44 = vpop.xlane.xlu0 %2858  ;;  %v2759_v55 = vpop.xlane.xlu2 %2758 }
 0x6d4   : > { %v2863_v62 = vmul.f32 %v2859_v44, %v2473_v24  ;;  %v2771_v3 = vmul.f32 %v2759_v55, %v2471_v47 }
 0x6d6   : > { %v2867_v36 = vadd.f32 %v2863_v62, %v2477_v25  ;;  %v2775_v57 = vadd.f32 %v2771_v3, %v2475_v42  ;;  %v2484_v25 = vld [vmem:[%s7540_s8 + $0x10] sm:$0xff] }
 0x6d8   : > { %v2871_v12 = vmax.f32 %v2867_v36, 0.0  ;;  %v2779_v37 = vmax.f32 %v2775_v57, 0.0 }
 0x6da   : > { %v2873_v56 = vpack.c.bf16 %v2871_v12, %v2870_v59  ;;  %v2782_v18 = vpack.c.bf16 %v2779_v37, %v2778_v15 }
 0x6db   : > { %v2844_v38 = vpop.xlane.xlu0 %2843 }
 0x6dc   : > { %v2860_v60 = vmul.f32 %v2844_v38, %v2470_v19  ;;  %2808 = vmatpush.bf16.msrb.mxu0 %v2782_v18  ;;  %2880 = vmatpush.bf16.msrb.mxu1 %v2873_v56 }
 0x6de   : > { %v2864_v53 = vadd.f32 %v2860_v60, %v2474_v20 }
 0x6df   : > { %5079 = vmatmul.msk.bf16.vlgmr.msrb.gmra.mxu0 %vm2794_vm3, %v5229_v61 }
 0x6e0   : > { %3146 = vmatpush.bf16.msra.mxu0 %v3003_v29  ;;  %v2868_v27 = vmax.f32 %v2864_v53, 0.0  ;;  %v2482_v29 = vld [vmem:[%s7540_s8] sm:$0xff]  ;;  %v3392_v53 = vld [vmem:[%s7541_s2 + $0x18] sm:$0xff] }
 0x6e2   : > { %v2872_v9 = vpack.c.bf16 %v2869_v51, %v2868_v27 }
 0x6e4   : > { %3262 = vmatpush.bf16.msrb.mxu0 %v3007_v46  ;;  %2881 = vmatpush.bf16.msrb.mxu1 %v2872_v9  ;;  %v2483_v46 = vld [vmem:[%s7540_s8 + $0x8] sm:$0xff]  ;;  %s7609_s8 = sld [smem:[#allocation30_spill]] }
 0x6e7   : > { %5081 = vmatmul.msk.bf16.vlgmr.msrb.gmra.mxu1 %vm2794_vm3, %v5229_v61 }
 0x6e8   : > { %3175 = vmatpush.bf16.msra.mxu1 %v3004_v31  ;;  %v6392_v31 = vpop.f32.mrf.mxu3 }
 0x6ec   : > { %3291 = vmatpush.bf16.msrb.mxu1 %v3008_v43  ;;  %v6397_v43 = vpop.f32.mrf.mxu2 }
 0x6ef   : > { %5080 = vmatmul.msk.bf16.gmra.mxu0 %vm2794_vm3, %v5230_v16 }
 0x6f4   : > { %v6404_v32 = vpop.f32.mrf.mxu2 }
 0x6f7   : > { %5082 = vmatmul.msk.bf16.gmra.mxu1 %vm2794_vm3, %v5230_v16 }
 0x6fc   : > { %v6411_v50 = vpop.f32.mrf.mxu2 }
 0x6ff   : > { %5107 = vmatmul.msk.bf16.vlgmr.msra.gmra.mxu0 %vm1780_vm2, %v6257_v23 }
 0x704   : > { %v6419_v38 = vpop.f32.mrf.mxu2 }
 0x707   : > { %5111 = vmatmul.msk.bf16.vlgmr.msra.gmra.mxu1 %vm1780_vm2, %v6257_v23 }
 0x70f   : > { %5108 = vmatmul.msk.bf16.gmra.mxu0 %vm1780_vm2, %v6264_v0 }
 0x717   : > { %5112 = vmatmul.msk.bf16.gmra.mxu1 %vm1780_vm2, %v6264_v0 }
 0x71f   : > { %5109 = vmatmul.msk.bf16.gmra.mxu0 %vm1780_vm2, %v6271_v58 }
 0x727   : > { %5113 = vmatmul.msk.bf16.gmra.mxu1 %vm1780_vm2, %v6271_v58 }
 0x72f   : > { %5110 = vmatmul.msk.bf16.gmra.mxu0 %vm1780_vm2, %v6278_v52 }
 0x737   : > { %5114 = vmatmul.msk.bf16.gmra.mxu1 %vm1780_vm2, %v6278_v52 }
 0x73f   : > { %5123 = vmatmul.msk.bf16.vlgmr.msrb.gmra.mxu0 %vm1780_vm2, %v6257_v23 }
 0x747   : > { %5127 = vmatmul.msk.bf16.vlgmr.msrb.gmra.mxu1 %vm1780_vm2, %v6257_v23 }
 0x74f   : > { %5124 = vmatmul.msk.bf16.gmra.mxu0 %vm1780_vm2, %v6264_v0 }
 0x757   : > { %5128 = vmatmul.msk.bf16.gmra.mxu1 %vm1780_vm2, %v6264_v0  ;;  %v6399_v0 = vpop.f32.mrf.mxu3 }
 0x75c   : > { %v2810_v6 = vpop.f32.mrf.mxu0 }
 0x75d   : > { %v2811_v7 = vadd.f32 %v2810_v6, %v2482_v29 }
 0x75f   : > { %v2820_v11 = vsub.f32 0.0, %v2811_v7  ;;  %5125 = vmatmul.msk.bf16.gmra.mxu0 %vm1780_vm2, %v6271_v58  ;;  %v6406_v48 = vpop.f32.mrf.mxu3 }
 0x761   : > { %v2824_v14 = vmul.f32 1.442695, %v2820_v11  ;;  %v3378_v11 = vld [vmem:[%s7536_s5 + $0x8] sm:$0xff]  ;;  %s7608_s5 = sld [smem:[#allocation29_spill]] }
 0x763   : > { %5368 = vpow2.f32 %v2824_v14 }
 0x764   : > { %v2812_v23 = vpop.f32.mrf.mxu0  ;;  %v2883_v63 = vpop.f32.mrf.mxu1 }
 0x765   : > { %v2813_v2 = vadd.f32 %v2812_v23, %v2483_v46  ;;  %v2884_v5 = vadd.f32 %v2883_v63, %v2482_v29  ;;  %v6429_v23 = vpop.f32.mrf.mxu2 }
 0x767   : > { %v2821_v39 = vsub.f32 0.0, %v2813_v2  ;;  %v2893_v10 = vsub.f32 0.0, %v2884_v5  ;;  %5129 = vmatmul.msk.bf16.gmra.mxu1 %vm1780_vm2, %v6271_v58  ;;  %v6415_v45 = vpop.f32.mrf.mxu3 }
 0x769   : > { %v5369_v4 = vpop.eup %5368  ;;  %v2826_v13 = vmul.f32 1.442695, %v2821_v39  ;;  %v2897_v1 = vmul.f32 1.442695, %v2893_v10 }
 0x76a   : > { %v2832_v24 = vadd.f32 1.0, %v5369_v4 }
 0x76b   : > { %5370 = vpow2.f32 %v2826_v13  ;;  %v3384_v13 = vld [vmem:[%s7535_s3 + $0x18] sm:$0xff] }
 0x76c   : > { %5372 = vrcp.f32 %v2832_v24  ;;  %v2815_v26 = vpop.f32.mrf.mxu0  ;;  %v2885_v54 = vpop.f32.mrf.mxu1 }
 0x76d   : > { %5374 = vpow2.f32 %v2897_v1  ;;  %v2816_v33 = vadd.f32 %v2815_v26, %v2484_v25  ;;  %v2886_v59 = vadd.f32 %v2885_v54, %v2483_v46  ;;  %v6442_v26 = vpop.f32.mrf.mxu2 }
 0x76f   : > { %v2822_v49 = vsub.f32 0.0, %v2816_v33  ;;  %5126 = vmatmul.msk.bf16.gmra.mxu0 %vm1780_vm2, %v6278_v52  ;;  %v2894_v18 = vsub.f32 0.0, %v2886_v59  ;;  %v6422_v27 = vpop.f32.mrf.mxu3 }
 0x771   : > { %v5371_v58 = vpop.eup %5370  ;;  %v2828_v30 = vmul.f32 1.442695, %v2822_v49  ;;  %v2899_v9 = vmul.f32 1.442695, %v2894_v18  ;;  %v3381_v49 = vld [vmem:[%s7535_s3] sm:$0xff]  ;;  %s7607_s3 = sld [smem:[#allocation34_spill]] }
 0x772   : > { %v5373_v34 = vpop.eup %5372  ;;  %v2833_v19 = vadd.f32 1.0, %v5371_v58 }
 0x773   : > { %v5375_v20 = vpop.eup %5374  ;;  %5376 = vpow2.f32 %v2828_v30  ;;  %2935 = vperm.xlu1 %5334, %v5373_v34  }
 0x774   : > { %5378 = vrcp.f32 %v2833_v19  ;;  %v2905_v40 = vadd.f32 1.0, %v5375_v20  ;;  %v2817_v41 = vpop.f32.mrf.mxu0  ;;  %v2888_v47 = vpop.f32.mrf.mxu1  ;;  %v3389_v20 = vld [vmem:[%s7541_s2] sm:$0xff] }
 0x775   : > { %v2818_v44 = vadd.f32 %v2817_v41, %v2485_v35  ;;  %v2889_v55 = vadd.f32 %v2888_v47, %v2484_v25 }
 0x776   : > { %5380 = vrcp.f32 %v2905_v40 }
 0x777   : > { %v2823_v62 = vsub.f32 0.0, %v2818_v44  ;;  %v2895_v3 = vsub.f32 0.0, %v2889_v55  ;;  %5130 = vmatmul.msk.bf16.gmra.mxu1 %vm1780_vm2, %v6278_v52  ;;  %v6435_v39 = vpop.f32.mrf.mxu3  ;;  %v3391_v44 = vld [vmem:[%s7541_s2 + $0x10] sm:$0xff] }
 0x779   : > { %v5377_v42 = vpop.eup %5376  ;;  %v2830_v36 = vmul.f32 1.442695, %v2823_v62  ;;  %v2901_v57 = vmul.f32 1.442695, %v2895_v3  ;;  %v6459_v62 = vpop.permute.xlu2 %3021 }
 0x77a   : > { %v5379_v15 = vpop.eup %5378  ;;  %v2834_v28 = vadd.f32 1.0, %v5377_v42 }
 0x77b   : > { %5382 = vpow2.f32 %v2830_v36  ;;  %2940 = vperm.xlu0 %5333, %v5379_v15  }
 0x77c   : > { %v5381_v12 = vpop.eup %5380  ;;  %5384 = vrcp.f32 %v2834_v28  ;;  %v2890_v37 = vpop.f32.mrf.mxu1 }
 0x77d   : > { %v6417_v56 = vpop.f32.mrf.mxu0  ;;  %5386 = vpow2.f32 %v2901_v57  ;;  %2915 = vperm.xlu2 %5335, %v5381_v12   ;;  %v2891_v61 = vadd.f32 %v2890_v37, %v2485_v35  ;;  %v6449_v35 = vpop.f32.mrf.mxu2  ;;  %v3390_v57 = vld [vmem:[%s7541_s2 + $0x8] sm:$0xff]  ;;  %s7599_s2 = sld [smem:[#allocation27_spill]] }
 0x77f   : > { %v2896_v6 = vsub.f32 0.0, %v2891_v61  ;;  %v6444_v33 = vpop.f32.mrf.mxu3 }
 0x781   : > { %v5383_v52 = vpop.eup %5382  ;;  %v2903_v14 = vmul.f32 1.442695, %v2896_v6  ;;  %v6468_v28 = vpop.permute.xlu2 %3041 }
 0x782   : > { %v5385_v8 = vpop.eup %5384  ;;  %v2835_v60 = vadd.f32 1.0, %v5383_v52  ;;  %7542 = vst [vmem:[#allocation43_spill] sm:$0xff] %v6468_v28  ;;  %v6484_v6 = vpop.permute.xlu1 %3046 }
 0x783   : > { %v5387_v51 = vpop.eup %5386  ;;  %2945 = vperm.xlu1 %5334, %v5385_v8  }
 0x784   : > { %5388 = vrcp.f32 %v2835_v60  ;;  %v6426_v29 = vpop.f32.mrf.mxu1  ;;  %v2907_v7 = vadd.f32 1.0, %v5387_v51 }
 0x785   : > { %v6424_v16 = vpop.f32.mrf.mxu0  ;;  %3578 = vperm.xlu2 %5335, %v3392_v53   ;;  %5390 = vpow2.f32 %v2899_v9  ;;  %v6457_v55 = vpop.f32.mrf.mxu2 }
 0x786   : > { %5392 = vrcp.f32 %v2907_v7 }
 0x787   : > { %5394 = vpow2.f32 %v2903_v14  ;;  %v6452_v40 = vpop.f32.mrf.mxu3 }
 0x789   : > { %v6476_v52 = vpop.permute.xlu2 %3016 }
 0x78a   : > { %v5389_v46 = vpop.eup %5388 }
 0x78b   : > { %2950 = vperm.xlu0 %5333, %v5389_v46   ;;  %3416 = vperm.xlu1 %5334, %v3378_v11   ;;  %v5391_v5 = vpop.eup %5390 }
 0x78c   : > { %v6433_v2 = vpop.f32.mrf.mxu1  ;;  %v5393_v10 = vpop.eup %5392  ;;  %v2906_v4 = vadd.f32 1.0, %v5391_v5 }
 0x78d   : > { %v6431_v63 = vpop.f32.mrf.mxu0  ;;  %v5395_v1 = vpop.eup %5394 }
 0x78e   : > { %5396 = vrcp.f32 %v2906_v4  ;;  %v2908_v54 = vadd.f32 1.0, %v5395_v1  ;;  %v3211_v15 = vpop.f32.mrf.mxu2  ;;  %v6498_v1 = vpop.permute.xlu0 %3026 }
 0x78f   : > { %v6461_v3 = vpop.f32.mrf.mxu3 }
 0x790   : > { %5398 = vrcp.f32 %v2908_v54 }
 0x791   : > { %v6482_v51 = vpop.permute.xlu2 %3031 }
 0x793   : > { %3478 = vperm.xlu0 %5333, %v3384_v13   ;;  %2925 = vperm.xlu1 %5334, %v5393_v10   ;;  %v6492_v10 = vpop.permute.xlu1 %3036 }
 0x794   : > { %v6440_v25 = vpop.f32.mrf.mxu1  ;;  %v5397_v58 = vpop.eup %5396 }
 0x795   : > { %v6438_v24 = vpop.f32.mrf.mxu0 }
 0x796   : > { %v5399_v19 = vpop.eup %5398  ;;  %v6474_v18 = vpop.f32.mrf.mxu2 }
 0x797   : > { %v3240_v59 = vpop.f32.mrf.mxu3 }
 0x799   : > { %v6490_v46 = vpop.permute.xlu2 %3426 }
 0x79a   : > { %7548 = vst [vmem:[#allocation49_spill] sm:$0xff] %v6490_v46 }
 0x79b   : > { %3463 = vperm.xlu0 %5333, %v3381_v49   ;;  %2920 = vperm.xlu1 %5334, %v5397_v58  }
 0x79c   : > { %v6447_v34 = vpop.f32.mrf.mxu1 }
 0x79d   : > { %v3158_v30 = vpop.f32.mrf.mxu0 }
 0x79e   : > { %v3216_v53 = vpop.f32.mrf.mxu2 }
 0x79f   : > { %v3242_v61 = vpop.f32.mrf.mxu3 }
 0x7a1   : > { %v6500_v49 = vpop.permute.xlu2 %3411 }
 0x7a2   : > { %7551 = vst [vmem:[#allocation52_spill] sm:$0xff] %v6500_v49  ;;  %v3159_v49 = vadd.f32 %v3158_v30, %v6482_v51  ;;  %v3125_v30 = vadd.f32 %v6399_v0, %v6459_v62  ;;  %v6554_v0 = vadd.f32 %v6419_v38, %v6492_v10 }
 0x7a3   : > { %2930 = vperm.xlu0 %5333, %v5399_v19   ;;  %3563 = vperm.xlu1 %5334, %v3389_v20   ;;  %v6502_v19 = vpop.permute.xlu1 %3473 }
 0x7a4   : > { %v3187_v41 = vpop.f32.mrf.mxu1  ;;  %7552 = vst [vmem:[#allocation53_spill] sm:$0xff] %v6502_v19 }
 0x7a5   : > { %v6454_v47 = vpop.f32.mrf.mxu0  ;;  %v3188_v19 = vadd.f32 %v3187_v41, %v6482_v51  ;;  %v6534_v41 = vadd.f32 %v6442_v26, %v6484_v6  ;;  %v6558_v26 = vadd.f32 %v6422_v27, %v6492_v10 }
 0x7a6   : > { %v3218_v14 = vpop.f32.mrf.mxu2 }
 0x7a7   : > { %v3245_v9 = vpop.f32.mrf.mxu3 }
 0x7ab   : > { %3573 = vperm.xlu0 %5333, %v3391_v44  }
 0x7ac   : > { %v6463_v42 = vpop.f32.mrf.mxu1 }
 0x7ad   : > { %v6465_v36 = vpop.f32.mrf.mxu0 }
 0x7ae   : > { %v3221_v54 = vpop.f32.mrf.mxu2 }
 0x7af   : > { %v3247_v5 = vpop.f32.mrf.mxu3  ;;  %v6571_v38 = vadd.f32 %v3221_v54, %v6468_v28 }
 0x7b1   : > { %7561 = vst [vmem:[#allocation62_spill] sm:$0xff] %v6571_v38 }
 0x7b3   : > { %3568 = vperm.xlu0 %5333, %v3390_v57   ;;  %v6508_v57 = vpop.permute.xlu0 %3011 }
 0x7b4   : > { %v6470_v12 = vpop.f32.mrf.mxu1  ;;  %v3149_v46 = vadd.f32 %v6417_v56, %v6508_v57 }
 0x7b5   : > { %7543 = vst [vmem:[#allocation44_spill] sm:$0xff] %v6470_v12  ;;  %v6472_v37 = vpop.f32.mrf.mxu0 }
 0x7b6   : > { %7544 = vst [vmem:[#allocation45_spill] sm:$0xff] %v6472_v37 }
 0x7b7   : > { %v3250_v58 = vpop.f32.mrf.mxu3 }
 0x7bb   : > { %v6576_v27 = vpop.permute.xlu0 %3421 }
 0x7bc   : > { %v6478_v8 = vpop.f32.mrf.mxu1 }
 0x7bd   : > { %7545 = vst [vmem:[#allocation46_spill] sm:$0xff] %v6478_v8  ;;  %v6480_v60 = vpop.f32.mrf.mxu0 }
 0x7bf   : > { %v3252_v8 = vpop.f32.mrf.mxu3 }
 0x7c4   : > { %v6486_v7 = vpop.f32.mrf.mxu1 }
 0x7c5   : > { %7546 = vst [vmem:[#allocation47_spill] sm:$0xff] %v6486_v7  ;;  %v6488_v11 = vpop.f32.mrf.mxu0  ;;  %v6516_v7 = vpop.permute.xlu2 %3468 }
 0x7c6   : > { %7547 = vst [vmem:[#allocation48_spill] sm:$0xff] %v6488_v11  ;;  %v3223_v11 = vpop.f32.mrf.mxu2 }
 0x7c7   : > { %7555 = vst [vmem:[#allocation56_spill] sm:$0xff] %v6516_v7 }
 0x7cc   : > { %v6494_v4 = vpop.f32.mrf.mxu1 }
 0x7cd   : > { %7549 = vst [vmem:[#allocation50_spill] sm:$0xff] %v6494_v4  ;;  %v6496_v13 = vpop.f32.mrf.mxu0  ;;  %v3178_v4 = vadd.f32 %v6426_v29, %v6508_v57  ;;  %v3096_v29 = vadd.f32 %v6397_v43, %v6459_v62  ;;  %v6550_v43 = vadd.f32 %v3252_v8, %v6484_v6  ;;  %v3135_v8 = vadd.f32 %v6435_v39, %v6468_v28 }
 0x7ce   : > { %7550 = vst [vmem:[#allocation51_spill] sm:$0xff] %v6496_v13  ;;  %v6592_v39 = vadd.f32 %v6461_v3, %v6476_v52  ;;  %v3207_v3 = vadd.f32 %v6449_v35, %v6508_v57  ;;  %v6625_v35 = vadd.f32 %v6424_v16, %v6476_v52  ;;  %v6639_v16 = vadd.f32 %v6454_v47, %v6492_v10  ;;  %v7569_v47 = vld [vmem:[#allocation46_spill] sm:$0xff] }
 0x7cf   : > { %7558 = vst [vmem:[#allocation59_spill] sm:$0xff] %v6550_v43  ;;  %v3246_v43 = vadd.f32 %v3245_v9, %v6482_v51 }
 0x7d0   : > { %7564 = vst [vmem:[#allocation65_spill] sm:$0xff] %v6592_v39 }
 0x7d4   : > { %v6504_v20 = vpop.f32.mrf.mxu1 }
 0x7d5   : > { %7553 = vst [vmem:[#allocation54_spill] sm:$0xff] %v6504_v20  ;;  %v6506_v44 = vpop.f32.mrf.mxu0 }
 0x7d6   : > { %7554 = vst [vmem:[#allocation55_spill] sm:$0xff] %v6506_v44 }
 0x7d7   : > { %v2916_v54 = vpop.permute.xlu2 %2915 }
 0x7dc   : > { %v6522_v12 = vpop.f32.mrf.mxu1 }
 0x7e5   : > { %v6514_v13 = vpop.permute.xlu1 %2935 }
 0x7e6   : > { %v3315_v20 = vmul.f32 %v3149_v46, %v6514_v13  ;;  %v3316_v44 = vmul.f32 %v3178_v4, %v6514_v13  ;;  %v6538_v46 = vadd.f32 %v6444_v33, %v6484_v6  ;;  %v6541_v4 = vadd.f32 %v3211_v15, %v6459_v62 }
 0x7e7   : > { %v6561_v33 = vadd.f32 %v3218_v14, %v6492_v10  ;;  %v6564_v15 = vadd.f32 %v3247_v5, %v6492_v10  ;;  %v6580_v14 = vadd.f32 %v6389_v22, %v6476_v52  ;;  %v6584_v5 = vadd.f32 %v6392_v31, %v6476_v52 }
 0x7e8   : > { %v6524_v56 = vadd.f32 %v3315_v20, %v3159_v49  ;;  %v6526_v37 = vadd.f32 %v3316_v44, %v3188_v19  ;;  %v6544_v49 = vadd.f32 %v3240_v59, %v6459_v62  ;;  %v6547_v19 = vadd.f32 %v3223_v11, %v6484_v6  ;;  %v3274_v59 = vpop.f32.mrf.mxu0 }
 0x7e9   : > { %7559 = vst [vmem:[#allocation60_spill] sm:$0xff] %v6561_v33  ;;  %v3106_v11 = vadd.f32 %v6429_v23, %v6468_v28  ;;  %v6574_v20 = vadd.f32 %v3250_v58, %v6468_v28  ;;  %v6588_v23 = vadd.f32 %v6457_v55, %v6476_v52  ;;  %v6596_v58 = vadd.f32 %v6404_v32, %v6498_v1 }
 0x7ea   : > { %7556 = vst [vmem:[#allocation57_spill] sm:$0xff] %v6544_v49  ;;  %v6600_v22 = vadd.f32 %v6406_v48, %v6498_v1  ;;  %v6604_v31 = vadd.f32 %v6474_v18, %v6498_v1  ;;  %v6607_v55 = vadd.f32 %v3242_v61, %v6498_v1  ;;  %v3217_v44 = vadd.f32 %v3216_v53, %v6482_v51 }
 0x7eb   : > { %7557 = vst [vmem:[#allocation58_spill] sm:$0xff] %v6547_v19  ;;  %v3236_v32 = vadd.f32 %v6452_v40, %v6508_v57  ;;  %v3091_v48 = vadd.f32 %v6381_v17, %v6508_v57  ;;  %v3120_v18 = vadd.f32 %v6385_v21, %v6508_v57  ;;  %v3101_v61 = vadd.f32 %v6411_v50, %v6482_v51 }
 0x7ec   : > { %7560 = vst [vmem:[#allocation61_spill] sm:$0xff] %v6564_v15  ;;  %v3130_v19 = vadd.f32 %v6415_v45, %v6482_v51  ;;  %v3154_v40 = vadd.f32 %v6431_v63, %v6459_v62  ;;  %v3317_v53 = vmul.f32 %v3207_v3, %v2916_v54  ;;  %v3180_v17 = vadd.f32 %v6433_v2, %v6476_v52 }
 0x7ed   : > { %7562 = vst [vmem:[#allocation63_spill] sm:$0xff] %v6574_v20  ;;  %v3318_v9 = vmul.f32 %v3236_v32, %v2916_v54  ;;  %v3156_v21 = vadd.f32 %v6438_v24, %v6498_v1  ;;  %v3183_v50 = vadd.f32 %v6440_v25, %v6459_v62  ;;  %v3185_v45 = vadd.f32 %v6447_v34, %v6498_v1  ;;  %v7567_v25 = vld [vmem:[#allocation45_spill] sm:$0xff]  ;;  %v7568_v32 = vld [vmem:[#allocation44_spill] sm:$0xff] }
 0x7ee   : > { %7563 = vst [vmem:[#allocation64_spill] sm:$0xff] %v6588_v23  ;;  %v3164_v63 = vadd.f32 %v6465_v36, %v6468_v28  ;;  %v3265_v2 = vadd.f32 %v6480_v60, %v6508_v57  ;;  %v3275_v3 = vadd.f32 %v3274_v59, %v6482_v51  ;;  %v6648_v24 = vadd.f32 %v6463_v42, %v6492_v10  ;;  %v7570_v36 = vld [vmem:[#allocation48_spill] sm:$0xff]  ;;  %v2941_v42 = vpop.permute.xlu0 %2940 }
 0x7ef   : > { %7565 = vst [vmem:[#allocation66_spill] sm:$0xff] %v6604_v31  ;;  %v3166_v34 = vadd.f32 %v7567_v25, %v6484_v6  ;;  %v3193_v31 = vadd.f32 %v7568_v32, %v6468_v28  ;;  %v3195_v15 = vadd.f32 %v7569_v47, %v6484_v6  ;;  %v6658_v33 = vadd.f32 %v7570_v36, %v6476_v52  ;;  %v7573_v32 = vld [vmem:[#allocation47_spill] sm:$0xff] }
 0x7f0   : > { %7566 = vst [vmem:[#allocation67_spill] sm:$0xff] %v6607_v55  ;;  %v3303_v55 = vpop.f32.mrf.mxu1  ;;  %v6660_v60 = vadd.f32 %v3317_v53, %v3217_v44  ;;  %v6662_v59 = vadd.f32 %v3318_v9, %v3246_v43  ;;  %v3319_v39 = vmul.f32 %v3265_v2, %v2916_v54  ;;  %v3276_v20 = vpop.f32.mrf.mxu0  ;;  %v3294_v28 = vadd.f32 %v7573_v32, %v6508_v57  ;;  %v7579_v57 = vld [vmem:[#allocation50_spill] sm:$0xff] }
 0x7f1   : > { %v3304_v36 = vadd.f32 %v3303_v55, %v6482_v51  ;;  %v3313_v44 = vmul.f32 %v3091_v48, %v6514_v13  ;;  %v3314_v43 = vmul.f32 %v3120_v18, %v6514_v13  ;;  %v7581_v55 = vld [vmem:[#allocation55_spill] sm:$0xff] }
 0x7f2   : > { %7571 = vst [vmem:[#allocation45_spill] sm:$0xff] %v6660_v60  ;;  %v6666_v47 = vadd.f32 %v3319_v39, %v3275_v3  ;;  %v3320_v39 = vmul.f32 %v3294_v28, %v2916_v54  ;;  %v6689_v13 = vadd.f32 %v7581_v55, %v6498_v1 }
 0x7f3   : > { %7572 = vst [vmem:[#allocation44_spill] sm:$0xff] %v6662_v59  ;;  %v6715_v54 = vadd.f32 %v3313_v44, %v3101_v61 }
 0x7f4   : > { %7574 = vst [vmem:[#allocation46_spill] sm:$0xff] %v6666_v47 }
 0x7f5   : > { %v2946_v23 = vpop.permute.xlu1 %2945  ;;  %7585 = vst [vmem:[#allocation55_spill] sm:$0xff] %v6715_v54 }
 0x7f6   : > { %v3329_v38 = vmul.f32 %v3096_v29, %v2946_v23  ;;  %v3330_v25 = vmul.f32 %v3125_v30, %v2946_v23  ;;  %v3331_v7 = vmul.f32 %v3154_v40, %v2946_v23  ;;  %v3332_v49 = vmul.f32 %v3183_v50, %v2946_v23  ;;  %v7578_v29 = vld [vmem:[#allocation51_spill] sm:$0xff] }
 0x7f7   : > { %v6679_v30 = vadd.f32 %v7578_v29, %v6459_v62  ;;  %v6683_v23 = vadd.f32 %v7579_v57, %v6476_v52  ;;  %v6709_v52 = vadd.f32 %v6522_v12, %v6498_v1  ;;  %v6726_v12 = vadd.f32 %v3276_v20, %v6492_v10 }
 0x7f8   : > { %v6671_v53 = vadd.f32 %v3329_v38, %v3106_v11  ;;  %v6673_v9 = vadd.f32 %v3330_v25, %v3135_v8  ;;  %v6675_v2 = vadd.f32 %v3331_v7, %v3164_v63  ;;  %v6685_v51 = vadd.f32 %v3332_v49, %v3193_v31  ;;  %v7582_v11 = vld [vmem:[#allocation54_spill] sm:$0xff]  ;;  %v7583_v7 = vld [vmem:[#allocation52_spill] sm:$0xff]  ;;  %v6719_v18 = vpop.f32.mrf.mxu1  ;;  %v3279_v57 = vpop.f32.mrf.mxu0 }
 0x7f9   : > { %v6693_v8 = vadd.f32 %v7582_v11, %v6459_v62  ;;  %v6697_v38 = vmul.f32 %v7583_v7, %v6660_v60  ;;  %v6701_v48 = vmul.f32 %v7583_v7, %v6662_v59  ;;  %v6705_v28 = vmul.f32 %v7583_v7, %v6666_v47  ;;  %v7592_v47 = vld [vmem:[#allocation57_spill] sm:$0xff] }
 0x7fa   : > { %7575 = vst [vmem:[#allocation48_spill] sm:$0xff] %v6671_v53  ;;  %v6711_v49 = vadd.f32 %v3320_v39, %v3304_v36  ;;  %v3445_v62 = vmul.f32 %v6576_v27, %v6671_v53  ;;  %v6717_v31 = vadd.f32 %v3314_v43, %v3130_v19  ;;  %v3446_v40 = vmul.f32 %v6576_v27, %v6673_v9 }
 0x7fb   : > { %7576 = vst [vmem:[#allocation47_spill] sm:$0xff] %v6673_v9  ;;  %v3447_v50 = vmul.f32 %v6576_v27, %v6675_v2  ;;  %v3321_v1 = vmul.f32 %v6580_v14, %v2941_v42  ;;  %v3322_v63 = vmul.f32 %v6584_v5, %v2941_v42  ;;  %v3448_v61 = vmul.f32 %v6576_v27, %v6685_v51  ;;  %v7587_v5 = vld [vmem:[#allocation53_spill] sm:$0xff] }
 0x7fc   : > { %7577 = vst [vmem:[#allocation68_spill] sm:$0xff] %v6675_v2  ;;  %v6738_v20 = vmul.f32 %v7583_v7, %v6711_v49  ;;  %v3323_v14 = vmul.f32 %v6625_v35, %v2941_v42  ;;  %v3324_v43 = vmul.f32 %v3180_v17, %v2941_v42  ;;  %v3497_v29 = vadd.f32 %v7587_v5, %v3445_v62  ;;  %v7594_v2 = vld [vmem:[#allocation43_spill] sm:$0xff] }
 0x7fd   : > { %7580 = vst [vmem:[#allocation51_spill] sm:$0xff] %v6685_v51  ;;  %v2951_v19 = vpop.permute.xlu0 %2950  ;;  %v6732_v3 = vpop.permute.xlu1 %3416  ;;  %v3498_v39 = vadd.f32 %v7587_v5, %v3446_v40  ;;  %v3499_v55 = vadd.f32 %v7587_v5, %v3447_v50  ;;  %v6763_v42 = vadd.f32 %v3321_v1, %v6554_v0  ;;  %v6766_v11 = vadd.f32 %v3322_v63, %v6558_v26  ;;  %v7591_v63 = vld [vmem:[#allocation49_spill] sm:$0xff] }
 0x7fe   : > { %7584 = vst [vmem:[#allocation50_spill] sm:$0xff] %v6711_v49  ;;  %v3337_v25 = vmul.f32 %v6596_v58, %v2951_v19  ;;  %v3338_v32 = vmul.f32 %v6600_v22, %v2951_v19  ;;  %v3339_v36 = vmul.f32 %v3156_v21, %v2951_v19  ;;  %v3340_v44 = vmul.f32 %v3185_v45, %v2951_v19 }
 0x7ff   : > { %7586 = vst [vmem:[#allocation54_spill] sm:$0xff] %v6717_v31  ;;  %v6746_v58 = vmul.f32 %v7583_v7, %v6715_v54  ;;  %v6750_v22 = vmul.f32 %v7583_v7, %v6717_v31  ;;  %v3500_v62 = vadd.f32 %v7587_v5, %v3448_v61  ;;  %v3431_v40 = vmul.f32 %v7583_v7, %v6524_v56 }
 0x800   : > { %v6753_v21 = vadd.f32 %v3337_v25, %v6534_v41  ;;  %v6756_v35 = vadd.f32 %v3338_v32, %v6538_v46  ;;  %v6758_v17 = vadd.f32 %v3339_v36, %v3166_v34  ;;  %v6760_v45 = vadd.f32 %v3340_v44, %v3195_v15  ;;  %7589 = vst [vmem:[#allocation53_spill] sm:$0xff] %v6763_v42  ;;  %v3281_v9 = vpop.f32.mrf.mxu0 }
 0x801   : > { %7590 = vst [vmem:[#allocation69_spill] sm:$0xff] %v6766_v11  ;;  %v6772_v41 = vadd.f32 %v3323_v14, %v6639_v16  ;;  %v6775_v46 = vadd.f32 %v3324_v43, %v6648_v24  ;;  %v3529_v34 = vmax.f32 %v3497_v29, 0.0  ;;  %v3432_v15 = vmul.f32 %v7583_v7, %v6526_v37  ;;  %v3308_v43 = vpop.f32.mrf.mxu1 }
 0x802   : > { %7588 = vst [vmem:[#allocation52_spill] sm:$0xff] %v6760_v45  ;;  %v3530_v0 = vmax.f32 %v3498_v39, 0.0  ;;  %v3531_v50 = vmax.f32 %v3499_v55, 0.0  ;;  %v3437_v26 = vmul.f32 %v6732_v3, %v6763_v42  ;;  %v3438_v1 = vmul.f32 %v6732_v3, %v6766_v11 }
 0x803   : > { %v3453_v61 = vmul.f32 %v7591_v63, %v6753_v21  ;;  %v3454_v16 = vmul.f32 %v7591_v63, %v6756_v35  ;;  %v3455_v24 = vmul.f32 %v7591_v63, %v6758_v17  ;;  %v3456_v7 = vmul.f32 %v7591_v63, %v6760_v45 }
 0x804   : > { %v3532_v36 = vmax.f32 %v3500_v62, 0.0  ;;  %v3439_v44 = vmul.f32 %v6732_v3, %v6772_v41  ;;  %v3440_v14 = vmul.f32 %v6732_v3, %v6775_v46  ;;  %v7593_v62 = vld [vmem:[#allocation56_spill] sm:$0xff] }
 0x805   : > { %v6791_v19 = vpop.permute.xlu0 %3478  ;;  %v2926_v25 = vpop.permute.xlu1 %2925  ;;  %v3489_v60 = vadd.f32 %v7593_v62, %v3437_v26  ;;  %v3490_v11 = vadd.f32 %v7593_v62, %v3438_v1  ;;  %v3306_v1 = vadd.f32 %v6719_v18, %v6492_v10 }
 0x806   : > { %v3333_v32 = vmul.f32 %v6541_v4, %v2926_v25  ;;  %v3505_v29 = vadd.f32 %v6791_v19, %v3453_v61  ;;  %v3506_v39 = vadd.f32 %v6791_v19, %v3454_v16  ;;  %v3507_v55 = vadd.f32 %v6791_v19, %v3455_v24  ;;  %v7595_v24 = vld [vmem:[#allocation62_spill] sm:$0xff] }
 0x807   : > { %v3508_v49 = vadd.f32 %v6791_v19, %v3456_v7  ;;  %v3334_v59 = vmul.f32 %v7592_v47, %v2926_v25  ;;  %v3335_v4 = vmul.f32 %v6679_v30, %v2926_v25  ;;  %v3280_v61 = vadd.f32 %v3279_v57, %v7594_v2 }
 0x808   : > { %v3537_v42 = vmax.f32 %v3505_v29, 0.0  ;;  %v3538_v31 = vmax.f32 %v3506_v39, 0.0  ;;  %v3539_v54 = vmax.f32 %v3507_v55, 0.0  ;;  %v3336_v16 = vmul.f32 %v6693_v8, %v2926_v25 }
 0x809   : > { %v3540_v51 = vmax.f32 %v3508_v49, 0.0  ;;  %v6809_v53 = vadd.f32 %v3333_v32, %v7595_v24  ;;  %v3491_v47 = vadd.f32 %v7593_v62, %v3439_v44  ;;  %v3309_v29 = vadd.f32 %v3308_v43, %v7594_v2  ;;  %v7596_v49 = vld [vmem:[#allocation63_spill] sm:$0xff] }
 0x80a   : > { %v3553_v7 = vpack.c.bf16 %v3537_v42, %v3529_v34  ;;  %v3554_v30 = vpack.c.bf16 %v3538_v31, %v3530_v0  ;;  %v3555_v45 = vpack.c.bf16 %v3539_v54, %v3531_v50  ;;  %v6816_v39 = vadd.f32 %v3334_v59, %v7596_v49  ;;  %v7597_v59 = vld [vmem:[#allocation64_spill] sm:$0xff] }
 0x80b   : > { %v3556_v26 = vpack.c.bf16 %v3540_v51, %v3532_v36  ;;  %v6818_v57 = vadd.f32 %v3335_v4, %v3280_v61  ;;  %v3282_v8 = vadd.f32 %v3281_v9, %v6484_v6  ;;  %v3521_v31 = vmax.f32 %v3489_v60, 0.0  ;;  %v7598_v9 = vld [vmem:[#allocation65_spill] sm:$0xff] }
 0x80c   : > { %3603 = vmatpush.bf16.msrb.mxu2 %v3553_v7  ;;  %3622 = vmatpush.bf16.msrb.mxu3 %v3554_v30  ;;  %v3522_v54 = vmax.f32 %v3490_v11, 0.0  ;;  %v3492_v51 = vadd.f32 %v7593_v62, %v3440_v14  ;;  %v6824_v34 = vadd.f32 %v3336_v16, %v3309_v29  ;;  %v3449_v10 = vmul.f32 %v6576_v27, %v6809_v53  ;;  %v3310_v14 = vpop.f32.mrf.mxu1  ;;  %v6852_v29 = vld [vmem:[%s7599_s2] sm:$0xff] }
 0x80d   : > { %v6821_v25 = vpop.permute.xlu0 %3463  ;;  %v2921_v42 = vpop.permute.xlu1 %2920  ;;  %3641 = vmatpush.bf16.msra.mxu0 %v3555_v45  ;;  %3660 = vmatpush.bf16.msra.mxu1 %v3556_v26  ;;  %v3523_v18 = vmax.f32 %v3491_v47, 0.0  ;;  %v3450_v32 = vmul.f32 %v6576_v27, %v6816_v39  ;;  %v3451_v45 = vmul.f32 %v6576_v27, %v6818_v57  ;;  %v7601_v47 = vld [vmem:[#allocation61_spill] sm:$0xff]  ;;  %v3311_v26 = vadd.f32 %v3310_v14, %v6484_v6  ;;  %v7602_v6 = vld [vmem:[#allocation66_spill] sm:$0xff] }
 0x80e   : > { %v3325_v2 = vmul.f32 %v7597_v59, %v2921_v42  ;;  %v3326_v0 = vmul.f32 %v7598_v9, %v2921_v42  ;;  %v3481_v50 = vadd.f32 %v6821_v25, %v6746_v58  ;;  %v3482_v60 = vadd.f32 %v6821_v25, %v6750_v22 }
 0x80f   : > { %v3483_v11 = vadd.f32 %v6821_v25, %v3431_v40  ;;  %v3327_v36 = vmul.f32 %v6658_v33, %v2921_v42  ;;  %v3484_v44 = vadd.f32 %v6821_v25, %v3432_v15  ;;  %v3328_v43 = vmul.f32 %v6683_v23, %v2921_v42  ;;  %v7600_v40 = vld [vmem:[#allocation60_spill] sm:$0xff] }
 0x810   : > { %v3513_v58 = vmax.f32 %v3481_v50, 0.0  ;;  %v3514_v55 = vmax.f32 %v3482_v60, 0.0  ;;  %v3452_v22 = vmul.f32 %v6576_v27, %v6824_v34  ;;  %v6845_v61 = vadd.f32 %v3325_v2, %v7600_v40  ;;  %v7603_v2 = vld [vmem:[#allocation67_spill] sm:$0xff]  ;;  %v7604_v50 = vld [vmem:[#allocation58_spill] sm:$0xff] }
 0x811   : > { %v3515_v4 = vmax.f32 %v3483_v11, 0.0  ;;  %v3516_v16 = vmax.f32 %v3484_v44, 0.0  ;;  %v3524_v24 = vmax.f32 %v3492_v51, 0.0  ;;  %v6848_v7 = vadd.f32 %v3326_v0, %v7601_v47  ;;  %v7605_v11 = vld [vmem:[#allocation59_spill] sm:$0xff] }
 0x812   : > { %v3545_v33 = vpack.c.bf16 %v3521_v31, %v3513_v58  ;;  %v3546_v15 = vpack.c.bf16 %v3522_v54, %v3514_v55  ;;  %v3501_v49 = vadd.f32 %v7587_v5, %v3449_v10  ;;  %v3502_v27 = vadd.f32 %v7587_v5, %v3450_v32 }
 0x813   : > { %v3547_v30 = vpack.c.bf16 %v3523_v18, %v3515_v4  ;;  %v3548_v23 = vpack.c.bf16 %v3524_v24, %v3516_v16  ;;  %v6857_v42 = vadd.f32 %v3327_v36, %v6726_v12  ;;  %v6859_v59 = vadd.f32 %v3328_v43, %v3306_v1 }
 0x814   : > { %3604 = vmatpush.bf16.msrb.mxu2 %v3545_v33  ;;  %3623 = vmatpush.bf16.msrb.mxu3 %v3546_v15  ;;  %v3503_v31 = vadd.f32 %v7587_v5, %v3451_v45  ;;  %v3504_v12 = vadd.f32 %v7587_v5, %v3452_v22  ;;  %v3441_v1 = vmul.f32 %v6732_v3, %v6845_v61  ;;  %v3534_v5 = vmax.f32 %v3502_v27, 0.0 }
 0x815   : > { %v2931_v51 = vpop.permute.xlu0 %2930  ;;  %3642 = vmatpush.bf16.msra.mxu0 %v3547_v30  ;;  %3661 = vmatpush.bf16.msra.mxu1 %v3548_v23  ;;  %v3442_v0 = vmul.f32 %v6732_v3, %v6848_v7  ;;  %v3444_v43 = vmul.f32 %v6732_v3, %v6859_v59 }
 0x816   : > { %v3341_v54 = vmul.f32 %v7602_v6, %v2931_v51  ;;  %v3342_v18 = vmul.f32 %v7603_v2, %v2931_v51  ;;  %v3343_v10 = vmul.f32 %v6689_v13, %v2931_v51  ;;  %v3344_v9 = vmul.f32 %v6709_v52, %v2931_v51 }
 0x817   : > { %5139 = vmatmul.msk.bf16.vlgmr.msrb.gmra.mxu2 %vm2794_vm3, %v6852_v29  ;;  %5141 = vmatmul.msk.bf16.vlgmr.msrb.gmra.mxu3 %vm2794_vm3, %v6852_v29  ;;  %v3533_v52 = vmax.f32 %v3501_v49, 0.0  ;;  %v3535_v55 = vmax.f32 %v3503_v31, 0.0  ;;  %v3536_v4 = vmax.f32 %v3504_v12, 0.0  ;;  %v3493_v22 = vadd.f32 %v7593_v62, %v3441_v1 }
 0x818   : > { %v6872_v60 = vadd.f32 %v3341_v54, %v7604_v50  ;;  %v6875_v32 = vadd.f32 %v3342_v18, %v7605_v11  ;;  %v6877_v45 = vadd.f32 %v3343_v10, %v3282_v8  ;;  %v6883_v13 = vadd.f32 %v3344_v9, %v3311_v26  ;;  %5143 = vmatmul.msk.bf16.vlgmr.msra.gmra.mxu0 %vm2794_vm3, %v6852_v29  ;;  %v5236_v50 = vld [vmem:[%s7599_s2 + $0x8] sm:$0xff]  ;;  %s7606_s2 = sld [smem:[#allocation33_spill]] }
 0x819   : > { %5145 = vmatmul.msk.bf16.vlgmr.msra.gmra.mxu1 %vm2794_vm3, %v6852_v29  ;;  %v3443_v8 = vmul.f32 %v6732_v3, %v6857_v42  ;;  %v3494_v47 = vadd.f32 %v7593_v62, %v3442_v0  ;;  %v3485_v3 = vadd.f32 %v6821_v25, %v6697_v38  ;;  %v3486_v49 = vadd.f32 %v6821_v25, %v6701_v48 }
 0x81a   : > { %v3457_v36 = vmul.f32 %v7591_v63, %v6872_v60  ;;  %v3458_v44 = vmul.f32 %v7591_v63, %v6875_v32  ;;  %v3459_v14 = vmul.f32 %v7591_v63, %v6877_v45  ;;  %v3460_v58 = vmul.f32 %v7591_v63, %v6883_v13 }
 0x81b   : > { %v3495_v15 = vadd.f32 %v7593_v62, %v3443_v8  ;;  %v3496_v63 = vadd.f32 %v7593_v62, %v3444_v43  ;;  %v3525_v51 = vmax.f32 %v3493_v22, 0.0  ;;  %v3487_v31 = vadd.f32 %v6821_v25, %v6705_v28 }
 0x81c   : > { %v3509_v40 = vadd.f32 %v6791_v19, %v3457_v36  ;;  %v3510_v16 = vadd.f32 %v6791_v19, %v3458_v44  ;;  %v3511_v24 = vadd.f32 %v6791_v19, %v3459_v14  ;;  %v3512_v33 = vadd.f32 %v6791_v19, %v3460_v58 }
 0x81d   : > { %v3488_v19 = vadd.f32 %v6821_v25, %v6738_v20  ;;  %v3526_v2 = vmax.f32 %v3494_v47, 0.0  ;;  %v3527_v18 = vmax.f32 %v3495_v15, 0.0  ;;  %v3528_v10 = vmax.f32 %v3496_v63, 0.0 }
 0x81e   : > { %v3541_v30 = vmax.f32 %v3509_v40, 0.0  ;;  %v3542_v26 = vmax.f32 %v3510_v16, 0.0  ;;  %v3543_v23 = vmax.f32 %v3511_v24, 0.0  ;;  %v3544_v27 = vmax.f32 %v3512_v33, 0.0  ;;  %v6934_v40 = vpop.permute.xlu0 %3573 }
 0x81f   : > { %v3517_v9 = vmax.f32 %v3485_v3, 0.0  ;;  %v3518_v48 = vmax.f32 %v3486_v49, 0.0  ;;  %v3519_v12 = vmax.f32 %v3487_v31, 0.0  ;;  %v3520_v1 = vmax.f32 %v3488_v19, 0.0 }
 0x820   : > { %v3557_v6 = vpack.c.bf16 %v3541_v30, %v3533_v52  ;;  %v3558_v38 = vpack.c.bf16 %v3542_v26, %v3534_v5  ;;  %v3559_v54 = vpack.c.bf16 %v3543_v23, %v3535_v55  ;;  %v3560_v62 = vpack.c.bf16 %v3544_v27, %v3536_v4  ;;  %v3564_v5 = vpop.permute.xlu1 %3563 }
 0x821   : > { %v3549_v28 = vpack.c.bf16 %v3525_v51, %v3517_v9  ;;  %v3550_v0 = vpack.c.bf16 %v3526_v2, %v3518_v48  ;;  %v3551_v20 = vpack.c.bf16 %v3527_v18, %v3519_v12  ;;  %v3552_v25 = vpack.c.bf16 %v3528_v10, %v3520_v1  ;;  %v3579_v2 = vpop.permute.xlu2 %3578 }
 0x822   : > { %3679 = vmatpush.bf16.msra.mxu2 %v3557_v6  ;;  %3698 = vmatpush.bf16.msra.mxu3 %v3558_v38 }
 0x823   : > { %3717 = vmatpush.bf16.msrb.mxu0 %v3559_v54  ;;  %3736 = vmatpush.bf16.msrb.mxu1 %v3560_v62 }
 0x826   : > { %3680 = vmatpush.bf16.msra.mxu2 %v3549_v28  ;;  %3699 = vmatpush.bf16.msra.mxu3 %v3550_v0  ;;  %v6938_v23 = vpop.permute.xlu0 %3568 }
 0x827   : > { %3718 = vmatpush.bf16.msrb.mxu0 %v3551_v20  ;;  %3737 = vmatpush.bf16.msrb.mxu1 %v3552_v25 }
 0x828   : > { %5140 = vmatmul.msk.bf16.gmra.mxu2 %vm2794_vm3, %v5236_v50  ;;  %5142 = vmatmul.msk.bf16.gmra.mxu3 %vm2794_vm3, %v5236_v50 }
 0x829   : > { %5144 = vmatmul.msk.bf16.gmra.mxu0 %vm2794_vm3, %v5236_v50  ;;  %5146 = vmatmul.msk.bf16.gmra.mxu1 %vm2794_vm3, %v5236_v50 }
 0x838   : > { %5147 = vmatmul.msk.bf16.vlgmr.msra.gmra.mxu2 %vm2794_vm3, %v6852_v29  ;;  %5149 = vmatmul.msk.bf16.vlgmr.msra.gmra.mxu3 %vm2794_vm3, %v6852_v29 }
 0x839   : > { %5151 = vmatmul.msk.bf16.vlgmr.msrb.gmra.mxu0 %vm2794_vm3, %v6852_v29  ;;  %5153 = vmatmul.msk.bf16.vlgmr.msrb.gmra.mxu1 %vm2794_vm3, %v6852_v29 }
 0x848   : > { %5148 = vmatmul.msk.bf16.gmra.mxu2 %vm2794_vm3, %v5236_v50  ;;  %5150 = vmatmul.msk.bf16.gmra.mxu3 %vm2794_vm3, %v5236_v50 }
 0x849   : > { %5152 = vmatmul.msk.bf16.gmra.mxu0 %vm2794_vm3, %v5236_v50  ;;  %5154 = vmatmul.msk.bf16.gmra.mxu1 %vm2794_vm3, %v5236_v50 }
 0x895   : > { %v3644_v11 = vpop.f32.mrf.mxu0 }
 0x896   : > { %v3663_v52 = vpop.f32.mrf.mxu1  ;;  %v3645_v43 = vadd.f32 %v3644_v11, %v3564_v5 }
 0x897   : > { %v3664_v29 = vadd.f32 %v3663_v52, %v3564_v5 }
 0x89a   : > { %v3606_v8 = vpop.f32.mrf.mxu2  ;;  %v3625_v36 = vpop.f32.mrf.mxu3 }
 0x89b   : > { %v3607_v44 = vadd.f32 %v3606_v8, %v3564_v5  ;;  %v3626_v14 = vadd.f32 %v3625_v36, %v3564_v5 }
 0x89d   : > { %v3749_v58 = vmax.f32 %v3607_v44, %v3626_v14  ;;  %v3646_v55 = vpop.f32.mrf.mxu0 }
 0x89e   : > { %v3665_v4 = vpop.f32.mrf.mxu1  ;;  %v3647_v48 = vadd.f32 %v3646_v55, %v6938_v23 }
 0x89f   : > { %v3750_v22 = vmax.f32 %v3749_v58, %v3645_v43  ;;  %v3666_v11 = vadd.f32 %v3665_v4, %v6938_v23 }
 0x8a1   : > { %v3751_v16 = vmax.f32 %v3750_v22, %v3664_v29 }
 0x8a2   : > { %v3608_v24 = vpop.f32.mrf.mxu2  ;;  %v3627_v47 = vpop.f32.mrf.mxu3 }
 0x8a3   : > { %3752 = vmax.xlane.f32.xlu0 %v3751_v16  ;;  %v3609_v49 = vadd.f32 %v3608_v24, %v6938_v23  ;;  %v3628_v27 = vadd.f32 %v3627_v47, %v6938_v23 }
 0x8a5   : > { %v3754_v62 = vmax.f32 %v3609_v49, %v3628_v27 }
 0x8a6   : > { %v3649_v33 = vpop.f32.mrf.mxu0  ;;  %v3668_v3 = vpop.f32.mrf.mxu1 }
 0x8a7   : > { %v3650_v51 = vadd.f32 %v3649_v33, %v6934_v40  ;;  %v3669_v38 = vadd.f32 %v3668_v3, %v6934_v40  ;;  %v3755_v25 = vmax.f32 %v3754_v62, %v3647_v48 }
 0x8a9   : > { %v3756_v36 = vmax.f32 %v3755_v25, %v3666_v11 }
 0x8ab   : > { %v3611_v15 = vpop.f32.mrf.mxu2  ;;  %v3630_v63 = vpop.f32.mrf.mxu3 }
 0x8ac   : > { %v3612_v30 = vadd.f32 %v3611_v15, %v6934_v40  ;;  %v3631_v26 = vadd.f32 %v3630_v63, %v6934_v40 }
 0x8ae   : > { %v3759_v31 = vmax.f32 %v3612_v30, %v3631_v26  ;;  %v3651_v19 = vpop.f32.mrf.mxu0  ;;  %v3670_v6 = vpop.f32.mrf.mxu1 }
 0x8af   : > { %v3652_v28 = vadd.f32 %v3651_v19, %v3579_v2  ;;  %v3671_v52 = vadd.f32 %v3670_v6, %v3579_v2 }
 0x8b0   : > { %v3760_v54 = vmax.f32 %v3759_v31, %v3650_v51 }
 0x8b2   : > { %v3761_v18 = vmax.f32 %v3760_v54, %v3669_v38 }
 0x8b3   : > { %v3613_v10 = vpop.f32.mrf.mxu2  ;;  %v3632_v9 = vpop.f32.mrf.mxu3 }
 0x8b4   : > { %v3614_v12 = vadd.f32 %v3613_v10, %v3579_v2  ;;  %v3633_v1 = vadd.f32 %v3632_v9, %v3579_v2  ;;  %3762 = vmax.xlane.f32.xlu2 %v3761_v18 }
 0x8b6   : > { %v3764_v0 = vmax.f32 %v3614_v12, %v3633_v1  ;;  %v3720_v50 = vpop.f32.mrf.mxu0  ;;  %v3739_v20 = vpop.f32.mrf.mxu1 }
 0x8b7   : > { %v3721_v55 = vadd.f32 %v3720_v50, %v3564_v5  ;;  %v3740_v24 = vadd.f32 %v3739_v20, %v3564_v5 }
 0x8b8   : > { %v3765_v8 = vmax.f32 %v3764_v0, %v3652_v28 }
 0x8ba   : > { %v3766_v44 = vmax.f32 %v3765_v8, %v3671_v52  ;;  %v4049_v8 = vld [vmem:[%s7606_s2 + $0x10] sm:$0xff] }
 0x8bb   : > { %v3682_v14 = vpop.f32.mrf.mxu2  ;;  %v3701_v43 = vpop.f32.mrf.mxu3 }
 0x8bc   : > { %v3683_v58 = vadd.f32 %v3682_v14, %v3564_v5  ;;  %v3702_v29 = vadd.f32 %v3701_v43, %v3564_v5  ;;  %3757 = vmax.xlane.f32.xlu2 %v3756_v36  ;;  %3767 = vmax.xlane.f32.xlu1 %v3766_v44  ;;  %v4054_v14 = vld [vmem:[%s7607_s3 + $0x18] sm:$0xff] }
 0x8bd   : > { %v4050_v43 = vld [vmem:[%s7606_s2 + $0x18] sm:$0xff] }
 0x8be   : > { %v3838_v22 = vmax.f32 %v3683_v58, %v3702_v29  ;;  %v3722_v16 = vpop.f32.mrf.mxu0  ;;  %v3741_v47 = vpop.f32.mrf.mxu1  ;;  %v3393_v29 = vld [vmem:[%s7608_s5] sm:$0xff] }
 0x8bf   : > { %v3723_v28 = vadd.f32 %v3722_v16, %v6938_v23  ;;  %v3742_v52 = vadd.f32 %v3741_v47, %v6938_v23  ;;  %v3399_v16 = vld [vmem:[%s7609_s8 + $0x10] sm:$0xff]  ;;  %v3394_v47 = vld [vmem:[%s7608_s5 + $0x8] sm:$0xff] }
 0x8c0   : > { %v3839_v33 = vmax.f32 %v3838_v22, %v3721_v55 }
 0x8c2   : > { %v3840_v3 = vmax.f32 %v3839_v33, %v3740_v24  ;;  %v3396_v24 = vld [vmem:[%s7608_s5 + $0x18] sm:$0xff] }
 0x8c3   : > { %v3684_v15 = vpop.f32.mrf.mxu2  ;;  %v3703_v63 = vpop.f32.mrf.mxu3  ;;  %v3400_v33 = vld [vmem:[%s7609_s8 + $0x18] sm:$0xff] }
 0x8c4   : > { %3841 = vmax.xlane.f32.xlu2 %v3840_v3  ;;  %v3685_v6 = vadd.f32 %v3684_v15, %v6938_v23  ;;  %v3704_v5 = vadd.f32 %v3703_v63, %v6938_v23  ;;  %v3395_v23 = vld [vmem:[%s7608_s5 + $0x10] sm:$0xff]  ;;  %v3398_v15 = vld [vmem:[%s7609_s8 + $0x8] sm:$0xff]  ;;  %s7611_s5 = sld [smem:[#allocation32_spill]] }
 0x8c6   : > { %v3725_v4 = vpop.f32.mrf.mxu0  ;;  %v3744_v30 = vpop.f32.mrf.mxu1  ;;  %v3843_v10 = vmax.f32 %v3685_v6, %v3704_v5 }
 0x8c7   : > { %v3726_v31 = vadd.f32 %v3725_v4, %v6934_v40  ;;  %v3745_v38 = vadd.f32 %v3744_v30, %v6934_v40 }
 0x8c8   : > { %v3844_v25 = vmax.f32 %v3843_v10, %v3723_v28  ;;  %v5237_v10 = vld [vmem:[%s7610_s9] sm:$0xff] }
 0x8ca   : > { %v3845_v44 = vmax.f32 %v3844_v25, %v3742_v52 }
 0x8cb   : > { %v3687_v26 = vpop.f32.mrf.mxu2  ;;  %v3706_v49 = vpop.f32.mrf.mxu3 }
 0x8cc   : > { %v3688_v27 = vadd.f32 %v3687_v26, %v6934_v40  ;;  %v3707_v51 = vadd.f32 %v3706_v49, %v6934_v40 }
 0x8ce   : > { %v3848_v19 = vmax.f32 %v3688_v27, %v3707_v51  ;;  %v3727_v62 = vpop.f32.mrf.mxu0  ;;  %v3746_v0 = vpop.f32.mrf.mxu1  ;;  %v3397_v27 = vld [vmem:[%s7609_s8] sm:$0xff] }
 0x8cf   : > { %v3728_v50 = vadd.f32 %v3727_v62, %v3579_v2  ;;  %v3747_v40 = vadd.f32 %v3746_v0, %v3579_v2 }
 0x8d0   : > { %v3849_v54 = vmax.f32 %v3848_v19, %v3726_v31 }
 0x8d2   : > { %v3850_v18 = vmax.f32 %v3849_v54, %v3745_v38 }
 0x8d3   : > { %v3689_v9 = vpop.f32.mrf.mxu2  ;;  %v3708_v48 = vpop.f32.mrf.mxu3 }
 0x8d4   : > { %v3690_v12 = vadd.f32 %v3689_v9, %v3579_v2  ;;  %v3709_v1 = vadd.f32 %v3708_v48, %v3579_v2  ;;  %3851 = vmax.xlane.f32.xlu1 %v3850_v18  ;;  %v4053_v2 = vld [vmem:[%s7607_s3 + $0x10] sm:$0xff]  ;;  %v5238_v48 = vld [vmem:[%s7610_s9 + $0x8] sm:$0xff] }
 0x8d6   : > { %v3853_v20 = vmax.f32 %v3690_v12, %v3709_v1 }
 0x8d8   : > { %v3854_v11 = vmax.f32 %v3853_v20, %v3728_v50 }
 0x8da   : > { %v3855_v36 = vmax.f32 %v3854_v11, %v3747_v40 }
 0x8dc   : > { %4079 = vperm.xlu2 %5335, %v4049_v8   ;;  %3856 = vmax.xlane.f32.xlu0 %v3855_v36 }
 0x8dd   : > { %3846 = vmax.xlane.f32.xlu1 %v3845_v44 }
 0x8e4   : > { %4136 = vperm.xlu2 %5335, %v4054_v14  }
 0x8f0   : > { %4084 = vperm.xlu0 %5333, %v4050_v43  }
 0x8f6   : > { %4131 = vperm.xlu1 %5334, %v4053_v2  }
 0x916   : > { %v3753_v22 = vpop.xlane.xlu0 %3752 }
 0x917   : > { %v3769_v4 = vmul.f32 %v3753_v22, %v3393_v29 }
 0x919   : > { %v3773_v19 = vadd.f32 %v3769_v4, %v3397_v27 }
 0x91b   : > { %v3777_v62 = vmax.f32 %v3773_v19, 0.0 }
 0x927   : > { %v3763_v58 = vpop.xlane.xlu2 %3762 }
 0x928   : > { %v3771_v55 = vmul.f32 %v3763_v58, %v3395_v23 }
 0x92a   : > { %v3775_v30 = vadd.f32 %v3771_v55, %v3399_v16 }
 0x92c   : > { %v3779_v6 = vmax.f32 %v3775_v30, 0.0  ;;  %v3407_v30 = vld [vmem:[%s7611_s5 + $0x10] sm:$0xff] }
 0x92f   : > { %v3768_v3 = vpop.xlane.xlu1 %3767  ;;  %v3758_v63 = vpop.xlane.xlu2 %3757 }
 0x930   : > { %v3772_v26 = vmul.f32 %v3768_v3, %v3396_v24  ;;  %v3770_v49 = vmul.f32 %v3758_v63, %v3394_v47 }
 0x932   : > { %v3776_v51 = vadd.f32 %v3772_v26, %v3400_v33  ;;  %v3774_v31 = vadd.f32 %v3770_v49, %v3398_v15 }
 0x934   : > { %v3780_v5 = vmax.f32 %v3776_v51, 0.0  ;;  %v3778_v54 = vmax.f32 %v3774_v31, 0.0 }
 0x936   : > { %v3782_v38 = vpack.c.bf16 %v3780_v5, %v3779_v6  ;;  %v3781_v18 = vpack.c.bf16 %v3778_v54, %v3777_v62  ;;  %v3408_v5 = vld [vmem:[%s7611_s5 + $0x18] sm:$0xff] }
 0x937   : > { %v3842_v1 = vpop.xlane.xlu2 %3841 }
 0x938   : > { %3805 = vmatpush.bf16.msrb.mxu2 %v3782_v38  ;;  %v3858_v0 = vmul.f32 %v3842_v1, %v3393_v29 }
 0x93a   : > { %v3862_v8 = vadd.f32 %v3858_v0, %v3397_v27 }
 0x93c   : > { %3806 = vmatpush.bf16.msrb.mxu2 %v3781_v18  ;;  %v3866_v2 = vmax.f32 %v3862_v8, 0.0  ;;  %v4048_v18 = vld [vmem:[%s7606_s2 + $0x8] sm:$0xff] }
 0x93f   : > { %5163 = vmatmul.msk.bf16.vlgmr.msrb.gmra.mxu2 %vm2794_vm3, %v5237_v10 }
 0x947   : > { %v3852_v9 = vpop.xlane.xlu1 %3851 }
 0x948   : > { %v3860_v12 = vmul.f32 %v3852_v9, %v3395_v23  ;;  %v3405_v23 = vld [vmem:[%s7611_s5] sm:$0xff] }
 0x94a   : > { %v3864_v50 = vadd.f32 %v3860_v12, %v3399_v16 }
 0x94c   : > { %v3868_v36 = vmax.f32 %v3864_v50, 0.0 }
 0x94f   : > { %v3857_v28 = vpop.xlane.xlu0 %3856  ;;  %5164 = vmatmul.msk.bf16.gmra.mxu2 %vm2794_vm3, %v5238_v48 }
 0x950   : > { %v3861_v20 = vmul.f32 %v3857_v28, %v3396_v24  ;;  %v3847_v25 = vpop.xlane.xlu1 %3846  ;;  %v3406_v24 = vld [vmem:[%s7611_s5 + $0x8] sm:$0xff]  ;;  %s7612_s5 = sld [smem:[#allocation36_spill]] }
 0x951   : > { %v3859_v40 = vmul.f32 %v3847_v25, %v3394_v47 }
 0x952   : > { %v3865_v11 = vadd.f32 %v3861_v20, %v3400_v33 }
 0x953   : > { %v3863_v52 = vadd.f32 %v3859_v40, %v3398_v15 }
 0x954   : > { %v3869_v44 = vmax.f32 %v3865_v11, 0.0 }
 0x955   : > { %v3867_v43 = vmax.f32 %v3863_v52, 0.0  ;;  %v4047_v52 = vld [vmem:[%s7606_s2] sm:$0xff]  ;;  %s7622_s2 = sld [smem:[#allocation35_spill]] }
 0x956   : > { %v3871_v14 = vpack.c.bf16 %v3869_v44, %v3868_v36 }
 0x957   : > { %v3870_v58 = vpack.c.bf16 %v3867_v43, %v3866_v2 }
 0x958   : > { %3878 = vmatpush.bf16.msrb.mxu3 %v3871_v14 }
 0x95c   : > { %3879 = vmatpush.bf16.msrb.mxu3 %v3870_v58 }
 0x95f   : > { %5165 = vmatmul.msk.bf16.vlgmr.msrb.gmra.mxu3 %vm2794_vm3, %v5237_v10 }
 0x96f   : > { %5166 = vmatmul.msk.bf16.gmra.mxu3 %vm2794_vm3, %v5238_v48 }
 0x9c2   : > { %v3808_v29 = vpop.f32.mrf.mxu2 }
 0x9c3   : > { %v3809_v55 = vadd.f32 %v3808_v29, %v3405_v23  ;;  %v4051_v29 = vld [vmem:[%s7607_s3] sm:$0xff] }
 0x9c5   : > { %v3818_v22 = vsub.f32 0.0, %v3809_v55  ;;  %v4052_v55 = vld [vmem:[%s7607_s3 + $0x8] sm:$0xff]  ;;  %s7629_s3 = sld [smem:[#allocation38_spill]] }
 0x9c7   : > { %v3822_v16 = vmul.f32 1.442695, %v3818_v22 }
 0x9c9   : > { %5400 = vpow2.f32 %v3822_v16 }
 0x9ca   : > { %v3810_v47 = vpop.f32.mrf.mxu2 }
 0x9cb   : > { %v3811_v33 = vadd.f32 %v3810_v47, %v3406_v24 }
 0x9cd   : > { %v3819_v3 = vsub.f32 0.0, %v3811_v33 }
 0x9cf   : > { %v5401_v15 = vpop.eup %5400  ;;  %v3824_v63 = vmul.f32 1.442695, %v3819_v3 }
 0x9d0   : > { %v3830_v4 = vadd.f32 1.0, %v5401_v15 }
 0x9d1   : > { %5402 = vpow2.f32 %v3824_v63 }
 0x9d2   : > { %5404 = vrcp.f32 %v3830_v4  ;;  %v3813_v26 = vpop.f32.mrf.mxu2 }
 0x9d3   : > { %v3814_v49 = vadd.f32 %v3813_v26, %v3407_v30 }
 0x9d5   : > { %v3820_v27 = vsub.f32 0.0, %v3814_v49  ;;  %v4058_v49 = vld [vmem:[%s7612_s5 + $0x8] sm:$0xff] }
 0x9d7   : > { %v5403_v51 = vpop.eup %5402  ;;  %v3826_v31 = vmul.f32 1.442695, %v3820_v27 }
 0x9d8   : > { %v5405_v19 = vpop.eup %5404  ;;  %v3831_v6 = vadd.f32 1.0, %v5403_v51 }
 0x9d9   : > { %5406 = vpow2.f32 %v3826_v31  ;;  %3933 = vperm.xlu1 %5334, %v5405_v19  }
 0x9da   : > { %5408 = vrcp.f32 %v3831_v6  ;;  %v3815_v38 = vpop.f32.mrf.mxu2 }
 0x9db   : > { %v3816_v54 = vadd.f32 %v3815_v38, %v3408_v5  ;;  %v6982_v38 = vpop.permute.xlu2 %4079 }
 0x9dd   : > { %v3821_v62 = vsub.f32 0.0, %v3816_v54 }
 0x9df   : > { %v5407_v10 = vpop.eup %5406  ;;  %v3828_v9 = vmul.f32 1.442695, %v3821_v62  ;;  %v6986_v62 = vpop.permute.xlu1 %4131 }
 0x9e0   : > { %v5409_v48 = vpop.eup %5408  ;;  %v3832_v12 = vadd.f32 1.0, %v5407_v10 }
 0x9e1   : > { %5410 = vpow2.f32 %v3828_v9  ;;  %3938 = vperm.xlu0 %5333, %v5409_v48   ;;  %4074 = vperm.xlu1 %5334, %v4048_v18   ;;  %v6988_v18 = vpop.permute.xlu0 %4084 }
 0x9e2   : > { %5412 = vrcp.f32 %v3832_v12  ;;  %v3881_v1 = vpop.f32.mrf.mxu3 }
 0x9e3   : > { %v3882_v28 = vadd.f32 %v3881_v1, %v3405_v23  ;;  %v6984_v54 = vpop.permute.xlu2 %4136 }
 0x9e5   : > { %v3891_v0 = vsub.f32 0.0, %v3882_v28 }
 0x9e7   : > { %v5411_v50 = vpop.eup %5410  ;;  %v3895_v40 = vmul.f32 1.442695, %v3891_v0 }
 0x9e8   : > { %v5413_v20 = vpop.eup %5412  ;;  %v3833_v25 = vadd.f32 1.0, %v5411_v50 }
 0x9e9   : > { %3943 = vperm.xlu0 %5333, %v5413_v20  }
 0x9ea   : > { %5414 = vrcp.f32 %v3833_v25  ;;  %v3883_v11 = vpop.f32.mrf.mxu3 }
 0x9eb   : > { %5416 = vpow2.f32 %v3895_v40  ;;  %v3884_v36 = vadd.f32 %v3883_v11, %v3406_v24 }
 0x9ed   : > { %v3892_v2 = vsub.f32 0.0, %v3884_v36 }
 0x9ef   : > { %v3897_v16 = vmul.f32 1.442695, %v3892_v2  ;;  %v7614_v2 = vld [vmem:[#allocation48_spill] sm:$0xff] }
 0x9f0   : > { %v5415_v8 = vpop.eup %5414 }
 0x9f1   : > { %3948 = vperm.xlu2 %5335, %v5415_v8   ;;  %4069 = vperm.xlu0 %5333, %v4047_v52   ;;  %v5417_v14 = vpop.eup %5416 }
 0x9f2   : > { %v3886_v44 = vpop.f32.mrf.mxu3  ;;  %v3903_v23 = vadd.f32 1.0, %v5417_v14 }
 0x9f3   : > { %v3887_v43 = vadd.f32 %v3886_v44, %v3407_v30 }
 0x9f5   : > { %v3893_v58 = vsub.f32 0.0, %v3887_v43 }
 0x9f7   : > { %v3899_v22 = vmul.f32 1.442695, %v3893_v58 }
 0x9f9   : > { %5418 = vpow2.f32 %v3899_v22  ;;  %4121 = vperm.xlu2 %5335, %v4051_v29   ;;  %4126 = vperm.xlu0 %5333, %v4052_v55   ;;  %v7616_v55 = vld [vmem:[#allocation68_spill] sm:$0xff] }
 0x9fa   : > { %5420 = vrcp.f32 %v3903_v23  ;;  %v3888_v47 = vpop.f32.mrf.mxu3  ;;  %v7615_v23 = vld [vmem:[#allocation47_spill] sm:$0xff] }
 0x9fb   : > { %v3889_v33 = vadd.f32 %v3888_v47, %v3408_v5  ;;  %5422 = vpow2.f32 %v3897_v16  ;;  %v4057_v5 = vld [vmem:[%s7612_s5] sm:$0xff]  ;;  %v7617_v16 = vld [vmem:[#allocation51_spill] sm:$0xff]  ;;  %s7630_s5 = sld [smem:[#allocation39_spill]] }
 0x9fd   : > { %v3894_v24 = vsub.f32 0.0, %v3889_v33  ;;  %v7618_v33 = vld [vmem:[#allocation55_spill] sm:$0xff] }
 0x9ff   : > { %v5419_v3 = vpop.eup %5418  ;;  %v3901_v15 = vmul.f32 1.442695, %v3894_v24 }
 0xa00   : > { %v5421_v63 = vpop.eup %5420  ;;  %v3905_v4 = vadd.f32 1.0, %v5419_v3  ;;  %v7619_v3 = vld [vmem:[#allocation54_spill] sm:$0xff] }
 0xa01   : > { %5424 = vpow2.f32 %v3901_v15  ;;  %3913 = vperm.xlu0 %5333, %v5421_v63   ;;  %v5423_v30 = vpop.eup %5422 }
 0xa02   : > { %5426 = vrcp.f32 %v3905_v4  ;;  %v3904_v26 = vadd.f32 1.0, %v5423_v30 }
 0xa04   : > { %5428 = vrcp.f32 %v3904_v26 }
 0xa07   : > { %v5425_v27 = vpop.eup %5424 }
 0xa08   : > { %v5427_v51 = vpop.eup %5426  ;;  %v3906_v31 = vadd.f32 1.0, %v5425_v27 }
 0xa09   : > { %3923 = vperm.xlu1 %5334, %v5427_v51   ;;  %4226 = vperm.xlu0 %5333, %v4058_v49  }
 0xa0a   : > { %5430 = vrcp.f32 %v3906_v31  ;;  %v5429_v19 = vpop.eup %5428 }
 0xa10   : > { %v5431_v6 = vpop.eup %5430 }
 0xa11   : > { %3928 = vperm.xlu2 %5335, %v5431_v6   ;;  %3918 = vperm.xlu1 %5334, %v5429_v19   ;;  %v7103_v6 = vld [vmem:[%s7622_s2] sm:$0xff]  ;;  %s7627_s2 = sld [smem:[#allocation41_spill]] }
 0xa19   : > { %4221 = vperm.xlu2 %5335, %v4057_v5  }
 0xa4b   : > { %v3949_v10 = vpop.permute.xlu2 %3948  ;;  %v3934_v9 = vpop.permute.xlu1 %3933 }
 0xa4c   : > { %v4007_v48 = vadd.f32 1.0, %v3949_v10  ;;  %v3983_v12 = vadd.f32 1.0, %v3934_v9 }
 0xa4e   : > { %v6991_v0 = vmul.f32 %v4007_v48, %v6753_v21  ;;  %v6994_v50 = vmul.f32 %v4007_v48, %v6756_v35  ;;  %v7003_v40 = vmul.f32 %v3983_v12, %v6524_v56  ;;  %v7006_v11 = vmul.f32 %v3983_v12, %v6526_v37  ;;  %v7613_v21 = vld [vmem:[#allocation52_spill] sm:$0xff] }
 0xa4f   : > { %v7009_v52 = vmul.f32 %v4007_v48, %v6758_v17  ;;  %v7012_v8 = vmul.f32 %v4007_v48, %v7613_v21  ;;  %v7041_v24 = vmul.f32 %v3983_v12, %v7618_v33  ;;  %v7044_v15 = vmul.f32 %v3983_v12, %v7619_v3  ;;  %v7620_v12 = vld [vmem:[#allocation53_spill] sm:$0xff] }
 0xa50   : > { %v4111_v35 = vmul.f32 %v6988_v18, %v6991_v0  ;;  %v7621_v21 = vld [vmem:[#allocation69_spill] sm:$0xff] }
 0xa51   : > { %v4113_v37 = vmul.f32 %v6988_v18, %v7009_v52  ;;  %v4114_v17 = vmul.f32 %v6988_v18, %v7012_v8 }
 0xa52   : > { %v4163_v14 = vadd.f32 %v6984_v54, %v4111_v35 }
 0xa53   : > { %v3939_v1 = vpop.permute.xlu0 %3938  ;;  %v4165_v63 = vadd.f32 %v6984_v54, %v4113_v37  ;;  %v4166_v4 = vadd.f32 %v6984_v54, %v4114_v17 }
 0xa54   : > { %v3991_v28 = vadd.f32 1.0, %v3939_v1  ;;  %v4195_v51 = vmax.f32 %v4163_v14, 0.0 }
 0xa55   : > { %v4197_v17 = vmax.f32 %v4165_v63, 0.0 }
 0xa56   : > { %v6997_v20 = vmul.f32 %v3991_v28, %v6772_v41  ;;  %v7000_v25 = vmul.f32 %v3991_v28, %v6775_v46  ;;  %v4112_v41 = vmul.f32 %v6988_v18, %v6994_v50  ;;  %v7065_v1 = vmul.f32 %v3991_v28, %v7620_v12 }
 0xa57   : > { %v7068_v35 = vmul.f32 %v3991_v28, %v7621_v21 }
 0xa58   : > { %v4164_v43 = vadd.f32 %v6984_v54, %v4112_v41  ;;  %v7070_v41 = vpop.permute.xlu2 %4121 }
 0xa5a   : > { %v4196_v31 = vmax.f32 %v4164_v43, 0.0 }
 0xa5b   : > { %v3944_v36 = vpop.permute.xlu0 %3943 }
 0xa5c   : > { %v3999_v44 = vadd.f32 1.0, %v3944_v36  ;;  %v4198_v36 = vmax.f32 %v4166_v4, 0.0 }
 0xa5e   : > { %v7029_v58 = vmul.f32 %v3999_v44, %v7614_v2  ;;  %v7032_v29 = vmul.f32 %v3999_v44, %v7615_v23  ;;  %v7035_v22 = vmul.f32 %v3999_v44, %v7616_v55  ;;  %v7038_v47 = vmul.f32 %v3999_v44, %v7617_v16 }
 0xa60   : > { %v4103_v30 = vmul.f32 %v6982_v38, %v7029_v58  ;;  %v4104_v26 = vmul.f32 %v6982_v38, %v7032_v29  ;;  %v4105_v49 = vmul.f32 %v6982_v38, %v7035_v22  ;;  %v4106_v27 = vmul.f32 %v6982_v38, %v7038_v47 }
 0xa61   : > { %v4493_v19 = vpack.c.bf16 %v7009_v52, %v7035_v22 }
 0xa62   : > { %v4155_v5 = vadd.f32 %v6986_v62, %v4103_v30  ;;  %v4156_v10 = vadd.f32 %v6986_v62, %v4104_v26  ;;  %v4157_v9 = vadd.f32 %v6986_v62, %v4105_v49  ;;  %v4158_v48 = vadd.f32 %v6986_v62, %v4106_v27  ;;  %v7082_v30 = vpop.permute.xlu1 %4074 }
 0xa63   : > { %v7072_v37 = vpop.permute.xlu0 %4069  ;;  %v4095_v26 = vmul.f32 %v7082_v30, %v7065_v1  ;;  %v4096_v27 = vmul.f32 %v7082_v30, %v7068_v35  ;;  %v4098_v12 = vmul.f32 %v7082_v30, %v7000_v25 }
 0xa64   : > { %v4187_v44 = vmax.f32 %v4155_v5, 0.0  ;;  %v4188_v14 = vmax.f32 %v4156_v10, 0.0  ;;  %v4189_v43 = vmax.f32 %v4157_v9, 0.0  ;;  %v4190_v2 = vmax.f32 %v4158_v48, 0.0 }
 0xa65   : > { %v4087_v23 = vmul.f32 %v7072_v37, %v7041_v24  ;;  %v4088_v55 = vmul.f32 %v7072_v37, %v7044_v15  ;;  %v4089_v28 = vmul.f32 %v7072_v37, %v7003_v40  ;;  %v4090_v16 = vmul.f32 %v7072_v37, %v7006_v11 }
 0xa66   : > { %v4211_v33 = vpack.c.bf16 %v4195_v51, %v4187_v44  ;;  %v4212_v3 = vpack.c.bf16 %v4196_v31, %v4188_v14  ;;  %v4213_v63 = vpack.c.bf16 %v4197_v17, %v4189_v43  ;;  %v4214_v4 = vpack.c.bf16 %v4198_v36, %v4190_v2 }
 0xa67   : > { %v4139_v49 = vadd.f32 %v7070_v41, %v4087_v23  ;;  %v4140_v5 = vadd.f32 %v7070_v41, %v4088_v55  ;;  %v4097_v51 = vmul.f32 %v7082_v30, %v6997_v20  ;;  %v4141_v31 = vadd.f32 %v7070_v41, %v4089_v28 }
 0xa68   : > { %4243 = vmatpush.bf16.msra.mxu0 %v4211_v33  ;;  %4257 = vmatpush.bf16.msra.mxu1 %v4212_v3  ;;  %v4142_v10 = vadd.f32 %v7070_v41, %v4090_v16 }
 0xa69   : > { %4271 = vmatpush.bf16.msra.mxu2 %v4213_v63  ;;  %4285 = vmatpush.bf16.msra.mxu3 %v4214_v4  ;;  %v4171_v44 = vmax.f32 %v4139_v49, 0.0  ;;  %v4172_v2 = vmax.f32 %v4140_v5, 0.0  ;;  %v4173_v23 = vmax.f32 %v4141_v31, 0.0 }
 0xa6a   : > { %v4174_v55 = vmax.f32 %v4142_v10, 0.0 }
 0xa6b   : > { %v7094_v9 = vpop.permute.xlu0 %4126  ;;  %v3929_v48 = vpop.permute.xlu2 %3928 }
 0xa6c   : > { %v4147_v21 = vadd.f32 %v7094_v9, %v4095_v26  ;;  %v4148_v17 = vadd.f32 %v7094_v9, %v4096_v27  ;;  %v4149_v36 = vadd.f32 %v7094_v9, %v4097_v51  ;;  %v4150_v14 = vadd.f32 %v7094_v9, %v4098_v12 }
 0xa6d   : > { %v4011_v43 = vadd.f32 1.0, %v3929_v48 }
 0xa6e   : > { %v4179_v28 = vmax.f32 %v4147_v21, 0.0  ;;  %v4180_v16 = vmax.f32 %v4148_v17, 0.0  ;;  %v4181_v33 = vmax.f32 %v4149_v36, 0.0  ;;  %v4182_v3 = vmax.f32 %v4150_v14, 0.0  ;;  %v7624_v36 = vld [vmem:[#allocation44_spill] sm:$0xff]  ;;  %v7625_v14 = vld [vmem:[#allocation46_spill] sm:$0xff] }
 0xa6f   : > { %v7106_v27 = vmul.f32 %v4011_v43, %v6872_v60  ;;  %v7109_v5 = vmul.f32 %v4011_v43, %v6875_v32  ;;  %v7112_v51 = vmul.f32 %v4011_v43, %v6877_v45  ;;  %v7117_v31 = vmul.f32 %v4011_v43, %v6883_v13 }
 0xa70   : > { %v4203_v63 = vpack.c.bf16 %v4179_v28, %v4171_v44  ;;  %v4204_v4 = vpack.c.bf16 %v4180_v16, %v4172_v2  ;;  %v4205_v56 = vpack.c.bf16 %v4181_v33, %v4173_v23  ;;  %v4206_v26 = vpack.c.bf16 %v4182_v3, %v4174_v55  ;;  %v7626_v33 = vld [vmem:[#allocation50_spill] sm:$0xff] }
 0xa71   : > { %v4115_v60 = vmul.f32 %v6988_v18, %v7106_v27  ;;  %v4116_v32 = vmul.f32 %v6988_v18, %v7109_v5  ;;  %v4117_v45 = vmul.f32 %v6988_v18, %v7112_v51  ;;  %v4118_v13 = vmul.f32 %v6988_v18, %v7117_v31 }
 0xa72   : > { %4244 = vmatpush.bf16.msra.mxu0 %v4203_v63  ;;  %4258 = vmatpush.bf16.msra.mxu1 %v4204_v4 }
 0xa73   : > { %4272 = vmatpush.bf16.msra.mxu2 %v4205_v56  ;;  %4286 = vmatpush.bf16.msra.mxu3 %v4206_v26  ;;  %v3914_v49 = vpop.permute.xlu0 %3913  ;;  %v7623_v56 = vld [vmem:[#allocation45_spill] sm:$0xff]  ;;  %v4167_v21 = vadd.f32 %v6984_v54, %v4115_v60  ;;  %v4168_v2 = vadd.f32 %v6984_v54, %v4116_v32  ;;  %v4169_v23 = vadd.f32 %v6984_v54, %v4117_v45 }
 0xa74   : > { %v3987_v10 = vadd.f32 1.0, %v3914_v49  ;;  %v4170_v4 = vadd.f32 %v6984_v54, %v4118_v13 }
 0xa75   : > { %5171 = vmatmul.msk.bf16.vlgmr.msra.gmra.mxu0 %vm2794_vm3, %v7103_v6  ;;  %5172 = vmatmul.msk.bf16.vlgmr.msra.gmra.mxu1 %vm2794_vm3, %v7103_v6  ;;  %v4199_v63 = vmax.f32 %v4167_v21, 0.0  ;;  %v4201_v21 = vmax.f32 %v4169_v23, 0.0 }
 0xa76   : > { %5173 = vmatmul.msk.bf16.vlgmr.msra.gmra.mxu2 %vm2794_vm3, %v7103_v6  ;;  %5174 = vmatmul.msk.bf16.vlgmr.msra.gmra.mxu3 %vm2794_vm3, %v7103_v6  ;;  %v7134_v48 = vmul.f32 %v3987_v10, %v7623_v56  ;;  %v7138_v44 = vmul.f32 %v3987_v10, %v7624_v36  ;;  %v7141_v43 = vmul.f32 %v3987_v10, %v7625_v14 }
 0xa77   : > { %v7158_v3 = vmul.f32 %v3987_v10, %v7626_v33 }
 0xa78   : > { %v4091_v26 = vmul.f32 %v7072_v37, %v7134_v48  ;;  %v4092_v49 = vmul.f32 %v7072_v37, %v7138_v44  ;;  %v4093_v54 = vmul.f32 %v7072_v37, %v7141_v43 }
 0xa79   : > { %v4094_v36 = vmul.f32 %v7072_v37, %v7158_v3 }
 0xa7b   : > { %v3924_v12 = vpop.permute.xlu1 %3923 }
 0xa7c   : > { %v4003_v17 = vadd.f32 1.0, %v3924_v12  ;;  %v4200_v12 = vmax.f32 %v4168_v2, 0.0 }
 0xa7e   : > { %v7146_v55 = vmul.f32 %v4003_v17, %v6809_v53  ;;  %v7149_v18 = vmul.f32 %v4003_v17, %v6816_v39  ;;  %v7152_v28 = vmul.f32 %v4003_v17, %v6818_v57  ;;  %v7155_v16 = vmul.f32 %v4003_v17, %v6824_v34 }
 0xa7f   : > { %v4202_v17 = vmax.f32 %v4170_v4, 0.0 }
 0xa80   : > { %v4107_v53 = vmul.f32 %v6982_v38, %v7146_v55  ;;  %v4108_v39 = vmul.f32 %v6982_v38, %v7149_v18  ;;  %v4109_v57 = vmul.f32 %v6982_v38, %v7152_v28  ;;  %v4110_v34 = vmul.f32 %v6982_v38, %v7155_v16 }
 0xa82   : > { %v4159_v32 = vadd.f32 %v6986_v62, %v4107_v53  ;;  %v4160_v45 = vadd.f32 %v6986_v62, %v4108_v39  ;;  %v4161_v13 = vadd.f32 %v6986_v62, %v4109_v57  ;;  %v4162_v38 = vadd.f32 %v6986_v62, %v4110_v34 }
 0xa83   : > { %v3919_v56 = vpop.permute.xlu1 %3918  ;;  %v4143_v53 = vadd.f32 %v7070_v41, %v4091_v26  ;;  %v4144_v39 = vadd.f32 %v7070_v41, %v4092_v49  ;;  %v4145_v57 = vadd.f32 %v7070_v41, %v4093_v54 }
 0xa84   : > { %v3995_v14 = vadd.f32 1.0, %v3919_v56  ;;  %v4191_v33 = vmax.f32 %v4159_v32, 0.0  ;;  %v4192_v60 = vmax.f32 %v4160_v45, 0.0  ;;  %v4193_v46 = vmax.f32 %v4161_v13, 0.0 }
 0xa85   : > { %v4194_v10 = vmax.f32 %v4162_v38, 0.0  ;;  %v4177_v56 = vmax.f32 %v4145_v57, 0.0 }
 0xa86   : > { %v4027_v62 = vmul.f32 %v3995_v14, %v6845_v61  ;;  %v4028_v2 = vmul.f32 %v3995_v14, %v6848_v7  ;;  %v7191_v23 = vmul.f32 %v3995_v14, %v6857_v42  ;;  %v7194_v37 = vmul.f32 %v3995_v14, %v6859_v59 }
 0xa87   : > { %v4215_v4 = vpack.c.bf16 %v4199_v63, %v4191_v33  ;;  %v4216_v34 = vpack.c.bf16 %v4200_v12, %v4192_v60  ;;  %v4217_v32 = vpack.c.bf16 %v4201_v21, %v4193_v46  ;;  %v4218_v45 = vpack.c.bf16 %v4202_v17, %v4194_v10 }
 0xa88   : > { %v4099_v26 = vmul.f32 %v7082_v30, %v4027_v62  ;;  %v4100_v49 = vmul.f32 %v7082_v30, %v4028_v2  ;;  %v4101_v54 = vmul.f32 %v7082_v30, %v7191_v23  ;;  %v4102_v61 = vmul.f32 %v7082_v30, %v7194_v37 }
 0xa89   : > { %4299 = vmatpush.bf16.msrb.mxu0 %v4215_v4  ;;  %4313 = vmatpush.bf16.msrb.mxu1 %v4216_v34  ;;  %v4146_v7 = vadd.f32 %v7070_v41, %v4094_v36  ;;  %v4489_v42 = vpack.c.bf16 %v7191_v23, %v7141_v43  ;;  %v4175_v60 = vmax.f32 %v4143_v53, 0.0  ;;  %v4176_v10 = vmax.f32 %v4144_v39, 0.0 }
 0xa8a   : > { %4327 = vmatpush.bf16.msrb.mxu2 %v4217_v32  ;;  %4341 = vmatpush.bf16.msrb.mxu3 %v4218_v45  ;;  %v4151_v59 = vadd.f32 %v7094_v9, %v4099_v26  ;;  %v4152_v46 = vadd.f32 %v7094_v9, %v4100_v49  ;;  %v4153_v63 = vadd.f32 %v7094_v9, %v4101_v54  ;;  %v4227_v26 = vpop.permute.xlu0 %4226 }
 0xa8b   : > { %v4154_v13 = vadd.f32 %v7094_v9, %v4102_v61  ;;  %v4490_v30 = vpack.c.bf16 %v7194_v37, %v7158_v3  ;;  %v4178_v21 = vmax.f32 %v4146_v7, 0.0  ;;  %v4491_v53 = vpack.c.bf16 %v6991_v0, %v7029_v58 }
 0xa8c   : > { %v4183_v38 = vmax.f32 %v4151_v59, 0.0  ;;  %v4184_v41 = vmax.f32 %v4152_v46, 0.0  ;;  %v4185_v12 = vmax.f32 %v4153_v63, 0.0  ;;  %v4492_v9 = vpack.c.bf16 %v6994_v50, %v7032_v29 }
 0xa8d   : > { %v4186_v17 = vmax.f32 %v4154_v13, 0.0  ;;  %v4483_v0 = vpack.c.bf16 %v7065_v1, %v7041_v24  ;;  %v4484_v50 = vpack.c.bf16 %v7068_v35, %v7044_v15  ;;  %v4495_v58 = vpack.c.bf16 %v7106_v27, %v7146_v55  ;;  %v7234_v24 = vld [vmem:[%s7627_s2] sm:$0xff]  ;;  %v7241_v15 = vld [vmem:[%s7627_s2 + $0x8] sm:$0xff]  ;;  %v4222_v27 = vpop.permute.xlu2 %4221  ;;  %s7628_s2 = sld [smem:[#allocation37_spill]] }
 0xa8e   : > { %v4207_v36 = vpack.c.bf16 %v4183_v38, %v4175_v60  ;;  %v4208_v14 = vpack.c.bf16 %v4184_v41, %v4176_v10  ;;  %v4209_v33 = vpack.c.bf16 %v4185_v12, %v4177_v56  ;;  %v4496_v29 = vpack.c.bf16 %v7109_v5, %v7149_v18 }
 0xa8f   : > { %v4210_v4 = vpack.c.bf16 %v4186_v17, %v4178_v21  ;;  %v4487_v39 = vpack.c.bf16 %v4027_v62, %v7134_v48  ;;  %v7635_v43 = vpack.c.bf16 %v7000_v25, %v7006_v11 }
 0xa90   : > { %4300 = vmatpush.bf16.msrb.mxu0 %v4207_v36  ;;  %4314 = vmatpush.bf16.msrb.mxu1 %v4208_v14  ;;  %v4479_v14 = vld [vmem:[%s7517_s6] sm:$0xff] }
 0xa91   : > { %4328 = vmatpush.bf16.msrb.mxu2 %v4209_v33  ;;  %4342 = vmatpush.bf16.msrb.mxu3 %v4210_v4 }
 0xa93   : > { %5175 = vmatmul.msk.bf16.vlgmr.msrb.gmra.mxu0 %vm2794_vm3, %v7103_v6  ;;  %5176 = vmatmul.msk.bf16.vlgmr.msrb.gmra.mxu1 %vm2794_vm3, %v7103_v6 }
 0xa94   : > { %5177 = vmatmul.msk.bf16.vlgmr.msrb.gmra.mxu2 %vm2794_vm3, %v7103_v6  ;;  %5178 = vmatmul.msk.bf16.vlgmr.msrb.gmra.mxu3 %vm2794_vm3, %v7103_v6  ;;  %v4488_v6 = vpack.c.bf16 %v4028_v2, %v7138_v44 }
 0xa95   : > { %4541 = vmatpush.bf16.msra.mxu2 %v4491_v53  ;;  %4560 = vmatpush.bf16.msra.mxu3 %v4492_v9 }
 0xa99   : > { %4542 = vmatpush.bf16.msra.mxu2 %v4483_v0  ;;  %4561 = vmatpush.bf16.msra.mxu3 %v4484_v50 }
 0xa9d   : > { %4617 = vmatpush.bf16.msrb.mxu2 %v4495_v58  ;;  %4636 = vmatpush.bf16.msrb.mxu3 %v4496_v29 }
 0xaa1   : > { %4618 = vmatpush.bf16.msrb.mxu2 %v4487_v39  ;;  %4637 = vmatpush.bf16.msrb.mxu3 %v4488_v6 }
 0xaa4   : > { %5193 = vmatmul.msk.bf16.vlgmr.msra.gmra.mxu2 %vm2794_vm3, %v7234_v24  ;;  %5195 = vmatmul.msk.bf16.vlgmr.msra.gmra.mxu3 %vm2794_vm3, %v7234_v24 }
 0xab4   : > { %5194 = vmatmul.msk.bf16.gmra.mxu2 %vm2794_vm3, %v7241_v15  ;;  %5196 = vmatmul.msk.bf16.gmra.mxu3 %vm2794_vm3, %v7241_v15 }
 0xac4   : > { %5201 = vmatmul.msk.bf16.vlgmr.msrb.gmra.mxu2 %vm2794_vm3, %v7234_v24  ;;  %5203 = vmatmul.msk.bf16.vlgmr.msrb.gmra.mxu3 %vm2794_vm3, %v7234_v24 }
 0xad4   : > { %5202 = vmatmul.msk.bf16.gmra.mxu2 %vm2794_vm3, %v7241_v15  ;;  %5204 = vmatmul.msk.bf16.gmra.mxu3 %vm2794_vm3, %v7241_v15 }
 0xaf2   : > { %v4246_v1 = vpop.f32.mrf.mxu0  ;;  %v4260_v35 = vpop.f32.mrf.mxu1 }
 0xaf3   : > { %v4247_v48 = vadd.f32 %v4246_v1, %v4222_v27  ;;  %v4261_v18 = vadd.f32 %v4260_v35, %v4222_v27  ;;  %v4481_v35 = vld [vmem:[%s7517_s6 + $0x10] sm:$0xff] }
 0xaf9   : > { %v4274_v5 = vpop.f32.mrf.mxu2  ;;  %v4288_v55 = vpop.f32.mrf.mxu3 }
 0xafa   : > { %v4275_v44 = vadd.f32 %v4274_v5, %v4222_v27  ;;  %v4289_v57 = vadd.f32 %v4288_v55, %v4222_v27  ;;  %v4248_v34 = vpop.f32.mrf.mxu0  ;;  %v4262_v45 = vpop.f32.mrf.mxu1  ;;  %v4059_v55 = vld [vmem:[%s7628_s2] sm:$0xff] }
 0xafb   : > { %v4249_v54 = vadd.f32 %v4248_v34, %v4227_v26  ;;  %v4263_v59 = vadd.f32 %v4262_v45, %v4227_v26  ;;  %v4062_v34 = vld [vmem:[%s7629_s3 + $0x8] sm:$0xff] }
 0xafc   : > { %v4349_v62 = vmax.f32 %v4247_v48, %v4275_v44  ;;  %v4350_v2 = vmax.f32 %v4261_v18, %v4289_v57  ;;  %v4480_v44 = vld [vmem:[%s7517_s6 + $0x8] sm:$0xff] }
 0xafe   : > { %v4351_v32 = vmax.f32 %v4349_v62, %v4350_v2  ;;  %v4061_v62 = vld [vmem:[%s7629_s3] sm:$0xff]  ;;  %v4060_v2 = vld [vmem:[%s7628_s2 + $0x8] sm:$0xff]  ;;  %s7473_s2 = sand.u32 1, %s5502_s10  }
 0xaff   : > { %s4996_s3 = sshll.u32 %s7473_s2, 4  ;;  %s5243_s2 = sshll.u32 %s5838_s0, 4 }
 0xb00   : > { %4352 = vmax.xlane.f32.xlu1 %v4351_v32 }
 0xb01   : > { %v4276_v49 = vpop.f32.mrf.mxu2  ;;  %v4290_v7 = vpop.f32.mrf.mxu3 }
 0xb02   : > { %v4277_v61 = vadd.f32 %v4276_v49, %v4227_v26  ;;  %v4291_v46 = vadd.f32 %v4290_v7, %v4227_v26 }
 0xb04   : > { %v4354_v63 = vmax.f32 %v4249_v54, %v4277_v61  ;;  %v4355_v60 = vmax.f32 %v4263_v59, %v4291_v46  ;;  %v5240_v59 = vld [vmem:[%s7630_s5] sm:$0xff]  ;;  %v7631_v46 = vpack.c.bf16 %v6997_v20, %v7003_v40  ;;  %s7633_s5 = sld [smem:[#allocation40_spill]] }
 0xb06   : > { %v4356_v10 = vmax.f32 %v4354_v63, %v4355_v60  ;;  %v7632_v63 = vpack.c.bf16 %v7112_v51, %v7152_v28  ;;  %v7634_v51 = vpack.c.bf16 %v7012_v8, %v7038_v47  ;;  %v7636_v28 = vpack.c.bf16 %v7117_v31, %v7155_v16 }
 0xb08   : > { %4357 = vmax.xlane.f32.xlu2 %v4356_v10 }
 0xb0a   : > { %v4065_v25 = vld [vmem:[%s7633_s5] sm:$0xff]  ;;  %v4066_v16 = vld [vmem:[%s7633_s5 + $0x8] sm:$0xff]  ;;  %s1456_s5 = scalar_lea.vmem [#allocation2], %s4996_s3  ;;  %s7637_s3 = sand.u32 1, %s5502_s10  }
 0xb0b   : > { %s4881_s8 = sshll.u32 %s1456_s5, 4  ;;  %s4882_s8 = int_to_ptr.vmem [resolvable:$true] %s4881_s8 }
 0xb10   : > { %v4302_v13 = vpop.f32.mrf.mxu0  ;;  %v4316_v38 = vpop.f32.mrf.mxu1 }
 0xb11   : > { %v4303_v12 = vadd.f32 %v4302_v13, %v4222_v27  ;;  %v4317_v21 = vadd.f32 %v4316_v38, %v4222_v27 }
 0xb17   : > { %v4330_v41 = vpop.f32.mrf.mxu2  ;;  %v4344_v56 = vpop.f32.mrf.mxu3 }
 0xb18   : > { %v4331_v17 = vadd.f32 %v4330_v41, %v4222_v27  ;;  %v4345_v36 = vadd.f32 %v4344_v56, %v4222_v27  ;;  %v4304_v9 = vpop.f32.mrf.mxu0  ;;  %v4318_v0 = vpop.f32.mrf.mxu1 }
 0xb19   : > { %4501 = vperm.xlu1 %5334, %v4479_v14   ;;  %v4305_v29 = vadd.f32 %v4304_v9, %v4227_v26  ;;  %v4319_v39 = vadd.f32 %v4318_v0, %v4227_v26 }
 0xb1a   : > { %v4398_v33 = vmax.f32 %v4303_v12, %v4331_v17  ;;  %v4399_v4 = vmax.f32 %v4317_v21, %v4345_v36  ;;  %v4482_v21 = vld [vmem:[%s7517_s6 + $0x18] sm:$0xff]  ;;  %s4879_s6 = scalar_lea.hbm %s5815_s4, %s5243_s2 }
 0xb1b   : > { %s4883_s9 = sshll.u32 %s4879_s6, 4  ;;  %s4868_s6 = scalar_lea.sflag [#allocation3], %s7637_s3  ;;  %s4884_s9 = int_to_ptr.hbm [resolvable:$true] %s4883_s9 }
 0xb1c   : > { %v4400_v53 = vmax.f32 %v4398_v33, %v4399_v4  ;;  %s5462_s0 = sshra.s32 %s4884_s9, 4  ;;  %s5463_s0 = int_to_ptr.hbm [resolvable:$true] %s5462_s0 }
 0xb1d   : > { %s5464_s2 = scalar_lea.hbm %s5463_s0, 16  ;;  %p5469_p0 = scmp.lt.s32.totalorder %s5463_s0, %s5815_s4 }
 0xb1e   : > { %4401 = vmax.xlane.f32.xlu0 %v4400_v53  ;;  %v4720_v53 = vld [vmem:[%s5810_s27] sm:$0x3]  ;;  %p5465_p11 = scmp.ne.s32.totalorder %s5463_s0, %s5464_s2  ;;  %p5470_p1 = scmp.lt.s32.totalorder %s5468_s12, %s5464_s2 }
 0xb1f   : > { %v4332_v50 = vpop.f32.mrf.mxu2  ;;  %v4346_v58 = vpop.f32.mrf.mxu3 }
 0xb20   : > { %v4333_v6 = vadd.f32 %v4332_v50, %v4227_v26  ;;  %v4347_v1 = vadd.f32 %v4346_v58, %v4227_v26  ;;  %p5466_p12 = pnand %p5465_p11, %p5855_p5  ;;  %p5471_p2 = por %p5470_p1, %p5469_p0 }
 0xb21   : > { %4511 = vperm.xlu1 %5334, %v4481_v35  }
 0xb22   : > { %v4403_v27 = vmax.f32 %v4305_v29, %v4333_v6  ;;  %v4404_v5 = vmax.f32 %v4319_v39, %v4347_v1  ;;  %p5467_p13 = pneg %p5466_p12 }
 0xb24   : > { %v4405_v48 = vmax.f32 %v4403_v27, %v4404_v5  ;;  %p5472_p3 = pnand %p5471_p2, %p5467_p13 }
 0xb26   : > { %4406 = vmax.xlane.f32.xlu2 %v4405_v48 }
 0xb27   : > { %v4544_v27 = vpop.f32.mrf.mxu2  ;;  %v4563_v5 = vpop.f32.mrf.mxu3 }
 0xb32   : > { %4506 = vperm.xlu0 %5333, %v4480_v44  }
 0xb73   : > { %v4353_v18 = vpop.xlane.xlu1 %4352 }
 0xb74   : > { %v4359_v57 = vmul.f32 %v4353_v18, %v4059_v55  ;;  %v4565_v18 = vpop.f32.mrf.mxu3 }
 0xb76   : > { %v4361_v45 = vadd.f32 %v4359_v57, %v4061_v62 }
 0xb78   : > { %v4363_v26 = vmax.f32 %v4361_v45, 0.0 }
 0xb7b   : > { %v4358_v32 = vpop.xlane.xlu2 %4357 }
 0xb7c   : > { %v4360_v49 = vmul.f32 %v4358_v32, %v4060_v2 }
 0xb7e   : > { %v4362_v54 = vadd.f32 %v4360_v49, %v4062_v34 }
 0xb80   : > { %v4364_v61 = vmax.f32 %v4362_v54, 0.0 }
 0xb82   : > { %v4365_v7 = vpack.c.bf16 %v4364_v61, %v4363_v26 }
 0xb84   : > { %4381 = vmatpush.bf16.msra.mxu0 %v4365_v7 }
 0xb87   : > { %5183 = vmatmul.msk.bf16.vlgmr.msra.gmra.mxu0 %vm1780_vm2, %v5240_v59 }
 0xb88   : > { %4579 = vmatpush.bf16.msrb.mxu0 %v4493_v19 }
 0xb8b   : > { %v7309_v49 = vpop.permute.xlu1 %4501 }
 0xb8c   : > { %4580 = vmatpush.bf16.msrb.mxu0 %v7631_v46 }
 0xb90   : > { %4655 = vmatpush.bf16.msra.mxu0 %v7632_v63 }
 0xb91   : > { %v4402_v60 = vpop.xlane.xlu0 %4401 }
 0xb92   : > { %v4408_v10 = vmul.f32 %v4402_v60, %v4059_v55  ;;  %v4546_v55 = vpop.f32.mrf.mxu2 }
 0xb93   : > { %v7313_v63 = vpop.permute.xlu1 %4511 }
 0xb94   : > { %4656 = vmatpush.bf16.msra.mxu0 %v4489_v42  ;;  %v4410_v22 = vadd.f32 %v4408_v10, %v4061_v62 }
 0xb96   : > { %v4412_v38 = vmax.f32 %v4410_v22, 0.0 }
 0xb97   : > { %5197 = vmatmul.msk.bf16.vlgmr.msrb.gmra.mxu0 %vm2794_vm3, %v7234_v24 }
 0xb99   : > { %v4407_v52 = vpop.xlane.xlu2 %4406 }
 0xb9a   : > { %v4409_v19 = vmul.f32 %v4407_v52, %v4060_v2  ;;  %v4549_v2 = vpop.f32.mrf.mxu2 }
 0xb9c   : > { %v4411_v13 = vadd.f32 %v4409_v19, %v4062_v34  ;;  %v4568_v34 = vpop.f32.mrf.mxu3 }
 0xb9e   : > { %v4413_v20 = vmax.f32 %v4411_v13, 0.0  ;;  %v4545_v13 = vadd.f32 %v4544_v27, %v7309_v49 }
 0xba0   : > { %v4414_v40 = vpack.c.bf16 %v4413_v20, %v4412_v38  ;;  %v4564_v38 = vadd.f32 %v4563_v5, %v7309_v49 }
 0xba2   : > { %4422 = vmatpush.bf16.msra.mxu1 %v4414_v40  ;;  %v4551_v54 = vpop.f32.mrf.mxu2  ;;  %v4550_v40 = vadd.f32 %v4549_v2, %v7313_v63 }
 0xba4   : > { %v4570_v26 = vpop.f32.mrf.mxu3  ;;  %v7311_v46 = vpop.permute.xlu0 %4506 }
 0xba5   : > { %5184 = vmatmul.msk.bf16.vlgmr.msra.gmra.mxu1 %vm1780_vm2, %v5240_v59 }
 0xba6   : > { %4598 = vmatpush.bf16.msrb.mxu1 %v7634_v51  ;;  %v4569_v51 = vadd.f32 %v4568_v34, %v7313_v63 }
 0xba7   : > { %5198 = vmatmul.msk.bf16.gmra.mxu0 %vm2794_vm3, %v7241_v15 }
 0xbaa   : > { %4599 = vmatpush.bf16.msrb.mxu1 %v7635_v43  ;;  %v7315_v60 = vpop.f32.mrf.mxu2 }
 0xbac   : > { %v7317_v10 = vpop.f32.mrf.mxu3 }
 0xbae   : > { %4674 = vmatpush.bf16.msra.mxu1 %v7636_v28  ;;  %v4547_v28 = vadd.f32 %v4546_v55, %v7311_v46 }
 0xbb2   : > { %4675 = vmatpush.bf16.msra.mxu1 %v4490_v30 }
 0xbb5   : > { %5199 = vmatmul.msk.bf16.vlgmr.msrb.gmra.mxu1 %vm2794_vm3, %v7234_v24 }
 0xbb7   : > { %5205 = vmatmul.msk.bf16.vlgmr.msra.gmra.mxu0 %vm2794_vm3, %v7234_v24 }
 0xbc5   : > { %5200 = vmatmul.msk.bf16.gmra.mxu1 %vm2794_vm3, %v7241_v15 }
 0xbc7   : > { %5206 = vmatmul.msk.bf16.gmra.mxu0 %vm2794_vm3, %v7241_v15 }
 0xbd5   : > { %5207 = vmatmul.msk.bf16.vlgmr.msra.gmra.mxu1 %vm2794_vm3, %v7234_v24 }
 0xbe5   : > { %5208 = vmatmul.msk.bf16.gmra.mxu1 %vm2794_vm3, %v7241_v15 }
 0xc04   : > { %v4383_v11 = vpop.f32.mrf.mxu0 }
 0xc05   : > { %v4384_v8 = vadd.f32 %v4383_v11, %v4065_v25 }
 0xc07   : > { %v4388_v47 = vsub.f32 0.0, %v4384_v8 }
 0xc09   : > { %v4390_v31 = vmul.f32 1.442695, %v4388_v47 }
 0xc0b   : > { %5432 = vpow2.f32 %v4390_v31 }
 0xc0c   : > { %v4385_v3 = vpop.f32.mrf.mxu0 }
 0xc0d   : > { %v4386_v23 = vadd.f32 %v4385_v3, %v4066_v16 }
 0xc0f   : > { %v4389_v37 = vsub.f32 0.0, %v4386_v23 }
 0xc11   : > { %v5433_v42 = vpop.eup %5432  ;;  %v4392_v30 = vmul.f32 1.442695, %v4389_v37 }
 0xc12   : > { %v4394_v41 = vadd.f32 1.0, %v5433_v42 }
 0xc13   : > { %5434 = vpow2.f32 %v4392_v30 }
 0xc14   : > { %5436 = vrcp.f32 %v4394_v41  ;;  %v4582_v48 = vpop.f32.mrf.mxu0 }
 0xc15   : > { %v4583_v52 = vadd.f32 %v4582_v48, %v7309_v49  ;;  %v4719_v48 = vld [vmem:[%s5805_s20] sm:$0x1] }
 0xc19   : > { %v5435_v24 = vpop.eup %5434 }
 0xc1a   : > { %v5437_v56 = vpop.eup %5436  ;;  %v4395_v15 = vadd.f32 1.0, %v5435_v24 }
 0xc1b   : > { %4451 = vperm.xlu2 %5335, %v5437_v56  }
 0xc1c   : > { %5438 = vrcp.f32 %v4395_v15  ;;  %v4584_v57 = vpop.f32.mrf.mxu0 }
 0xc22   : > { %v4424_v12 = vpop.f32.mrf.mxu1  ;;  %v5439_v36 = vpop.eup %5438 }
 0xc23   : > { %v4425_v17 = vadd.f32 %v4424_v12, %v4065_v25  ;;  %4456 = vperm.xlu0 %5333, %v5439_v36   ;;  %4516 = vperm.xlu2 %5335, %v4482_v21   ;;  %v4566_v25 = vadd.f32 %v4565_v18, %v7311_v46 }
 0xc24   : > { %v4587_v32 = vpop.f32.mrf.mxu0 }
 0xc25   : > { %v4429_v14 = vsub.f32 0.0, %v4425_v17  ;;  %v4588_v3 = vadd.f32 %v4587_v32, %v7313_v63 }
 0xc27   : > { %v4431_v33 = vmul.f32 1.442695, %v4429_v14 }
 0xc29   : > { %5440 = vpow2.f32 %v4431_v33 }
 0xc2a   : > { %v4426_v4 = vpop.f32.mrf.mxu1 }
 0xc2b   : > { %v4427_v9 = vadd.f32 %v4426_v4, %v4066_v16  ;;  %4731 = vperm.xlu2 %5335, %v4720_v53   ;;  %v4585_v16 = vadd.f32 %v4584_v57, %v7311_v46 }
 0xc2c   : > { %v4589_v61 = vpop.f32.mrf.mxu0 }
 0xc2d   : > { %v4430_v0 = vsub.f32 0.0, %v4427_v9 }
 0xc2f   : > { %v5441_v50 = vpop.eup %5440  ;;  %v4433_v58 = vmul.f32 1.442695, %v4430_v0 }
 0xc30   : > { %v4435_v29 = vadd.f32 1.0, %v5441_v50 }
 0xc31   : > { %5442 = vpow2.f32 %v4433_v58 }
 0xc32   : > { %5444 = vrcp.f32 %v4435_v29  ;;  %v4601_v44 = vpop.f32.mrf.mxu1 }
 0xc33   : > { %v4602_v22 = vadd.f32 %v4601_v44, %v7309_v49 }
 0xc34   : > { %v4658_v19 = vpop.f32.mrf.mxu0 }
 0xc35   : > { %v4659_v2 = vadd.f32 %v4658_v19, %v7309_v49 }
 0xc37   : > { %v5443_v39 = vpop.eup %5442 }
 0xc38   : > { %v5445_v6 = vpop.eup %5444  ;;  %v4436_v1 = vadd.f32 1.0, %v5443_v39 }
 0xc39   : > { %4441 = vperm.xlu0 %5333, %v5445_v6  }
 0xc3a   : > { %5446 = vrcp.f32 %v4436_v1  ;;  %v4603_v62 = vpop.f32.mrf.mxu1  ;;  %v4622_v1 = vpop.f32.mrf.mxu2 }
 0xc3b   : > { %v4604_v23 = vadd.f32 %v4603_v62, %v7311_v46 }
 0xc3c   : > { %v4660_v27 = vpop.f32.mrf.mxu0 }
 0xc40   : > { %v5447_v35 = vpop.eup %5446 }
 0xc41   : > { %4446 = vperm.xlu1 %5334, %v5447_v35   ;;  %v4641_v35 = vpop.f32.mrf.mxu3 }
 0xc42   : > { %v4606_v45 = vpop.f32.mrf.mxu1  ;;  %v4625_v44 = vpop.f32.mrf.mxu2  ;;  %v4642_v19 = vadd.f32 %v4641_v35, %v7311_v46 }
 0xc43   : > { %v4607_v37 = vadd.f32 %v4606_v45, %v7313_v63 }
 0xc44   : > { %v4663_v18 = vpop.f32.mrf.mxu0 }
 0xc49   : > { %v4644_v55 = vpop.f32.mrf.mxu3 }
 0xc4a   : > { %v4608_v7 = vpop.f32.mrf.mxu1  ;;  %v4627_v32 = vpop.f32.mrf.mxu2 }
 0xc51   : > { %v4646_v45 = vpop.f32.mrf.mxu3 }
 0xc52   : > { %v4677_v20 = vpop.f32.mrf.mxu1 }
 0xc53   : > { %v4678_v34 = vadd.f32 %v4677_v20, %v7309_v49 }
 0xc5a   : > { %v4679_v5 = vpop.f32.mrf.mxu1 }
 0xc62   : > { %v4682_v57 = vpop.f32.mrf.mxu1 }
 0xc75   : > { %v4452_v59 = vpop.permute.xlu2 %4451 }
 0xc76   : > { %v4687_v11 = vmul.f32 %v4545_v13, %v4452_v59  ;;  %v4688_v8 = vmul.f32 %v4564_v38, %v4452_v59  ;;  %v4689_v47 = vmul.f32 %v4583_v52, %v4452_v59  ;;  %v4690_v31 = vmul.f32 %v4602_v22, %v4452_v59 }
 0xc77   : > { %v4626_v59 = vadd.f32 %v4625_v44, %v7313_v63  ;;  %v4645_v52 = vadd.f32 %v4644_v55, %v7313_v63  ;;  %v4623_v22 = vadd.f32 %v4622_v1, %v7311_v46 }
 0xc78   : > { %v4703_v36 = vadd.f32 %v4687_v11, %v4550_v40  ;;  %v4704_v14 = vadd.f32 %v4688_v8, %v4569_v51  ;;  %v4705_v33 = vadd.f32 %v4689_v47, %v4588_v3  ;;  %v4706_v4 = vadd.f32 %v4690_v31, %v4607_v37 }
 0xc79   : > { %v4661_v51 = vadd.f32 %v4660_v27, %v7311_v46 }
 0xc7d   : > { %v7325_v43 = vpop.permute.xlu2 %4516 }
 0xc7e   : > { %v4552_v30 = vadd.f32 %v4551_v54, %v7325_v43  ;;  %v4571_v41 = vadd.f32 %v4570_v26, %v7325_v43  ;;  %v4590_v24 = vadd.f32 %v4589_v61, %v7325_v43  ;;  %v4609_v56 = vadd.f32 %v4608_v7, %v7325_v43  ;;  %v4665_v61 = vpop.f32.mrf.mxu0  ;;  %v4684_v7 = vpop.f32.mrf.mxu1 }
 0xc7f   : > { %v4621_v54 = vadd.f32 %v7315_v60, %v7309_v49  ;;  %v4640_v26 = vadd.f32 %v7317_v10, %v7309_v49  ;;  %v4664_v60 = vadd.f32 %v4663_v18, %v7313_v63  ;;  %v4680_v49 = vadd.f32 %v4679_v5, %v7311_v46 }
 0xc80   : > { %v4683_v10 = vadd.f32 %v4682_v57, %v7313_v63  ;;  %v4647_v11 = vadd.f32 %v4646_v45, %v7325_v43  ;;  %v4666_v8 = vadd.f32 %v4665_v61, %v7325_v43  ;;  %v4685_v47 = vadd.f32 %v4684_v7, %v7325_v43 }
 0xc95   : > { %v4457_v42 = vpop.permute.xlu0 %4456 }
 0xc96   : > { %v4695_v15 = vmul.f32 %v4547_v28, %v4457_v42  ;;  %v4696_v12 = vmul.f32 %v4566_v25, %v4457_v42  ;;  %v4697_v21 = vmul.f32 %v4585_v16, %v4457_v42  ;;  %v4698_v17 = vmul.f32 %v4604_v23, %v4457_v42 }
 0xc97   : > { %v4628_v25 = vadd.f32 %v4627_v32, %v7325_v43 }
 0xc98   : > { %v4711_v53 = vadd.f32 %v4695_v15, %v4552_v30  ;;  %v4712_v9 = vadd.f32 %v4696_v12, %v4571_v41  ;;  %v4713_v0 = vadd.f32 %v4697_v21, %v4590_v24  ;;  %v4714_v50 = vadd.f32 %v4698_v17, %v4609_v56 }
 0xc9a   : > { %v4721_v58 = vpack.c.bf16 %v4711_v53, %v4703_v36  ;;  %v4722_v29 = vpack.c.bf16 %v4712_v9, %v4704_v14  ;;  %v4723_v39 = vpack.c.bf16 %v4713_v0, %v4705_v33  ;;  %v4724_v6 = vpack.c.bf16 %v4714_v50, %v4706_v4  ;;  %v4732_v14 = vpop.permute.xlu2 %4731 }
 0xc9c   : > { %4744 = vmatpush.bf16.msra.mxu2 %v4721_v58  ;;  %4757 = vmatpush.bf16.msra.mxu3 %v4722_v29 }
 0xc9d   : > { %4770 = vmatpush.bf16.msrb.mxu0 %v4723_v39  ;;  %4783 = vmatpush.bf16.msrb.mxu1 %v4724_v6 }
 0xc9f   : > { %5209 = vmatmul.msk.bf16.vlgmr.msra.gmra.mxu2 %vm1780_vm2, %v4719_v48  ;;  %5210 = vmatmul.msk.bf16.vlgmr.msra.gmra.mxu3 %vm1780_vm2, %v4719_v48 }
 0xca0   : > { %5211 = vmatmul.msk.bf16.vlgmr.msrb.gmra.mxu0 %vm1780_vm2, %v4719_v48  ;;  %5212 = vmatmul.msk.bf16.vlgmr.msrb.gmra.mxu1 %vm1780_vm2, %v4719_v48 }
 0xcab   : > { %v4442_v62 = vpop.permute.xlu0 %4441 }
 0xcac   : > { %v4691_v13 = vmul.f32 %v4621_v54, %v4442_v62  ;;  %v4692_v38 = vmul.f32 %v4640_v26, %v4442_v62  ;;  %v4693_v20 = vmul.f32 %v4659_v2, %v4442_v62  ;;  %v4694_v40 = vmul.f32 %v4678_v34, %v4442_v62 }
 0xcae   : > { %v4707_v37 = vadd.f32 %v4691_v13, %v4626_v59  ;;  %v4708_v42 = vadd.f32 %v4692_v38, %v4645_v52  ;;  %v4709_v30 = vadd.f32 %v4693_v20, %v4664_v60  ;;  %v4710_v41 = vadd.f32 %v4694_v40, %v4683_v10 }
 0xcb3   : > { %v4447_v28 = vpop.permute.xlu1 %4446 }
 0xcb4   : > { %v4699_v31 = vmul.f32 %v4623_v22, %v4447_v28  ;;  %v4700_v16 = vmul.f32 %v4642_v19, %v4447_v28  ;;  %v4701_v3 = vmul.f32 %v4661_v51, %v4447_v28  ;;  %v4702_v23 = vmul.f32 %v4680_v49, %v4447_v28 }
 0xcb6   : > { %v4715_v46 = vadd.f32 %v4699_v31, %v4628_v25  ;;  %v4716_v24 = vadd.f32 %v4700_v16, %v4647_v11  ;;  %v4717_v63 = vadd.f32 %v4701_v3, %v4666_v8  ;;  %v4718_v56 = vadd.f32 %v4702_v23, %v4685_v47 }
 0xcb8   : > { %v4725_v15 = vpack.c.bf16 %v4715_v46, %v4707_v37  ;;  %v4726_v12 = vpack.c.bf16 %v4716_v24, %v4708_v42  ;;  %v4727_v21 = vpack.c.bf16 %v4717_v63, %v4709_v30  ;;  %v4728_v17 = vpack.c.bf16 %v4718_v56, %v4710_v41 }
 0xcba   : > { %4796 = vmatpush.bf16.msrb.mxu2 %v4725_v15  ;;  %4809 = vmatpush.bf16.msrb.mxu3 %v4726_v12 }
 0xcbb   : > { %4822 = vmatpush.bf16.msra.mxu0 %v4727_v21  ;;  %4835 = vmatpush.bf16.msra.mxu1 %v4728_v17 }
 0xcbd   : > { %5213 = vmatmul.msk.bf16.vlgmr.msrb.gmra.mxu2 %vm1780_vm2, %v4719_v48  ;;  %5214 = vmatmul.msk.bf16.vlgmr.msrb.gmra.mxu3 %vm1780_vm2, %v4719_v48 }
 0xcbe   : > { %5215 = vmatmul.msk.bf16.vlgmr.msra.gmra.mxu0 %vm1780_vm2, %v4719_v48  ;;  %5216 = vmatmul.msk.bf16.vlgmr.msra.gmra.mxu1 %vm1780_vm2, %v4719_v48 }
 0xd1d   : > { %v4772_v43 = vpop.f32.mrf.mxu0  ;;  %v4785_v36 = vpop.f32.mrf.mxu1 }
 0xd1e   : > { %v4773_v33 = vadd.f32 %v4772_v43, %v4732_v14  ;;  %v4786_v4 = vadd.f32 %v4785_v36, %v4732_v14 }
 0xd20   : > { %v4850_v0 = vrot.slane %v4773_v33, 4  ;;  %v4851_v50 = vrot.slane %v4786_v4, 2 }
 0xd22   : > { %v4746_v53 = vpop.f32.mrf.mxu2  ;;  %v4759_v9 = vpop.f32.mrf.mxu3  ;;  %v4857_v35 = vsel %vm4856_vm4, %v4850_v0, %v4851_v50 }
 0xd23   : > { %v4760_v58 = vadd.f32 %v4759_v9, %v4732_v14  ;;  %v4747_v29 = vadd.f32 %v4746_v53, %v4732_v14 }
 0xd25   : > { %v4849_v39 = vrot.slane %v4760_v58, 6  ;;  %v4774_v6 = vpop.f32.mrf.mxu0  ;;  %v4787_v1 = vpop.f32.mrf.mxu1 }
 0xd27   : > { %v4855_v27 = vsel %vm1527_vm0, %v4747_v29, %v4849_v39 }
 0xd28   : > { %v4859_v5 = vsel %vm4858_vm5, %v4855_v27, %v4857_v35 }
 0xd29   : > { %4865 = vst [vmem:[%s1456_s5] sm:$0xff] %v4859_v5 }
 0xd2a   : > { %v4748_v48 = vpop.f32.mrf.mxu2  ;;  %v4761_v44 = vpop.f32.mrf.mxu3 }
 0xd3b   : > { %v4824_v55 = vpop.f32.mrf.mxu0  ;;  %v4837_v18 = vpop.f32.mrf.mxu1 }
 0xd3c   : > { %v4825_v57 = vadd.f32 %v4824_v55, %v4732_v14  ;;  %v4838_v62 = vadd.f32 %v4837_v18, %v4732_v14 }
 0xd3e   : > { %v4853_v32 = vrot.slane %v4825_v57, 4  ;;  %v4854_v45 = vrot.slane %v4838_v62, 2 }
 0xd40   : > { %v4798_v2 = vpop.f32.mrf.mxu2  ;;  %v4811_v34 = vpop.f32.mrf.mxu3  ;;  %v4861_v52 = vsel %vm4856_vm4, %v4853_v32, %v4854_v45 }
 0xd41   : > { %v4812_v54 = vadd.f32 %v4811_v34, %v4732_v14  ;;  %v4799_v26 = vadd.f32 %v4798_v2, %v4732_v14 }
 0xd43   : > { %v4852_v61 = vrot.slane %v4812_v54, 6  ;;  %v4826_v7 = vpop.f32.mrf.mxu0  ;;  %v4839_v59 = vpop.f32.mrf.mxu1 }
 0xd45   : > { %v4860_v22 = vsel %vm1527_vm0, %v4799_v26, %v4852_v61 }
 0xd46   : > { %v4862_v19 = vsel %vm4858_vm5, %v4860_v22, %v4861_v52 }
 0xd47   : > { %4866 = vst [vmem:[%s1456_s5 + $0x8] sm:$0xff] %v4862_v19 }
 0xd48   : > { %v4800_v13 = vpop.f32.mrf.mxu2  ;;  %v4813_v38 = vpop.f32.mrf.mxu3 }
 0xd49   : > { %5475 = shalt.err (!%p5472_p3)
}
 0xd4a   : > { %5244 = dma.vmem_to_hbm [thread:$0]  (%p5855_p5), %s4882_s8, 256, %s4884_s9, %s4868_s6  }
 0xd4b PF: > { %p5250_p4 = scmp.ge.s32.totalorder %s5510_s15, 2  ;;  %s4895_s5 = sand.u32 1, %s5498_s7  }
 0xd4c   : > { %s4896_s3 = scalar_lea.sflag [#allocation3], %s4895_s5 }
 0xd4d   : > { %p5247_p7 = pnand %p5250_p4, %p5859_p6 }
 0xd4f   : > { %p5248_p8 = pneg %p5247_p7 }
 0xd51   : > { %5493 = dma.done.wait (%p5248_p8), %s4896_s3, 256  }
 0xd52   : > { %5495 = vsyncadd (%p5248_p8), %s4896_s3, 4294967040  ;;  %p109_p9 = scmp.ge.s32.totalorder %s5842_s18, 4   ;;  %s7638_s7 = smov %s5502_s10 }
 0xd53   : > { %s7639_s10 = smov %s5506_s11  ;;  %s7640_s11 = smov %s5853_s26 }
 0xd54   : > { %s7641_s15 = smov %s5842_s18  ;;  %111 = sbr.rel (!%p109_p9) target bundleno = 109 (0x6d), region = 303 }
 0xd59   :  { %4902 = vsyncpa [#allocation3], 1 }
 0xd5a   :  { %4904 = vsyncpa [#allocation3 + $0x1], 1 }

</bundles_post_ra>
